<compile_context>
chip_gen: v5e
topology: v5e:2x2
jax: 0.10.0
libtpu: 0.0.40
codegen_flags: <defaults>
</compile_context>

<pallas_src>
import jax
import jax.numpy as jnp
from jax.experimental import pallas as pl
from jax.experimental.pallas import tpu as pltpu

_SMALL_N = 1 << 18            # below this, XLA-fused add beats a custom call
_TARGET_TILE_BYTES = 2 << 20  # ~2 MiB/tile -> 12 MiB double-buffered total


def _sum_kernel(a_ref, b_ref, o_ref):
    # One VPU add over a lane-dense (bm, cols) VMEM tile.
    o_ref[...] = a_ref[...] + b_ref[...]


def _round_up(x: int, m: int) -> int:
    return ((x + m - 1) // m) * m


def sum_layer(a: jax.Array, b: jax.Array) -> jax.Array:
    """Pallas equivalent of Sum_Layer.forward([a, b]) == torch.add(a, b)."""
    assert a.shape == b.shape and a.dtype == b.dtype
    orig_shape = a.shape
    n = a.size
    itemsize = jnp.dtype(a.dtype).itemsize

    # Tiny inputs (incl. the module's actual (2, 8, 32)): let XLA fuse it.
    if n < _SMALL_N:
        return a + b

    # ---- Lane-dense 2-D slab.  Pick the widest lane count that divides n so
    # the common path is a pure (free) reshape; pad only if nothing divides.
    cols = None
    for c in (512, 256, 128):
        if n % c == 0:
            cols = c
            break
    if cols is None:
        cols = 512
        pad = cols - (n % cols)
        a_flat = jnp.pad(a.reshape(-1), (0, pad))
        b_flat = jnp.pad(b.reshape(-1), (0, pad))
        sliced = True
    else:
        a_flat = a.reshape(-1)
        b_flat = b.reshape(-1)
        sliced = False

    rows = a_flat.size // cols
    a2 = a_flat.reshape(rows, cols)
    b2 = b_flat.reshape(rows, cols)

    # ---- Tile rows: ~2 MiB per tile, multiple of 8 sublanes; guarantee at
    # least 2 grid blocks so v7x's two TensorCores both get work.
    if rows <= 8:
        bm = rows  # full extent (exempt from the (8,128) divisibility rule)
    else:
        bm = max(8, (_TARGET_TILE_BYTES // (cols * itemsize)) // 8 * 8)
        if bm >= rows:
            bm = min(rows, max(8, _round_up(pl.cdiv(rows, 2), 8)))

    grid = (pl.cdiv(rows, bm),)  # ragged last block -> masked loads/stores
    spec = pl.BlockSpec((bm, cols), lambda i: (i, 0))

    out2 = pl.pallas_call(
        _sum_kernel,
        out_shape=jax.ShapeDtypeStruct((rows, cols), a.dtype),
        grid=grid,
        in_specs=[spec, spec],
        out_specs=spec,
        compiler_params=pltpu.CompilerParams(
            dimension_semantics=("parallel",),
        ),
        cost_estimate=pl.CostEstimate(
            flops=n, transcendentals=0, bytes_accessed=3 * n * itemsize),
    )(a2, b2)

    out_flat = out2.reshape(-1)
    if sliced:
        out_flat = out_flat[:n]
    return out_flat.reshape(orig_shape)


if __name__ == "__main__":
    key = jax.random.PRNGKey(0)
    k1, k2, k3, k4, k5, k6 = jax.random.split(key, 6)

    # Shapes implied by the module's use: (batch, seq, hidden) = (2, 8, 32).
    # This hits the tiny-input fast path (plain fused add), as recommended.
    B, S, H = 2, 8, 32
    x0 = jax.random.normal(k1, (B, S, H), dtype=jnp.float32)
    x1 = jax.random.normal(k2, (B, S, H), dtype=jnp.float32)
    out_small = sum_layer(x0, x1)
    jax.block_until_ready(out_small)
    assert out_small.shape == x0.shape and out_small.dtype == x0.dtype
    assert jnp.allclose(out_small, x0 + x1, atol=1e-6, rtol=1e-6)

    # Non-toy case: exercises the Pallas path (cols=512, multiple grid blocks,
    # ragged last block handled by masking, no padding copy).
    y0 = jax.random.normal(k3, (4, 384, 1000), dtype=jnp.float32)
    y1 = jax.random.normal(k4, (4, 384, 1000), dtype=jnp.float32)
    out_big = sum_layer(y0, y1)
    jax.block_until_ready(out_big)
    assert jnp.allclose(out_big, y0 + y1, atol=1e-6, rtol=1e-6)

    # Indivisible element count: exercises the rare pad+slice fallback and the
    # "at least 2 blocks" tile selection.
    z0 = jax.random.normal(k5, (5, 333, 257), dtype=jnp.float32)
    z1 = jax.random.normal(k6, (5, 333, 257), dtype=jnp.float32)
    out_odd = sum_layer(z0, z1)
    jax.block_until_ready(out_odd)
    assert jnp.allclose(out_odd, z0 + z1, atol=1e-6, rtol=1e-6)

    print("KERNEL_OK")
</pallas_src>

<mosaic_0001>
module attributes {stable_mosaic.version = 11 : i64} {
  func.func @_sum_kernel(%arg0: i32, %arg1: memref<1024x512xf32, #tpu.memory_space<vmem>>, %arg2: memref<1024x512xf32, #tpu.memory_space<vmem>>, %arg3: memref<1024x512xf32, #tpu.memory_space<vmem>>) attributes {dimension_semantics = [#tpu.dimension_semantics<parallel>], iteration_bounds = array<i64: 3>, scalar_prefetch = 0 : i64, scratch_operands = 0 : i64, tpu.core_type = #tpu.core_type<tc>, window_params = [{transform_indices = @transform_0, window_bounds = array<i64: 1024, 512>}, {transform_indices = @transform_1, window_bounds = array<i64: 1024, 512>}, {transform_indices = @transform_2, window_bounds = array<i64: 1024, 512>}]} {
    %c0 = arith.constant 0 : index
    %c0_0 = arith.constant 0 : index
    %0 = vector.load %arg1[%c0, %c0_0] : memref<1024x512xf32, #tpu.memory_space<vmem>>, vector<1024x512xf32>
    %c0_1 = arith.constant 0 : index
    %c0_2 = arith.constant 0 : index
    %1 = vector.load %arg2[%c0_1, %c0_2] : memref<1024x512xf32, #tpu.memory_space<vmem>>, vector<1024x512xf32>
    %2 = arith.addf %0, %1 : vector<1024x512xf32>
    %c0_3 = arith.constant 0 : index
    %c0_4 = arith.constant 0 : index
    %3 = vector.load %arg3[%c0_3, %c0_4] : memref<1024x512xf32, #tpu.memory_space<vmem>>, vector<1024x512xf32>
    tpu.vector_store %arg3[%c0_3, %c0_4], %2 {strides = array<i32>} : memref<1024x512xf32, #tpu.memory_space<vmem>>, vector<1024x512xf32>,
    return
  }
  func.func @transform_0(%arg0: i32) -> (i32, i32) {
    %c0_i32 = arith.constant 0 : i32
    %c0_i32_0 = arith.constant 0 : i32
    return %arg0, %c0_i32 : i32, i32
  }
  func.func @transform_1(%arg0: i32) -> (i32, i32) {
    %c0_i32 = arith.constant 0 : i32
    %c0_i32_0 = arith.constant 0 : i32
    return %arg0, %c0_i32 : i32, i32
  }
  func.func @transform_2(%arg0: i32) -> (i32, i32) {
    %c0_i32 = arith.constant 0 : i32
    %c0_i32_0 = arith.constant 0 : i32
    return %arg0, %c0_i32 : i32, i32
  }
}

</mosaic_0001>

<bundles_post_ra>
// kernel: tpu_custom_call.1
= control target key start
LH: loop header
LB: loop body
LE: loop exit
PB: predicated region body
PF: predicated region fallthrough
CT: control target
= control target key end

     0   :  { %7 = vsyncpa [#allocation3], 0  ;;  %s4458_s0 = inlined_call_operand.hbm [shape: f32[3000,512], index: 0, kind: input, shape index: {}]   ;;  %s4459_s1 = inlined_call_operand.hbm [shape: f32[3000,512], index: 1, kind: input, shape index: {}]   ;;  %s4460_s2 = inlined_call_operand.hbm [shape: f32[3000,512], index: 2, kind: output, shape index: {}]  }
   0x1   :  { %9 = vsyncpa [#allocation3 + $0x1], 0 }
   0x2   :  { %10 = vsyncpa [#allocation6], 0 }
   0x3   :  { %12 = vsyncpa [#allocation6 + $0x1], 0 }
   0x4   :  { %13 = vsyncpa [#allocation4], 0 }
   0x5   :  { %15 = vsyncpa [#allocation4 + $0x1], 0  ;;  %s2687_s9 = smov 0   ;;  %s2689_s10 = smov 0  }
   0x6   :  { %s2691_s11 = smov 0   ;;  %s2693_s12 = smov 0  }
   0x7 LB: > { %s2708_s13 = sadd.s32 4294967295, %s2661_s12   ;;  %s2411_s14 = sadd.s32 4294967294, %s2661_s12   ;;  %s2661_s12 = sphi %s2693_s12, %s4472_s12   ;;  %s2657_s11 = sphi %s2691_s11, %s4471_s11   ;;  %s2653_s10 = sphi %s2689_s10, %s4470_s10   ;;  %s2649_s9 = sphi %s2687_s9, %s4469_s9  }
   0x8   : > { %s2712_s15 = sadd.s32 1, %s2661_s12   ;;  %s28_s16 = sadd.s32 1, %s2657_s11 }
   0x9   : > { %s25_s17 = ssub.s32 %s2661_s12, %s2712_s15  ;;  %p35_p0 = scmp.ne.s32.totalorder %s2657_s11, %s2653_s10 }
   0xa   : > { %p26_p1 = scmp.eq.s32.totalorder %s25_s17, 0  ;;  %p36_p2 = scmp.eq.s32.totalorder %s2661_s12, 0 }
   0xb   : > { %p41_p3 = scmp.ne.s32.totalorder %s2653_s10, %s2649_s9  ;;  %p42_p4 = scmp.eq.s32.totalorder %s2708_s13, 0 }
   0xc   : > { %s2724_s18 = scalar_select %p26_p1, %s2657_s11, %s28_s16  }
   0xd   : > { %p2726_p5 = por %p36_p2, %p35_p0  ;;  %p2730_p6 = por %p42_p4, %p41_p3 }
   0xe   : > { %p91_p7 = scmp.eq.s32.totalorder %s2708_s13, 2  ;;  %p97_p8 = scmp.eq.s32.totalorder %s2411_s14, 2 }
   0xf   : > { %p2413_p11 = scmp.ge.s32.totalorder %s2661_s12, 3 }
  0x10   : > { %p2735_p9 = por %p91_p7, %p35_p0  ;;  %p2739_p10 = por %p97_p8, %p41_p3 }
  0x11   : > { %113 = sbr.rel (%p2413_p11) target bundleno = 94 (0x5e), region = 16 }
  0x12   : > { %s4464_s22 = scalar_select %p2739_p10, 1, 0 }
  0x16   : > { %116 = sbr.rel (!%p2726_p5) target bundleno = 58 (0x3a), region = 20  ;;  %s117_s23 = sand.u32 (%p2726_p5), 1, %s2657_s11  }
  0x17   : > { %s2415_s24 = sshll.u32 (%p2726_p5), %s2661_s12, 7  ;;  %s2414_s25 = sshll.u32 (%p2726_p5), %s117_s23, 12 }
  0x18   : > { %s123_s26 = ssub.s32 (%p2726_p5), 375, %s2415_s24  ;;  %s2751_s30 = scalar_lea.sflag (%p2726_p5), [#allocation3], %s117_s23 }
  0x19   : > { %p124_p12 = scmp.lt.s32.totalorder (%p2726_p5), %s123_s26, 128  ;;  %s121_s3 = scalar_lea.vmem (%p2726_p5), [#allocation2], %s2414_s25 }
  0x1b   : > { %s4474_s26 = smov (!%p124_p12, %s123_s26), 128 }
  0x1c   : > { %s2447_s27 = sshll.u32 %s4474_s26, 5 }
  0x1d   : > { %s128_s28 = ssub.s32 4096, %s2447_s27 }
  0x1e   : > { %s129_s29 = sshll.u32 %s128_s28, 4 }
  0x1f   : > { %130 = vsyncadd %s2751_s30, %s129_s29  ;;  %p2754_p13 = scmp.ne.s32.totalorder %s2447_s27, 0  ;;  %s2449_s5 = sshll.u32 %s2661_s12, 12 }
  0x20   : > { %s134_s8 = scalar_lea.hbm %s4458_s0, %s2449_s5  ;;  %s2762_s14 = sshll.u32 %s121_s3, 4  ;;  %s139_s14 = int_to_ptr.vmem [resolvable:$true] %s2762_s14 }
  0x21   : > { %s136_s16 = sshll.u32 %s134_s8, 4  ;;  %s2422_s17 = sshll.u32 %s4474_s26, 9  ;;  %s2765_s16 = int_to_ptr.hbm [resolvable:$true] %s136_s16 }
  0x22   : > { %s2502_s23 = sshra.s32 %s2765_s16, 4  ;;  %s2504_s24 = sshrl.u32 %s2422_s17, 4  ;;  %s2503_s23 = int_to_ptr.hbm [resolvable:$true] %s2502_s23 }
  0x23   : > { %s2509_s25 = scalar_lea.hbm %s2503_s23, %s2504_s24  ;;  %s2513_s29 = scalar_lea.hbm %s4458_s0, 12000 }
  0x24   : > { %p2510_p0 = scmp.ne.s32.totalorder %s2503_s23, %s2509_s25  ;;  %p2514_p3 = scmp.lt.s32.totalorder %s2503_s23, %s4458_s0 }
  0x25   : > { %p2515_p4 = scmp.lt.s32.totalorder %s2513_s29, %s2509_s25 }
  0x26   : > { %p2511_p1 = pnand %p2510_p0, %p2754_p13 }
  0x27   : > { %p2516_p7 = por %p2515_p4, %p2514_p3 }
  0x28   : > { %p2512_p2 = pneg %p2511_p1 }
  0x2a   : > { %p2517_p8 = pnand %p2516_p7, %p2512_p2 }
  0x2c   : > { %2520 = shalt.err (!%p2517_p8)
}
  0x2d   : > { %s2521_s6 = sshra.s32 %s139_s14, 4  ;;  %s2663_s8 = smov [#allocation2]   ;;  %s2522_s6 = int_to_ptr.vmem [resolvable:$true] %s2521_s6 }
  0x2e   : > { %s2528_s7 = scalar_lea.vmem %s2522_s6, %s2504_s24  ;;  %s2532_s27 = scalar_lea.vmem %s2663_s8, 8192 }
  0x2f   : > { %p2529_p11 = scmp.ne.s32.totalorder %s2522_s6, %s2528_s7  ;;  %p2534_p1 = scmp.lt.s32.totalorder %s2532_s27, %s2528_s7 }
  0x31   : > { %p2530_p12 = pnand %p2529_p11, %p2754_p13 }
  0x33   : > { %p2531_p0 = pneg %p2530_p12 }
  0x35   : > { %p2536_p10 = pnand %p2534_p1, %p2531_p0 }
  0x37   : > { %2539 = shalt.err (!%p2536_p10)
}
  0x38   : > { %s2664_s23 = smov 512   ;;  %s2665_s25 = smov 32  }
  0x39   : > { %144 = dma.hbm_to_vmem [thread:$0]  (%p2754_p13), %s2765_s16, %s2422_s17, %s139_s14, %s2751_s30, %s2664_s23, %s2664_s23, %s2665_s25  }
  0x3a PF: > { %147 = sbr.rel (!%p2726_p5) target bundleno = 94 (0x5e), region = 24  ;;  %s148_s24 = sand.u32 (%p2726_p5), 1, %s2657_s11  }
  0x3b   : > { %s2424_s28 = sshll.u32 (%p2726_p5), %s2661_s12, 7  ;;  %s2423_s29 = sshll.u32 (%p2726_p5), %s148_s24, 12 }
  0x3c   : > { %s154_s3 = ssub.s32 (%p2726_p5), 375, %s2424_s28  ;;  %s2798_s7 = scalar_lea.sflag (%p2726_p5), [#allocation6], %s148_s24 }
  0x3d   : > { %p155_p10 = scmp.lt.s32.totalorder (%p2726_p5), %s154_s3, 128  ;;  %s152_s26 = scalar_lea.vmem (%p2726_p5), [#allocation5], %s2423_s29 }
  0x3f   : > { %s4476_s3 = smov (!%p155_p10, %s154_s3), 128 }
  0x40   : > { %s2450_s5 = sshll.u32 %s4476_s3, 5 }
  0x41   : > { %s159_s6 = ssub.s32 4096, %s2450_s5 }
  0x42   : > { %s160_s4 = sshll.u32 %s159_s6, 4 }
  0x43   : > { %161 = vsyncadd %s2798_s7, %s160_s4  ;;  %p2801_p5 = scmp.ne.s32.totalorder %s2450_s5, 0  ;;  %s2452_s30 = sshll.u32 %s2661_s12, 12 }
  0x44   : > { %s165_s17 = scalar_lea.hbm %s4459_s1, %s2452_s30  ;;  %s2809_s8 = sshll.u32 %s152_s26, 4  ;;  %s170_s8 = int_to_ptr.vmem [resolvable:$true] %s2809_s8 }
  0x45   : > { %s167_s27 = sshll.u32 %s165_s17, 4  ;;  %s2431_s23 = sshll.u32 %s4476_s3, 9  ;;  %s2812_s27 = int_to_ptr.hbm [resolvable:$true] %s167_s27 }
  0x46   : > { %s2541_s25 = sshra.s32 %s2812_s27, 4  ;;  %s2543_s24 = sshrl.u32 %s2431_s23, 4  ;;  %s2542_s25 = int_to_ptr.hbm [resolvable:$true] %s2541_s25 }
  0x47   : > { %s2548_s28 = scalar_lea.hbm %s2542_s25, %s2543_s24  ;;  %s2552_s6 = scalar_lea.hbm %s4459_s1, 12000 }
  0x48   : > { %p2549_p13 = scmp.ne.s32.totalorder %s2542_s25, %s2548_s28  ;;  %p2553_p4 = scmp.lt.s32.totalorder %s2542_s25, %s4459_s1 }
  0x49   : > { %p2554_p7 = scmp.lt.s32.totalorder %s2552_s6, %s2548_s28 }
  0x4a   : > { %p2550_p2 = pnand %p2549_p13, %p2801_p5 }
  0x4b   : > { %p2555_p8 = por %p2554_p7, %p2553_p4 }
  0x4c   : > { %p2551_p3 = pneg %p2550_p2 }
  0x4e   : > { %p2556_p11 = pnand %p2555_p8, %p2551_p3 }
  0x50   : > { %2559 = shalt.err (!%p2556_p11)
}
  0x51   : > { %s2560_s30 = sshra.s32 %s170_s8, 4  ;;  %s2666_s16 = smov [#allocation5]   ;;  %s2561_s30 = int_to_ptr.vmem [resolvable:$true] %s2560_s30 }
  0x52   : > { %s2567_s14 = scalar_lea.vmem %s2561_s30, %s2543_s24  ;;  %s2571_s17 = scalar_lea.vmem %s2666_s16, 8192 }
  0x53   : > { %p2568_p12 = scmp.ne.s32.totalorder %s2561_s30, %s2567_s14  ;;  %p2573_p10 = scmp.lt.s32.totalorder %s2571_s17, %s2567_s14 }
  0x55   : > { %p2569_p0 = pnand %p2568_p12, %p2801_p5 }
  0x57   : > { %p2570_p1 = pneg %p2569_p0 }
  0x59   : > { %p2575_p13 = pnand %p2573_p10, %p2570_p1 }
  0x5b   : > { %2578 = shalt.err (!%p2575_p13)
}
  0x5c   : > { %s2667_s25 = smov 512   ;;  %s2668_s28 = smov 32  }
  0x5d   : > { %175 = dma.hbm_to_vmem [thread:$0]  (%p2801_p5), %s2812_s27, %s2431_s23, %s170_s8, %s2798_s7, %s2667_s25, %s2667_s25, %s2668_s28  }
  0x5e PF: > { %p2432_p2 = scmp.ge.s32.totalorder %s2661_s12, 1  ;;  %p177_p3 = scmp.lt.s32.totalorder %s2661_s12, 4 }
  0x60   : > { %p178_p4 = pnand %p2432_p2, %p177_p3 }
  0x61   : > { %s2841_s24 = sand.u32 (!%p178_p4), 1, %s2653_s10  }
  0x62   : > { %181 = sbr.rel (%p178_p4) target bundleno = 653 (0x28d), region = 28  ;;  %s2433_s29 = sshll.u32 (!%p178_p4), %s2841_s24, 12 }
  0x63   : > { %s184_s5 = scalar_lea.sflag (!%p178_p4), [#allocation3], %s2841_s24  ;;  %s2845_s19 = scalar_lea.vmem (!%p178_p4), [#allocation2], %s2433_s29 }
  0x67   : > { %2636 = dma.done.wait (%p2730_p6), %s184_s5, 65536  }
  0x68   : > { %2638 = vsyncadd (%p2730_p6), %s184_s5, 4294901760  ;;  %s194_s3 = scalar_lea.sflag [#allocation6], %s2841_s24  ;;  %s2852_s7 = scalar_lea.vmem [#allocation5], %s2433_s29 }
  0x69   : > { %2640 = dma.done.wait (%p2730_p6), %s194_s3, 65536  }
  0x6a   : > { %2642 = vsyncadd (%p2730_p6), %s194_s3, 4294901760  ;;  %v242_v0 = vld [vmem:[%s2845_s19] sm:$0xff]  ;;  %v243_v2 = vld [vmem:[%s2845_s19 + $0x8] sm:$0xff]  ;;  %s2867_s20 = scalar_lea.vmem [#allocation7], %s2433_s29  ;;  %s2291_s8 = scalar_lea.sflag [#allocation4], %s2841_s24 }
  0x6b   : > { %v754_v1 = vld [vmem:[%s2852_s7] sm:$0xff]  ;;  %v755_v4 = vld [vmem:[%s2852_s7 + $0x8] sm:$0xff]  ;;  %v244_v5 = vld [vmem:[%s2845_s19 + $0x10] sm:$0xff]  ;;  %s2437_s27 = sshll.u32 (%p2735_p9), %s2708_s13, 7 }
  0x6c   : > { %v1266_v3 = vadd.f32 %v754_v1, %v242_v0  ;;  %v756_v6 = vld [vmem:[%s2852_s7 + $0x10] sm:$0xff]  ;;  %v1267_v7 = vadd.f32 %v755_v4, %v243_v2  ;;  %v245_v9 = vld [vmem:[%s2845_s19 + $0x18] sm:$0xff]  ;;  %v246_v11 = vld [vmem:[%s2845_s19 + $0x20] sm:$0xff]  ;;  %s2299_s23 = ssub.s32 (%p2735_p9), 375, %s2437_s27 }
  0x6d   : > { %v1268_v8 = vadd.f32 %v756_v6, %v244_v5  ;;  %v757_v10 = vld [vmem:[%s2852_s7 + $0x18] sm:$0xff]  ;;  %v758_v13 = vld [vmem:[%s2852_s7 + $0x20] sm:$0xff]  ;;  %v247_v14 = vld [vmem:[%s2845_s19 + $0x28] sm:$0xff]  ;;  %p2300_p6 = scmp.lt.s32.totalorder (%p2735_p9), %s2299_s23, 128 }
  0x6e   : > { %1778 = vst [vmem:[%s2867_s20] sm:$0xff] %v1266_v3  ;;  %v1269_v12 = vadd.f32 %v757_v10, %v245_v9  ;;  %v759_v15 = vld [vmem:[%s2852_s7 + $0x28] sm:$0xff]  ;;  %v1270_v16 = vadd.f32 %v758_v13, %v246_v11  ;;  %v248_v18 = vld [vmem:[%s2845_s19 + $0x30] sm:$0xff]  ;;  %v249_v20 = vld [vmem:[%s2845_s19 + $0x38] sm:$0xff] }
  0x6f   : > { %1779 = vst [vmem:[%s2867_s20 + $0x8] sm:$0xff] %v1267_v7  ;;  %v1271_v17 = vadd.f32 %v759_v15, %v247_v14  ;;  %v760_v19 = vld [vmem:[%s2852_s7 + $0x30] sm:$0xff]  ;;  %v761_v22 = vld [vmem:[%s2852_s7 + $0x38] sm:$0xff]  ;;  %v250_v23 = vld [vmem:[%s2845_s19 + $0x40] sm:$0xff] }
  0x70   : > { %1780 = vst [vmem:[%s2867_s20 + $0x10] sm:$0xff] %v1268_v8  ;;  %v1272_v21 = vadd.f32 %v760_v19, %v248_v18  ;;  %v762_v24 = vld [vmem:[%s2852_s7 + $0x40] sm:$0xff]  ;;  %v1273_v25 = vadd.f32 %v761_v22, %v249_v20  ;;  %v251_v26 = vld [vmem:[%s2845_s19 + $0x48] sm:$0xff]  ;;  %v252_v28 = vld [vmem:[%s2845_s19 + $0x50] sm:$0xff] }
  0x71   : > { %1781 = vst [vmem:[%s2867_s20 + $0x18] sm:$0xff] %v1269_v12  ;;  %v763_v27 = vld [vmem:[%s2852_s7 + $0x48] sm:$0xff]  ;;  %v1274_v29 = vadd.f32 %v762_v24, %v250_v23  ;;  %v764_v30 = vld [vmem:[%s2852_s7 + $0x50] sm:$0xff]  ;;  %v253_v31 = vld [vmem:[%s2845_s19 + $0x58] sm:$0xff] }
  0x72   : > { %1782 = vst [vmem:[%s2867_s20 + $0x20] sm:$0xff] %v1270_v16  ;;  %v765_v32 = vld [vmem:[%s2852_s7 + $0x58] sm:$0xff]  ;;  %v1275_v33 = vadd.f32 %v763_v27, %v251_v26  ;;  %v254_v34 = vld [vmem:[%s2845_s19 + $0x60] sm:$0xff]  ;;  %v1276_v36 = vadd.f32 %v764_v30, %v252_v28  ;;  %v255_v37 = vld [vmem:[%s2845_s19 + $0x68] sm:$0xff] }
  0x73   : > { %1783 = vst [vmem:[%s2867_s20 + $0x28] sm:$0xff] %v1271_v17  ;;  %v766_v35 = vld [vmem:[%s2852_s7 + $0x60] sm:$0xff]  ;;  %v767_v38 = vld [vmem:[%s2852_s7 + $0x68] sm:$0xff]  ;;  %v1277_v39 = vadd.f32 %v765_v32, %v253_v31  ;;  %v256_v40 = vld [vmem:[%s2845_s19 + $0x70] sm:$0xff] }
  0x74   : > { %1784 = vst [vmem:[%s2867_s20 + $0x30] sm:$0xff] %v1272_v21  ;;  %v768_v41 = vld [vmem:[%s2852_s7 + $0x70] sm:$0xff]  ;;  %v1278_v42 = vadd.f32 %v766_v35, %v254_v34  ;;  %v257_v43 = vld [vmem:[%s2845_s19 + $0x78] sm:$0xff]  ;;  %v1279_v45 = vadd.f32 %v767_v38, %v255_v37  ;;  %v258_v46 = vld [vmem:[%s2845_s19 + $0x80] sm:$0xff] }
  0x75   : > { %1785 = vst [vmem:[%s2867_s20 + $0x38] sm:$0xff] %v1273_v25  ;;  %v769_v44 = vld [vmem:[%s2852_s7 + $0x78] sm:$0xff]  ;;  %v770_v47 = vld [vmem:[%s2852_s7 + $0x80] sm:$0xff]  ;;  %v1280_v48 = vadd.f32 %v768_v41, %v256_v40  ;;  %v259_v49 = vld [vmem:[%s2845_s19 + $0x88] sm:$0xff] }
  0x76   : > { %1786 = vst [vmem:[%s2867_s20 + $0x40] sm:$0xff] %v1274_v29  ;;  %v771_v50 = vld [vmem:[%s2852_s7 + $0x88] sm:$0xff]  ;;  %v1281_v51 = vadd.f32 %v769_v44, %v257_v43  ;;  %v260_v52 = vld [vmem:[%s2845_s19 + $0x90] sm:$0xff]  ;;  %v1282_v54 = vadd.f32 %v770_v47, %v258_v46  ;;  %v261_v55 = vld [vmem:[%s2845_s19 + $0x98] sm:$0xff] }
  0x77   : > { %1787 = vst [vmem:[%s2867_s20 + $0x48] sm:$0xff] %v1275_v33  ;;  %v772_v53 = vld [vmem:[%s2852_s7 + $0x90] sm:$0xff]  ;;  %v773_v56 = vld [vmem:[%s2852_s7 + $0x98] sm:$0xff]  ;;  %v1283_v57 = vadd.f32 %v771_v50, %v259_v49  ;;  %v262_v58 = vld [vmem:[%s2845_s19 + $0xa0] sm:$0xff] }
  0x78   : > { %1788 = vst [vmem:[%s2867_s20 + $0x50] sm:$0xff] %v1276_v36  ;;  %v774_v59 = vld [vmem:[%s2852_s7 + $0xa0] sm:$0xff]  ;;  %v1284_v60 = vadd.f32 %v772_v53, %v260_v52  ;;  %v263_v61 = vld [vmem:[%s2845_s19 + $0xa8] sm:$0xff]  ;;  %v1285_v63 = vadd.f32 %v773_v56, %v261_v55  ;;  %v264_v0 = vld [vmem:[%s2845_s19 + $0xb0] sm:$0xff] }
  0x79   : > { %1789 = vst [vmem:[%s2867_s20 + $0x58] sm:$0xff] %v1277_v39  ;;  %v775_v62 = vld [vmem:[%s2852_s7 + $0xa8] sm:$0xff]  ;;  %v776_v1 = vld [vmem:[%s2852_s7 + $0xb0] sm:$0xff]  ;;  %v1286_v2 = vadd.f32 %v774_v59, %v262_v58  ;;  %v265_v3 = vld [vmem:[%s2845_s19 + $0xb8] sm:$0xff] }
  0x7a   : > { %1790 = vst [vmem:[%s2867_s20 + $0x60] sm:$0xff] %v1278_v42  ;;  %v777_v4 = vld [vmem:[%s2852_s7 + $0xb8] sm:$0xff]  ;;  %v1287_v5 = vadd.f32 %v775_v62, %v263_v61  ;;  %v266_v6 = vld [vmem:[%s2845_s19 + $0xc0] sm:$0xff]  ;;  %v1288_v8 = vadd.f32 %v776_v1, %v264_v0  ;;  %v267_v9 = vld [vmem:[%s2845_s19 + $0xc8] sm:$0xff] }
  0x7b   : > { %1791 = vst [vmem:[%s2867_s20 + $0x68] sm:$0xff] %v1279_v45  ;;  %v778_v7 = vld [vmem:[%s2852_s7 + $0xc0] sm:$0xff]  ;;  %v779_v10 = vld [vmem:[%s2852_s7 + $0xc8] sm:$0xff]  ;;  %v1289_v11 = vadd.f32 %v777_v4, %v265_v3  ;;  %v268_v12 = vld [vmem:[%s2845_s19 + $0xd0] sm:$0xff] }
  0x7c   : > { %1792 = vst [vmem:[%s2867_s20 + $0x70] sm:$0xff] %v1280_v48  ;;  %v780_v13 = vld [vmem:[%s2852_s7 + $0xd0] sm:$0xff]  ;;  %v1290_v14 = vadd.f32 %v778_v7, %v266_v6  ;;  %v269_v15 = vld [vmem:[%s2845_s19 + $0xd8] sm:$0xff]  ;;  %v1291_v17 = vadd.f32 %v779_v10, %v267_v9  ;;  %v270_v18 = vld [vmem:[%s2845_s19 + $0xe0] sm:$0xff] }
  0x7d   : > { %1793 = vst [vmem:[%s2867_s20 + $0x78] sm:$0xff] %v1281_v51  ;;  %v781_v16 = vld [vmem:[%s2852_s7 + $0xd8] sm:$0xff]  ;;  %v782_v19 = vld [vmem:[%s2852_s7 + $0xe0] sm:$0xff]  ;;  %v1292_v20 = vadd.f32 %v780_v13, %v268_v12  ;;  %v271_v21 = vld [vmem:[%s2845_s19 + $0xe8] sm:$0xff] }
  0x7e   : > { %1794 = vst [vmem:[%s2867_s20 + $0x80] sm:$0xff] %v1282_v54  ;;  %v783_v22 = vld [vmem:[%s2852_s7 + $0xe8] sm:$0xff]  ;;  %v1293_v23 = vadd.f32 %v781_v16, %v269_v15  ;;  %v272_v24 = vld [vmem:[%s2845_s19 + $0xf0] sm:$0xff]  ;;  %v1294_v26 = vadd.f32 %v782_v19, %v270_v18  ;;  %v273_v27 = vld [vmem:[%s2845_s19 + $0xf8] sm:$0xff] }
  0x7f   : > { %1795 = vst [vmem:[%s2867_s20 + $0x88] sm:$0xff] %v1283_v57  ;;  %v784_v25 = vld [vmem:[%s2852_s7 + $0xf0] sm:$0xff]  ;;  %v785_v28 = vld [vmem:[%s2852_s7 + $0xf8] sm:$0xff]  ;;  %v1295_v29 = vadd.f32 %v783_v22, %v271_v21  ;;  %v274_v30 = vld [vmem:[%s2845_s19 + $0x100] sm:$0xff] }
  0x80   : > { %1796 = vst [vmem:[%s2867_s20 + $0x90] sm:$0xff] %v1284_v60  ;;  %v786_v31 = vld [vmem:[%s2852_s7 + $0x100] sm:$0xff]  ;;  %v1296_v32 = vadd.f32 %v784_v25, %v272_v24  ;;  %v275_v33 = vld [vmem:[%s2845_s19 + $0x108] sm:$0xff]  ;;  %v1297_v35 = vadd.f32 %v785_v28, %v273_v27  ;;  %v276_v36 = vld [vmem:[%s2845_s19 + $0x110] sm:$0xff] }
  0x81   : > { %1797 = vst [vmem:[%s2867_s20 + $0x98] sm:$0xff] %v1285_v63  ;;  %v787_v34 = vld [vmem:[%s2852_s7 + $0x108] sm:$0xff]  ;;  %v788_v37 = vld [vmem:[%s2852_s7 + $0x110] sm:$0xff]  ;;  %v1298_v38 = vadd.f32 %v786_v31, %v274_v30  ;;  %v277_v39 = vld [vmem:[%s2845_s19 + $0x118] sm:$0xff] }
  0x82   : > { %1798 = vst [vmem:[%s2867_s20 + $0xa0] sm:$0xff] %v1286_v2  ;;  %v789_v40 = vld [vmem:[%s2852_s7 + $0x118] sm:$0xff]  ;;  %v1299_v41 = vadd.f32 %v787_v34, %v275_v33  ;;  %v278_v42 = vld [vmem:[%s2845_s19 + $0x120] sm:$0xff]  ;;  %v1300_v44 = vadd.f32 %v788_v37, %v276_v36  ;;  %v279_v45 = vld [vmem:[%s2845_s19 + $0x128] sm:$0xff] }
  0x83   : > { %1799 = vst [vmem:[%s2867_s20 + $0xa8] sm:$0xff] %v1287_v5  ;;  %v790_v43 = vld [vmem:[%s2852_s7 + $0x120] sm:$0xff]  ;;  %v791_v46 = vld [vmem:[%s2852_s7 + $0x128] sm:$0xff]  ;;  %v1301_v47 = vadd.f32 %v789_v40, %v277_v39  ;;  %v280_v48 = vld [vmem:[%s2845_s19 + $0x130] sm:$0xff] }
  0x84   : > { %1800 = vst [vmem:[%s2867_s20 + $0xb0] sm:$0xff] %v1288_v8  ;;  %v792_v49 = vld [vmem:[%s2852_s7 + $0x130] sm:$0xff]  ;;  %v1302_v50 = vadd.f32 %v790_v43, %v278_v42  ;;  %v281_v51 = vld [vmem:[%s2845_s19 + $0x138] sm:$0xff]  ;;  %v1303_v53 = vadd.f32 %v791_v46, %v279_v45  ;;  %v282_v54 = vld [vmem:[%s2845_s19 + $0x140] sm:$0xff] }
  0x85   : > { %1801 = vst [vmem:[%s2867_s20 + $0xb8] sm:$0xff] %v1289_v11  ;;  %v793_v52 = vld [vmem:[%s2852_s7 + $0x138] sm:$0xff]  ;;  %v794_v55 = vld [vmem:[%s2852_s7 + $0x140] sm:$0xff]  ;;  %v1304_v56 = vadd.f32 %v792_v49, %v280_v48  ;;  %v283_v57 = vld [vmem:[%s2845_s19 + $0x148] sm:$0xff] }
  0x86   : > { %1802 = vst [vmem:[%s2867_s20 + $0xc0] sm:$0xff] %v1290_v14  ;;  %v795_v58 = vld [vmem:[%s2852_s7 + $0x148] sm:$0xff]  ;;  %v1305_v59 = vadd.f32 %v793_v52, %v281_v51  ;;  %v284_v60 = vld [vmem:[%s2845_s19 + $0x150] sm:$0xff]  ;;  %v1306_v62 = vadd.f32 %v794_v55, %v282_v54  ;;  %v285_v63 = vld [vmem:[%s2845_s19 + $0x158] sm:$0xff] }
  0x87   : > { %1803 = vst [vmem:[%s2867_s20 + $0xc8] sm:$0xff] %v1291_v17  ;;  %v796_v61 = vld [vmem:[%s2852_s7 + $0x150] sm:$0xff]  ;;  %v797_v0 = vld [vmem:[%s2852_s7 + $0x158] sm:$0xff]  ;;  %v1307_v1 = vadd.f32 %v795_v58, %v283_v57  ;;  %v286_v2 = vld [vmem:[%s2845_s19 + $0x160] sm:$0xff] }
  0x88   : > { %1804 = vst [vmem:[%s2867_s20 + $0xd0] sm:$0xff] %v1292_v20  ;;  %v798_v3 = vld [vmem:[%s2852_s7 + $0x160] sm:$0xff]  ;;  %v1308_v4 = vadd.f32 %v796_v61, %v284_v60  ;;  %v287_v5 = vld [vmem:[%s2845_s19 + $0x168] sm:$0xff]  ;;  %v1309_v7 = vadd.f32 %v797_v0, %v285_v63  ;;  %v288_v8 = vld [vmem:[%s2845_s19 + $0x170] sm:$0xff] }
  0x89   : > { %1805 = vst [vmem:[%s2867_s20 + $0xd8] sm:$0xff] %v1293_v23  ;;  %v799_v6 = vld [vmem:[%s2852_s7 + $0x168] sm:$0xff]  ;;  %v800_v9 = vld [vmem:[%s2852_s7 + $0x170] sm:$0xff]  ;;  %v1310_v10 = vadd.f32 %v798_v3, %v286_v2  ;;  %v289_v11 = vld [vmem:[%s2845_s19 + $0x178] sm:$0xff] }
  0x8a   : > { %1806 = vst [vmem:[%s2867_s20 + $0xe0] sm:$0xff] %v1294_v26  ;;  %v801_v12 = vld [vmem:[%s2852_s7 + $0x178] sm:$0xff]  ;;  %v1311_v13 = vadd.f32 %v799_v6, %v287_v5  ;;  %v290_v14 = vld [vmem:[%s2845_s19 + $0x180] sm:$0xff]  ;;  %v1312_v16 = vadd.f32 %v800_v9, %v288_v8  ;;  %v291_v17 = vld [vmem:[%s2845_s19 + $0x188] sm:$0xff] }
  0x8b   : > { %1807 = vst [vmem:[%s2867_s20 + $0xe8] sm:$0xff] %v1295_v29  ;;  %v802_v15 = vld [vmem:[%s2852_s7 + $0x180] sm:$0xff]  ;;  %v803_v18 = vld [vmem:[%s2852_s7 + $0x188] sm:$0xff]  ;;  %v1313_v19 = vadd.f32 %v801_v12, %v289_v11  ;;  %v292_v20 = vld [vmem:[%s2845_s19 + $0x190] sm:$0xff] }
  0x8c   : > { %1808 = vst [vmem:[%s2867_s20 + $0xf0] sm:$0xff] %v1296_v32  ;;  %v804_v21 = vld [vmem:[%s2852_s7 + $0x190] sm:$0xff]  ;;  %v1314_v22 = vadd.f32 %v802_v15, %v290_v14  ;;  %v293_v23 = vld [vmem:[%s2845_s19 + $0x198] sm:$0xff]  ;;  %v1315_v25 = vadd.f32 %v803_v18, %v291_v17  ;;  %v294_v26 = vld [vmem:[%s2845_s19 + $0x1a0] sm:$0xff] }
  0x8d   : > { %1809 = vst [vmem:[%s2867_s20 + $0xf8] sm:$0xff] %v1297_v35  ;;  %v805_v24 = vld [vmem:[%s2852_s7 + $0x198] sm:$0xff]  ;;  %v806_v27 = vld [vmem:[%s2852_s7 + $0x1a0] sm:$0xff]  ;;  %v1316_v28 = vadd.f32 %v804_v21, %v292_v20  ;;  %v295_v29 = vld [vmem:[%s2845_s19 + $0x1a8] sm:$0xff] }
  0x8e   : > { %1810 = vst [vmem:[%s2867_s20 + $0x100] sm:$0xff] %v1298_v38  ;;  %v807_v30 = vld [vmem:[%s2852_s7 + $0x1a8] sm:$0xff]  ;;  %v1317_v31 = vadd.f32 %v805_v24, %v293_v23  ;;  %v296_v32 = vld [vmem:[%s2845_s19 + $0x1b0] sm:$0xff]  ;;  %v1318_v34 = vadd.f32 %v806_v27, %v294_v26  ;;  %v297_v35 = vld [vmem:[%s2845_s19 + $0x1b8] sm:$0xff] }
  0x8f   : > { %1811 = vst [vmem:[%s2867_s20 + $0x108] sm:$0xff] %v1299_v41  ;;  %v808_v33 = vld [vmem:[%s2852_s7 + $0x1b0] sm:$0xff]  ;;  %v809_v36 = vld [vmem:[%s2852_s7 + $0x1b8] sm:$0xff]  ;;  %v1319_v37 = vadd.f32 %v807_v30, %v295_v29  ;;  %v298_v38 = vld [vmem:[%s2845_s19 + $0x1c0] sm:$0xff] }
  0x90   : > { %1812 = vst [vmem:[%s2867_s20 + $0x110] sm:$0xff] %v1300_v44  ;;  %v810_v39 = vld [vmem:[%s2852_s7 + $0x1c0] sm:$0xff]  ;;  %v1320_v40 = vadd.f32 %v808_v33, %v296_v32  ;;  %v299_v41 = vld [vmem:[%s2845_s19 + $0x1c8] sm:$0xff]  ;;  %v1321_v43 = vadd.f32 %v809_v36, %v297_v35  ;;  %v300_v44 = vld [vmem:[%s2845_s19 + $0x1d0] sm:$0xff] }
  0x91   : > { %1813 = vst [vmem:[%s2867_s20 + $0x118] sm:$0xff] %v1301_v47  ;;  %v811_v42 = vld [vmem:[%s2852_s7 + $0x1c8] sm:$0xff]  ;;  %v812_v45 = vld [vmem:[%s2852_s7 + $0x1d0] sm:$0xff]  ;;  %v1322_v46 = vadd.f32 %v810_v39, %v298_v38  ;;  %v301_v47 = vld [vmem:[%s2845_s19 + $0x1d8] sm:$0xff] }
  0x92   : > { %1814 = vst [vmem:[%s2867_s20 + $0x120] sm:$0xff] %v1302_v50  ;;  %v813_v48 = vld [vmem:[%s2852_s7 + $0x1d8] sm:$0xff]  ;;  %v1323_v49 = vadd.f32 %v811_v42, %v299_v41  ;;  %v302_v50 = vld [vmem:[%s2845_s19 + $0x1e0] sm:$0xff]  ;;  %v1324_v52 = vadd.f32 %v812_v45, %v300_v44  ;;  %v815_v54 = vld [vmem:[%s2852_s7 + $0x1e8] sm:$0xff] }
  0x93   : > { %1815 = vst [vmem:[%s2867_s20 + $0x128] sm:$0xff] %v1303_v53  ;;  %v814_v51 = vld [vmem:[%s2852_s7 + $0x1e0] sm:$0xff]  ;;  %v303_v53 = vld [vmem:[%s2845_s19 + $0x1e8] sm:$0xff]  ;;  %v1325_v55 = vadd.f32 %v813_v48, %v301_v47  ;;  %v816_v57 = vld [vmem:[%s2852_s7 + $0x1f0] sm:$0xff] }
  0x94   : > { %1816 = vst [vmem:[%s2867_s20 + $0x130] sm:$0xff] %v1304_v56  ;;  %v304_v56 = vld [vmem:[%s2845_s19 + $0x1f0] sm:$0xff]  ;;  %v1326_v58 = vadd.f32 %v814_v51, %v302_v50  ;;  %v817_v60 = vld [vmem:[%s2852_s7 + $0x1f8] sm:$0xff]  ;;  %v1327_v61 = vadd.f32 %v815_v54, %v303_v53  ;;  %v818_v63 = vld [vmem:[%s2852_s7 + $0x200] sm:$0xff] }
  0x95   : > { %1817 = vst [vmem:[%s2867_s20 + $0x138] sm:$0xff] %v1305_v59  ;;  %v305_v59 = vld [vmem:[%s2845_s19 + $0x1f8] sm:$0xff]  ;;  %v1328_v0 = vadd.f32 %v816_v57, %v304_v56  ;;  %v819_v2 = vld [vmem:[%s2852_s7 + $0x208] sm:$0xff]  ;;  %v820_v5 = vld [vmem:[%s2852_s7 + $0x210] sm:$0xff] }
  0x96   : > { %1818 = vst [vmem:[%s2867_s20 + $0x140] sm:$0xff] %v1306_v62  ;;  %v306_v62 = vld [vmem:[%s2845_s19 + $0x200] sm:$0xff]  ;;  %v1329_v3 = vadd.f32 %v817_v60, %v305_v59  ;;  %v821_v8 = vld [vmem:[%s2852_s7 + $0x218] sm:$0xff]  ;;  %v823_v14 = vld [vmem:[%s2852_s7 + $0x228] sm:$0xff] }
  0x97   : > { %1819 = vst [vmem:[%s2867_s20 + $0x148] sm:$0xff] %v1307_v1  ;;  %v307_v1 = vld [vmem:[%s2845_s19 + $0x208] sm:$0xff]  ;;  %v1330_v6 = vadd.f32 %v818_v63, %v306_v62  ;;  %v822_v11 = vld [vmem:[%s2852_s7 + $0x220] sm:$0xff]  ;;  %v824_v17 = vld [vmem:[%s2852_s7 + $0x230] sm:$0xff] }
  0x98   : > { %1820 = vst [vmem:[%s2867_s20 + $0x150] sm:$0xff] %v1308_v4  ;;  %v308_v4 = vld [vmem:[%s2845_s19 + $0x210] sm:$0xff]  ;;  %v1331_v9 = vadd.f32 %v819_v2, %v307_v1  ;;  %v825_v20 = vld [vmem:[%s2852_s7 + $0x238] sm:$0xff]  ;;  %v826_v23 = vld [vmem:[%s2852_s7 + $0x240] sm:$0xff] }
  0x99   : > { %1821 = vst [vmem:[%s2867_s20 + $0x158] sm:$0xff] %v1309_v7  ;;  %v309_v7 = vld [vmem:[%s2845_s19 + $0x218] sm:$0xff]  ;;  %v1332_v12 = vadd.f32 %v820_v5, %v308_v4  ;;  %v827_v26 = vld [vmem:[%s2852_s7 + $0x248] sm:$0xff]  ;;  %v828_v29 = vld [vmem:[%s2852_s7 + $0x250] sm:$0xff] }
  0x9a   : > { %1822 = vst [vmem:[%s2867_s20 + $0x160] sm:$0xff] %v1310_v10  ;;  %v310_v10 = vld [vmem:[%s2845_s19 + $0x220] sm:$0xff]  ;;  %v1333_v15 = vadd.f32 %v821_v8, %v309_v7  ;;  %v829_v32 = vld [vmem:[%s2852_s7 + $0x258] sm:$0xff]  ;;  %v831_v38 = vld [vmem:[%s2852_s7 + $0x268] sm:$0xff] }
  0x9b   : > { %1823 = vst [vmem:[%s2867_s20 + $0x168] sm:$0xff] %v1311_v13  ;;  %v311_v13 = vld [vmem:[%s2845_s19 + $0x228] sm:$0xff]  ;;  %v1334_v18 = vadd.f32 %v822_v11, %v310_v10  ;;  %v830_v35 = vld [vmem:[%s2852_s7 + $0x260] sm:$0xff]  ;;  %v832_v41 = vld [vmem:[%s2852_s7 + $0x270] sm:$0xff] }
  0x9c   : > { %1824 = vst [vmem:[%s2867_s20 + $0x170] sm:$0xff] %v1312_v16  ;;  %v312_v16 = vld [vmem:[%s2845_s19 + $0x230] sm:$0xff]  ;;  %v1335_v21 = vadd.f32 %v823_v14, %v311_v13  ;;  %v833_v44 = vld [vmem:[%s2852_s7 + $0x278] sm:$0xff]  ;;  %v834_v47 = vld [vmem:[%s2852_s7 + $0x280] sm:$0xff] }
  0x9d   : > { %1825 = vst [vmem:[%s2867_s20 + $0x178] sm:$0xff] %v1313_v19  ;;  %v313_v19 = vld [vmem:[%s2845_s19 + $0x238] sm:$0xff]  ;;  %v1336_v24 = vadd.f32 %v824_v17, %v312_v16  ;;  %v835_v50 = vld [vmem:[%s2852_s7 + $0x288] sm:$0xff]  ;;  %v836_v53 = vld [vmem:[%s2852_s7 + $0x290] sm:$0xff] }
  0x9e   : > { %1826 = vst [vmem:[%s2867_s20 + $0x180] sm:$0xff] %v1314_v22  ;;  %v314_v22 = vld [vmem:[%s2845_s19 + $0x240] sm:$0xff]  ;;  %v1337_v27 = vadd.f32 %v825_v20, %v313_v19  ;;  %v837_v56 = vld [vmem:[%s2852_s7 + $0x298] sm:$0xff]  ;;  %v839_v62 = vld [vmem:[%s2852_s7 + $0x2a8] sm:$0xff] }
  0x9f   : > { %1827 = vst [vmem:[%s2867_s20 + $0x188] sm:$0xff] %v1315_v25  ;;  %v315_v25 = vld [vmem:[%s2845_s19 + $0x248] sm:$0xff]  ;;  %v1338_v30 = vadd.f32 %v826_v23, %v314_v22  ;;  %v838_v59 = vld [vmem:[%s2852_s7 + $0x2a0] sm:$0xff]  ;;  %v840_v1 = vld [vmem:[%s2852_s7 + $0x2b0] sm:$0xff] }
  0xa0   : > { %1828 = vst [vmem:[%s2867_s20 + $0x190] sm:$0xff] %v1316_v28  ;;  %v316_v28 = vld [vmem:[%s2845_s19 + $0x250] sm:$0xff]  ;;  %v1339_v33 = vadd.f32 %v827_v26, %v315_v25  ;;  %v841_v4 = vld [vmem:[%s2852_s7 + $0x2b8] sm:$0xff]  ;;  %v842_v7 = vld [vmem:[%s2852_s7 + $0x2c0] sm:$0xff] }
  0xa1   : > { %1829 = vst [vmem:[%s2867_s20 + $0x198] sm:$0xff] %v1317_v31  ;;  %v317_v31 = vld [vmem:[%s2845_s19 + $0x258] sm:$0xff]  ;;  %v1340_v36 = vadd.f32 %v828_v29, %v316_v28  ;;  %v843_v10 = vld [vmem:[%s2852_s7 + $0x2c8] sm:$0xff]  ;;  %v844_v13 = vld [vmem:[%s2852_s7 + $0x2d0] sm:$0xff] }
  0xa2   : > { %1830 = vst [vmem:[%s2867_s20 + $0x1a0] sm:$0xff] %v1318_v34  ;;  %v318_v34 = vld [vmem:[%s2845_s19 + $0x260] sm:$0xff]  ;;  %v1341_v39 = vadd.f32 %v829_v32, %v317_v31  ;;  %v845_v16 = vld [vmem:[%s2852_s7 + $0x2d8] sm:$0xff]  ;;  %v847_v22 = vld [vmem:[%s2852_s7 + $0x2e8] sm:$0xff] }
  0xa3   : > { %1831 = vst [vmem:[%s2867_s20 + $0x1a8] sm:$0xff] %v1319_v37  ;;  %v319_v37 = vld [vmem:[%s2845_s19 + $0x268] sm:$0xff]  ;;  %v1342_v42 = vadd.f32 %v830_v35, %v318_v34  ;;  %v846_v19 = vld [vmem:[%s2852_s7 + $0x2e0] sm:$0xff]  ;;  %v848_v25 = vld [vmem:[%s2852_s7 + $0x2f0] sm:$0xff] }
  0xa4   : > { %1832 = vst [vmem:[%s2867_s20 + $0x1b0] sm:$0xff] %v1320_v40  ;;  %v320_v40 = vld [vmem:[%s2845_s19 + $0x270] sm:$0xff]  ;;  %v1343_v45 = vadd.f32 %v831_v38, %v319_v37  ;;  %v849_v28 = vld [vmem:[%s2852_s7 + $0x2f8] sm:$0xff]  ;;  %v850_v31 = vld [vmem:[%s2852_s7 + $0x300] sm:$0xff] }
  0xa5   : > { %1833 = vst [vmem:[%s2867_s20 + $0x1b8] sm:$0xff] %v1321_v43  ;;  %v321_v43 = vld [vmem:[%s2845_s19 + $0x278] sm:$0xff]  ;;  %v1344_v48 = vadd.f32 %v832_v41, %v320_v40  ;;  %v851_v34 = vld [vmem:[%s2852_s7 + $0x308] sm:$0xff]  ;;  %v852_v37 = vld [vmem:[%s2852_s7 + $0x310] sm:$0xff] }
  0xa6   : > { %1834 = vst [vmem:[%s2867_s20 + $0x1c0] sm:$0xff] %v1322_v46  ;;  %v322_v46 = vld [vmem:[%s2845_s19 + $0x280] sm:$0xff]  ;;  %v1345_v51 = vadd.f32 %v833_v44, %v321_v43  ;;  %v853_v40 = vld [vmem:[%s2852_s7 + $0x318] sm:$0xff] }
  0xa7   : > { %1835 = vst [vmem:[%s2867_s20 + $0x1c8] sm:$0xff] %v1323_v49  ;;  %v323_v49 = vld [vmem:[%s2845_s19 + $0x288] sm:$0xff]  ;;  %v1346_v54 = vadd.f32 %v834_v47, %v322_v46  ;;  %v854_v43 = vld [vmem:[%s2852_s7 + $0x320] sm:$0xff] }
  0xa8   : > { %1836 = vst [vmem:[%s2867_s20 + $0x1d0] sm:$0xff] %v1324_v52  ;;  %v324_v52 = vld [vmem:[%s2845_s19 + $0x290] sm:$0xff]  ;;  %v1347_v57 = vadd.f32 %v835_v50, %v323_v49  ;;  %v855_v46 = vld [vmem:[%s2852_s7 + $0x328] sm:$0xff] }
  0xa9   : > { %1837 = vst [vmem:[%s2867_s20 + $0x1d8] sm:$0xff] %v1325_v55  ;;  %v325_v55 = vld [vmem:[%s2845_s19 + $0x298] sm:$0xff]  ;;  %v1348_v60 = vadd.f32 %v836_v53, %v324_v52  ;;  %v856_v49 = vld [vmem:[%s2852_s7 + $0x330] sm:$0xff] }
  0xaa   : > { %1838 = vst [vmem:[%s2867_s20 + $0x1e0] sm:$0xff] %v1326_v58  ;;  %v326_v58 = vld [vmem:[%s2845_s19 + $0x2a0] sm:$0xff]  ;;  %v1349_v63 = vadd.f32 %v837_v56, %v325_v55  ;;  %v857_v52 = vld [vmem:[%s2852_s7 + $0x338] sm:$0xff] }
  0xab   : > { %1839 = vst [vmem:[%s2867_s20 + $0x1e8] sm:$0xff] %v1327_v61  ;;  %v327_v61 = vld [vmem:[%s2845_s19 + $0x2a8] sm:$0xff]  ;;  %v1350_v2 = vadd.f32 %v838_v59, %v326_v58  ;;  %v858_v55 = vld [vmem:[%s2852_s7 + $0x340] sm:$0xff] }
  0xac   : > { %1840 = vst [vmem:[%s2867_s20 + $0x1f0] sm:$0xff] %v1328_v0  ;;  %v328_v0 = vld [vmem:[%s2845_s19 + $0x2b0] sm:$0xff]  ;;  %v1351_v5 = vadd.f32 %v839_v62, %v327_v61  ;;  %v859_v58 = vld [vmem:[%s2852_s7 + $0x348] sm:$0xff] }
  0xad   : > { %1841 = vst [vmem:[%s2867_s20 + $0x1f8] sm:$0xff] %v1329_v3  ;;  %v329_v3 = vld [vmem:[%s2845_s19 + $0x2b8] sm:$0xff]  ;;  %v1352_v8 = vadd.f32 %v840_v1, %v328_v0  ;;  %v860_v61 = vld [vmem:[%s2852_s7 + $0x350] sm:$0xff] }
  0xae   : > { %1842 = vst [vmem:[%s2867_s20 + $0x200] sm:$0xff] %v1330_v6  ;;  %v330_v6 = vld [vmem:[%s2845_s19 + $0x2c0] sm:$0xff]  ;;  %v1353_v11 = vadd.f32 %v841_v4, %v329_v3  ;;  %v861_v0 = vld [vmem:[%s2852_s7 + $0x358] sm:$0xff] }
  0xaf   : > { %1843 = vst [vmem:[%s2867_s20 + $0x208] sm:$0xff] %v1331_v9  ;;  %v331_v9 = vld [vmem:[%s2845_s19 + $0x2c8] sm:$0xff]  ;;  %v1354_v14 = vadd.f32 %v842_v7, %v330_v6  ;;  %v862_v3 = vld [vmem:[%s2852_s7 + $0x360] sm:$0xff] }
  0xb0   : > { %1844 = vst [vmem:[%s2867_s20 + $0x210] sm:$0xff] %v1332_v12  ;;  %v332_v12 = vld [vmem:[%s2845_s19 + $0x2d0] sm:$0xff]  ;;  %v1355_v17 = vadd.f32 %v843_v10, %v331_v9  ;;  %v863_v6 = vld [vmem:[%s2852_s7 + $0x368] sm:$0xff] }
  0xb1   : > { %1845 = vst [vmem:[%s2867_s20 + $0x218] sm:$0xff] %v1333_v15  ;;  %v333_v15 = vld [vmem:[%s2845_s19 + $0x2d8] sm:$0xff]  ;;  %v1356_v20 = vadd.f32 %v844_v13, %v332_v12  ;;  %v864_v9 = vld [vmem:[%s2852_s7 + $0x370] sm:$0xff] }
  0xb2   : > { %1846 = vst [vmem:[%s2867_s20 + $0x220] sm:$0xff] %v1334_v18  ;;  %v334_v18 = vld [vmem:[%s2845_s19 + $0x2e0] sm:$0xff]  ;;  %v1357_v23 = vadd.f32 %v845_v16, %v333_v15  ;;  %v865_v12 = vld [vmem:[%s2852_s7 + $0x378] sm:$0xff] }
  0xb3   : > { %1847 = vst [vmem:[%s2867_s20 + $0x228] sm:$0xff] %v1335_v21  ;;  %v335_v21 = vld [vmem:[%s2845_s19 + $0x2e8] sm:$0xff]  ;;  %v1358_v26 = vadd.f32 %v846_v19, %v334_v18  ;;  %v866_v15 = vld [vmem:[%s2852_s7 + $0x380] sm:$0xff] }
  0xb4   : > { %1848 = vst [vmem:[%s2867_s20 + $0x230] sm:$0xff] %v1336_v24  ;;  %v336_v24 = vld [vmem:[%s2845_s19 + $0x2f0] sm:$0xff]  ;;  %v1359_v29 = vadd.f32 %v847_v22, %v335_v21  ;;  %v867_v18 = vld [vmem:[%s2852_s7 + $0x388] sm:$0xff] }
  0xb5   : > { %1849 = vst [vmem:[%s2867_s20 + $0x238] sm:$0xff] %v1337_v27  ;;  %v337_v27 = vld [vmem:[%s2845_s19 + $0x2f8] sm:$0xff]  ;;  %v1360_v32 = vadd.f32 %v848_v25, %v336_v24  ;;  %v868_v21 = vld [vmem:[%s2852_s7 + $0x390] sm:$0xff] }
  0xb6   : > { %1850 = vst [vmem:[%s2867_s20 + $0x240] sm:$0xff] %v1338_v30  ;;  %v338_v30 = vld [vmem:[%s2845_s19 + $0x300] sm:$0xff]  ;;  %v1361_v35 = vadd.f32 %v849_v28, %v337_v27  ;;  %v869_v24 = vld [vmem:[%s2852_s7 + $0x398] sm:$0xff] }
  0xb7   : > { %1851 = vst [vmem:[%s2867_s20 + $0x248] sm:$0xff] %v1339_v33  ;;  %v339_v33 = vld [vmem:[%s2845_s19 + $0x308] sm:$0xff]  ;;  %v1362_v38 = vadd.f32 %v850_v31, %v338_v30  ;;  %v870_v27 = vld [vmem:[%s2852_s7 + $0x3a0] sm:$0xff] }
  0xb8   : > { %1852 = vst [vmem:[%s2867_s20 + $0x250] sm:$0xff] %v1340_v36  ;;  %v340_v36 = vld [vmem:[%s2845_s19 + $0x310] sm:$0xff]  ;;  %v1363_v41 = vadd.f32 %v851_v34, %v339_v33  ;;  %v871_v30 = vld [vmem:[%s2852_s7 + $0x3a8] sm:$0xff] }
  0xb9   : > { %1853 = vst [vmem:[%s2867_s20 + $0x258] sm:$0xff] %v1341_v39  ;;  %v341_v39 = vld [vmem:[%s2845_s19 + $0x318] sm:$0xff]  ;;  %v1364_v44 = vadd.f32 %v852_v37, %v340_v36  ;;  %v872_v33 = vld [vmem:[%s2852_s7 + $0x3b0] sm:$0xff] }
  0xba   : > { %1854 = vst [vmem:[%s2867_s20 + $0x260] sm:$0xff] %v1342_v42  ;;  %v342_v42 = vld [vmem:[%s2845_s19 + $0x320] sm:$0xff]  ;;  %v1365_v47 = vadd.f32 %v853_v40, %v341_v39  ;;  %v873_v36 = vld [vmem:[%s2852_s7 + $0x3b8] sm:$0xff] }
  0xbb   : > { %1855 = vst [vmem:[%s2867_s20 + $0x268] sm:$0xff] %v1343_v45  ;;  %v343_v45 = vld [vmem:[%s2845_s19 + $0x328] sm:$0xff]  ;;  %v1366_v50 = vadd.f32 %v854_v43, %v342_v42  ;;  %v874_v39 = vld [vmem:[%s2852_s7 + $0x3c0] sm:$0xff] }
  0xbc   : > { %1856 = vst [vmem:[%s2867_s20 + $0x270] sm:$0xff] %v1344_v48  ;;  %v344_v48 = vld [vmem:[%s2845_s19 + $0x330] sm:$0xff]  ;;  %v1367_v53 = vadd.f32 %v855_v46, %v343_v45  ;;  %v875_v42 = vld [vmem:[%s2852_s7 + $0x3c8] sm:$0xff] }
  0xbd   : > { %1857 = vst [vmem:[%s2867_s20 + $0x278] sm:$0xff] %v1345_v51  ;;  %v345_v51 = vld [vmem:[%s2845_s19 + $0x338] sm:$0xff]  ;;  %v1368_v56 = vadd.f32 %v856_v49, %v344_v48  ;;  %v876_v45 = vld [vmem:[%s2852_s7 + $0x3d0] sm:$0xff] }
  0xbe   : > { %1858 = vst [vmem:[%s2867_s20 + $0x280] sm:$0xff] %v1346_v54  ;;  %v346_v54 = vld [vmem:[%s2845_s19 + $0x340] sm:$0xff]  ;;  %v1369_v59 = vadd.f32 %v857_v52, %v345_v51  ;;  %v877_v48 = vld [vmem:[%s2852_s7 + $0x3d8] sm:$0xff] }
  0xbf   : > { %1859 = vst [vmem:[%s2867_s20 + $0x288] sm:$0xff] %v1347_v57  ;;  %v347_v57 = vld [vmem:[%s2845_s19 + $0x348] sm:$0xff]  ;;  %v1370_v62 = vadd.f32 %v858_v55, %v346_v54  ;;  %v878_v51 = vld [vmem:[%s2852_s7 + $0x3e0] sm:$0xff] }
  0xc0   : > { %1860 = vst [vmem:[%s2867_s20 + $0x290] sm:$0xff] %v1348_v60  ;;  %v348_v60 = vld [vmem:[%s2845_s19 + $0x350] sm:$0xff]  ;;  %v1371_v1 = vadd.f32 %v859_v58, %v347_v57  ;;  %v879_v54 = vld [vmem:[%s2852_s7 + $0x3e8] sm:$0xff] }
  0xc1   : > { %1861 = vst [vmem:[%s2867_s20 + $0x298] sm:$0xff] %v1349_v63  ;;  %v349_v63 = vld [vmem:[%s2845_s19 + $0x358] sm:$0xff]  ;;  %v1372_v4 = vadd.f32 %v860_v61, %v348_v60  ;;  %v880_v57 = vld [vmem:[%s2852_s7 + $0x3f0] sm:$0xff] }
  0xc2   : > { %1862 = vst [vmem:[%s2867_s20 + $0x2a0] sm:$0xff] %v1350_v2  ;;  %v350_v2 = vld [vmem:[%s2845_s19 + $0x360] sm:$0xff]  ;;  %v1373_v7 = vadd.f32 %v861_v0, %v349_v63  ;;  %v881_v60 = vld [vmem:[%s2852_s7 + $0x3f8] sm:$0xff] }
  0xc3   : > { %1863 = vst [vmem:[%s2867_s20 + $0x2a8] sm:$0xff] %v1351_v5  ;;  %v351_v5 = vld [vmem:[%s2845_s19 + $0x368] sm:$0xff]  ;;  %v1374_v10 = vadd.f32 %v862_v3, %v350_v2  ;;  %v882_v63 = vld [vmem:[%s2852_s7 + $0x400] sm:$0xff] }
  0xc4   : > { %1864 = vst [vmem:[%s2867_s20 + $0x2b0] sm:$0xff] %v1352_v8  ;;  %v352_v8 = vld [vmem:[%s2845_s19 + $0x370] sm:$0xff]  ;;  %v1375_v13 = vadd.f32 %v863_v6, %v351_v5  ;;  %v883_v2 = vld [vmem:[%s2852_s7 + $0x408] sm:$0xff] }
  0xc5   : > { %1865 = vst [vmem:[%s2867_s20 + $0x2b8] sm:$0xff] %v1353_v11  ;;  %v353_v11 = vld [vmem:[%s2845_s19 + $0x378] sm:$0xff]  ;;  %v1376_v16 = vadd.f32 %v864_v9, %v352_v8  ;;  %v884_v5 = vld [vmem:[%s2852_s7 + $0x410] sm:$0xff] }
  0xc6   : > { %1866 = vst [vmem:[%s2867_s20 + $0x2c0] sm:$0xff] %v1354_v14  ;;  %v354_v14 = vld [vmem:[%s2845_s19 + $0x380] sm:$0xff]  ;;  %v1377_v19 = vadd.f32 %v865_v12, %v353_v11  ;;  %v885_v8 = vld [vmem:[%s2852_s7 + $0x418] sm:$0xff] }
  0xc7   : > { %1867 = vst [vmem:[%s2867_s20 + $0x2c8] sm:$0xff] %v1355_v17  ;;  %v355_v17 = vld [vmem:[%s2845_s19 + $0x388] sm:$0xff]  ;;  %v1378_v22 = vadd.f32 %v866_v15, %v354_v14  ;;  %v886_v11 = vld [vmem:[%s2852_s7 + $0x420] sm:$0xff] }
  0xc8   : > { %1868 = vst [vmem:[%s2867_s20 + $0x2d0] sm:$0xff] %v1356_v20  ;;  %v356_v20 = vld [vmem:[%s2845_s19 + $0x390] sm:$0xff]  ;;  %v1379_v25 = vadd.f32 %v867_v18, %v355_v17  ;;  %v887_v14 = vld [vmem:[%s2852_s7 + $0x428] sm:$0xff] }
  0xc9   : > { %1869 = vst [vmem:[%s2867_s20 + $0x2d8] sm:$0xff] %v1357_v23  ;;  %v357_v23 = vld [vmem:[%s2845_s19 + $0x398] sm:$0xff]  ;;  %v1380_v28 = vadd.f32 %v868_v21, %v356_v20  ;;  %v888_v17 = vld [vmem:[%s2852_s7 + $0x430] sm:$0xff] }
  0xca   : > { %1870 = vst [vmem:[%s2867_s20 + $0x2e0] sm:$0xff] %v1358_v26  ;;  %v358_v26 = vld [vmem:[%s2845_s19 + $0x3a0] sm:$0xff]  ;;  %v1381_v31 = vadd.f32 %v869_v24, %v357_v23  ;;  %v889_v20 = vld [vmem:[%s2852_s7 + $0x438] sm:$0xff] }
  0xcb   : > { %1871 = vst [vmem:[%s2867_s20 + $0x2e8] sm:$0xff] %v1359_v29  ;;  %v359_v29 = vld [vmem:[%s2845_s19 + $0x3a8] sm:$0xff]  ;;  %v1382_v34 = vadd.f32 %v870_v27, %v358_v26  ;;  %v890_v23 = vld [vmem:[%s2852_s7 + $0x440] sm:$0xff] }
  0xcc   : > { %1872 = vst [vmem:[%s2867_s20 + $0x2f0] sm:$0xff] %v1360_v32  ;;  %v360_v32 = vld [vmem:[%s2845_s19 + $0x3b0] sm:$0xff]  ;;  %v1383_v37 = vadd.f32 %v871_v30, %v359_v29  ;;  %v891_v26 = vld [vmem:[%s2852_s7 + $0x448] sm:$0xff] }
  0xcd   : > { %1873 = vst [vmem:[%s2867_s20 + $0x2f8] sm:$0xff] %v1361_v35  ;;  %v361_v35 = vld [vmem:[%s2845_s19 + $0x3b8] sm:$0xff]  ;;  %v1384_v40 = vadd.f32 %v872_v33, %v360_v32  ;;  %v892_v29 = vld [vmem:[%s2852_s7 + $0x450] sm:$0xff] }
  0xce   : > { %1874 = vst [vmem:[%s2867_s20 + $0x300] sm:$0xff] %v1362_v38  ;;  %v362_v38 = vld [vmem:[%s2845_s19 + $0x3c0] sm:$0xff]  ;;  %v1385_v43 = vadd.f32 %v873_v36, %v361_v35  ;;  %v893_v32 = vld [vmem:[%s2852_s7 + $0x458] sm:$0xff] }
  0xcf   : > { %1875 = vst [vmem:[%s2867_s20 + $0x308] sm:$0xff] %v1363_v41  ;;  %v363_v41 = vld [vmem:[%s2845_s19 + $0x3c8] sm:$0xff]  ;;  %v1386_v46 = vadd.f32 %v874_v39, %v362_v38  ;;  %v894_v35 = vld [vmem:[%s2852_s7 + $0x460] sm:$0xff] }
  0xd0   : > { %1876 = vst [vmem:[%s2867_s20 + $0x310] sm:$0xff] %v1364_v44  ;;  %v364_v44 = vld [vmem:[%s2845_s19 + $0x3d0] sm:$0xff]  ;;  %v1387_v49 = vadd.f32 %v875_v42, %v363_v41  ;;  %v895_v38 = vld [vmem:[%s2852_s7 + $0x468] sm:$0xff] }
  0xd1   : > { %1877 = vst [vmem:[%s2867_s20 + $0x318] sm:$0xff] %v1365_v47  ;;  %v365_v47 = vld [vmem:[%s2845_s19 + $0x3d8] sm:$0xff]  ;;  %v1388_v52 = vadd.f32 %v876_v45, %v364_v44  ;;  %v896_v41 = vld [vmem:[%s2852_s7 + $0x470] sm:$0xff] }
  0xd2   : > { %1878 = vst [vmem:[%s2867_s20 + $0x320] sm:$0xff] %v1366_v50  ;;  %v366_v50 = vld [vmem:[%s2845_s19 + $0x3e0] sm:$0xff]  ;;  %v1389_v55 = vadd.f32 %v877_v48, %v365_v47  ;;  %v897_v44 = vld [vmem:[%s2852_s7 + $0x478] sm:$0xff] }
  0xd3   : > { %1879 = vst [vmem:[%s2867_s20 + $0x328] sm:$0xff] %v1367_v53  ;;  %v367_v53 = vld [vmem:[%s2845_s19 + $0x3e8] sm:$0xff]  ;;  %v1390_v58 = vadd.f32 %v878_v51, %v366_v50  ;;  %v898_v47 = vld [vmem:[%s2852_s7 + $0x480] sm:$0xff] }
  0xd4   : > { %1880 = vst [vmem:[%s2867_s20 + $0x330] sm:$0xff] %v1368_v56  ;;  %v368_v56 = vld [vmem:[%s2845_s19 + $0x3f0] sm:$0xff]  ;;  %v1391_v61 = vadd.f32 %v879_v54, %v367_v53  ;;  %v899_v50 = vld [vmem:[%s2852_s7 + $0x488] sm:$0xff] }
  0xd5   : > { %1881 = vst [vmem:[%s2867_s20 + $0x338] sm:$0xff] %v1369_v59  ;;  %v369_v59 = vld [vmem:[%s2845_s19 + $0x3f8] sm:$0xff]  ;;  %v1392_v0 = vadd.f32 %v880_v57, %v368_v56  ;;  %v900_v53 = vld [vmem:[%s2852_s7 + $0x490] sm:$0xff] }
  0xd6   : > { %1882 = vst [vmem:[%s2867_s20 + $0x340] sm:$0xff] %v1370_v62  ;;  %v370_v62 = vld [vmem:[%s2845_s19 + $0x400] sm:$0xff]  ;;  %v1393_v3 = vadd.f32 %v881_v60, %v369_v59  ;;  %v901_v56 = vld [vmem:[%s2852_s7 + $0x498] sm:$0xff] }
  0xd7   : > { %1883 = vst [vmem:[%s2867_s20 + $0x348] sm:$0xff] %v1371_v1  ;;  %v371_v1 = vld [vmem:[%s2845_s19 + $0x408] sm:$0xff]  ;;  %v1394_v6 = vadd.f32 %v882_v63, %v370_v62  ;;  %v902_v59 = vld [vmem:[%s2852_s7 + $0x4a0] sm:$0xff] }
  0xd8   : > { %1884 = vst [vmem:[%s2867_s20 + $0x350] sm:$0xff] %v1372_v4  ;;  %v372_v4 = vld [vmem:[%s2845_s19 + $0x410] sm:$0xff]  ;;  %v1395_v9 = vadd.f32 %v883_v2, %v371_v1  ;;  %v903_v62 = vld [vmem:[%s2852_s7 + $0x4a8] sm:$0xff] }
  0xd9   : > { %1885 = vst [vmem:[%s2867_s20 + $0x358] sm:$0xff] %v1373_v7  ;;  %v373_v7 = vld [vmem:[%s2845_s19 + $0x418] sm:$0xff]  ;;  %v1396_v12 = vadd.f32 %v884_v5, %v372_v4  ;;  %v904_v1 = vld [vmem:[%s2852_s7 + $0x4b0] sm:$0xff] }
  0xda   : > { %1886 = vst [vmem:[%s2867_s20 + $0x360] sm:$0xff] %v1374_v10  ;;  %v374_v10 = vld [vmem:[%s2845_s19 + $0x420] sm:$0xff]  ;;  %v1397_v15 = vadd.f32 %v885_v8, %v373_v7  ;;  %v905_v4 = vld [vmem:[%s2852_s7 + $0x4b8] sm:$0xff] }
  0xdb   : > { %1887 = vst [vmem:[%s2867_s20 + $0x368] sm:$0xff] %v1375_v13  ;;  %v375_v13 = vld [vmem:[%s2845_s19 + $0x428] sm:$0xff]  ;;  %v1398_v18 = vadd.f32 %v886_v11, %v374_v10  ;;  %v906_v7 = vld [vmem:[%s2852_s7 + $0x4c0] sm:$0xff] }
  0xdc   : > { %1888 = vst [vmem:[%s2867_s20 + $0x370] sm:$0xff] %v1376_v16  ;;  %v376_v16 = vld [vmem:[%s2845_s19 + $0x430] sm:$0xff]  ;;  %v1399_v21 = vadd.f32 %v887_v14, %v375_v13  ;;  %v907_v10 = vld [vmem:[%s2852_s7 + $0x4c8] sm:$0xff] }
  0xdd   : > { %1889 = vst [vmem:[%s2867_s20 + $0x378] sm:$0xff] %v1377_v19  ;;  %v377_v19 = vld [vmem:[%s2845_s19 + $0x438] sm:$0xff]  ;;  %v1400_v24 = vadd.f32 %v888_v17, %v376_v16  ;;  %v908_v13 = vld [vmem:[%s2852_s7 + $0x4d0] sm:$0xff] }
  0xde   : > { %1890 = vst [vmem:[%s2867_s20 + $0x380] sm:$0xff] %v1378_v22  ;;  %v378_v22 = vld [vmem:[%s2845_s19 + $0x440] sm:$0xff]  ;;  %v1401_v27 = vadd.f32 %v889_v20, %v377_v19  ;;  %v909_v16 = vld [vmem:[%s2852_s7 + $0x4d8] sm:$0xff] }
  0xdf   : > { %1891 = vst [vmem:[%s2867_s20 + $0x388] sm:$0xff] %v1379_v25  ;;  %v379_v25 = vld [vmem:[%s2845_s19 + $0x448] sm:$0xff]  ;;  %v1402_v30 = vadd.f32 %v890_v23, %v378_v22  ;;  %v910_v19 = vld [vmem:[%s2852_s7 + $0x4e0] sm:$0xff] }
  0xe0   : > { %1892 = vst [vmem:[%s2867_s20 + $0x390] sm:$0xff] %v1380_v28  ;;  %v380_v28 = vld [vmem:[%s2845_s19 + $0x450] sm:$0xff]  ;;  %v1403_v33 = vadd.f32 %v891_v26, %v379_v25  ;;  %v911_v22 = vld [vmem:[%s2852_s7 + $0x4e8] sm:$0xff] }
  0xe1   : > { %1893 = vst [vmem:[%s2867_s20 + $0x398] sm:$0xff] %v1381_v31  ;;  %v381_v31 = vld [vmem:[%s2845_s19 + $0x458] sm:$0xff]  ;;  %v1404_v36 = vadd.f32 %v892_v29, %v380_v28  ;;  %v912_v25 = vld [vmem:[%s2852_s7 + $0x4f0] sm:$0xff] }
  0xe2   : > { %1894 = vst [vmem:[%s2867_s20 + $0x3a0] sm:$0xff] %v1382_v34  ;;  %v382_v34 = vld [vmem:[%s2845_s19 + $0x460] sm:$0xff]  ;;  %v1405_v39 = vadd.f32 %v893_v32, %v381_v31  ;;  %v913_v28 = vld [vmem:[%s2852_s7 + $0x4f8] sm:$0xff] }
  0xe3   : > { %1895 = vst [vmem:[%s2867_s20 + $0x3a8] sm:$0xff] %v1383_v37  ;;  %v383_v37 = vld [vmem:[%s2845_s19 + $0x468] sm:$0xff]  ;;  %v1406_v42 = vadd.f32 %v894_v35, %v382_v34  ;;  %v914_v31 = vld [vmem:[%s2852_s7 + $0x500] sm:$0xff] }
  0xe4   : > { %1896 = vst [vmem:[%s2867_s20 + $0x3b0] sm:$0xff] %v1384_v40  ;;  %v384_v40 = vld [vmem:[%s2845_s19 + $0x470] sm:$0xff]  ;;  %v1407_v45 = vadd.f32 %v895_v38, %v383_v37  ;;  %v915_v34 = vld [vmem:[%s2852_s7 + $0x508] sm:$0xff] }
  0xe5   : > { %1897 = vst [vmem:[%s2867_s20 + $0x3b8] sm:$0xff] %v1385_v43  ;;  %v385_v43 = vld [vmem:[%s2845_s19 + $0x478] sm:$0xff]  ;;  %v1408_v48 = vadd.f32 %v896_v41, %v384_v40  ;;  %v916_v37 = vld [vmem:[%s2852_s7 + $0x510] sm:$0xff] }
  0xe6   : > { %1898 = vst [vmem:[%s2867_s20 + $0x3c0] sm:$0xff] %v1386_v46  ;;  %v386_v46 = vld [vmem:[%s2845_s19 + $0x480] sm:$0xff]  ;;  %v1409_v51 = vadd.f32 %v897_v44, %v385_v43  ;;  %v917_v40 = vld [vmem:[%s2852_s7 + $0x518] sm:$0xff] }
  0xe7   : > { %1899 = vst [vmem:[%s2867_s20 + $0x3c8] sm:$0xff] %v1387_v49  ;;  %v387_v49 = vld [vmem:[%s2845_s19 + $0x488] sm:$0xff]  ;;  %v1410_v54 = vadd.f32 %v898_v47, %v386_v46  ;;  %v918_v43 = vld [vmem:[%s2852_s7 + $0x520] sm:$0xff] }
  0xe8   : > { %1900 = vst [vmem:[%s2867_s20 + $0x3d0] sm:$0xff] %v1388_v52  ;;  %v388_v52 = vld [vmem:[%s2845_s19 + $0x490] sm:$0xff]  ;;  %v1411_v57 = vadd.f32 %v899_v50, %v387_v49  ;;  %v919_v46 = vld [vmem:[%s2852_s7 + $0x528] sm:$0xff] }
  0xe9   : > { %1901 = vst [vmem:[%s2867_s20 + $0x3d8] sm:$0xff] %v1389_v55  ;;  %v389_v55 = vld [vmem:[%s2845_s19 + $0x498] sm:$0xff]  ;;  %v1412_v60 = vadd.f32 %v900_v53, %v388_v52  ;;  %v920_v49 = vld [vmem:[%s2852_s7 + $0x530] sm:$0xff] }
  0xea   : > { %1902 = vst [vmem:[%s2867_s20 + $0x3e0] sm:$0xff] %v1390_v58  ;;  %v390_v58 = vld [vmem:[%s2845_s19 + $0x4a0] sm:$0xff]  ;;  %v1413_v63 = vadd.f32 %v901_v56, %v389_v55  ;;  %v921_v52 = vld [vmem:[%s2852_s7 + $0x538] sm:$0xff] }
  0xeb   : > { %1903 = vst [vmem:[%s2867_s20 + $0x3e8] sm:$0xff] %v1391_v61  ;;  %v391_v61 = vld [vmem:[%s2845_s19 + $0x4a8] sm:$0xff]  ;;  %v1414_v2 = vadd.f32 %v902_v59, %v390_v58  ;;  %v922_v55 = vld [vmem:[%s2852_s7 + $0x540] sm:$0xff] }
  0xec   : > { %1904 = vst [vmem:[%s2867_s20 + $0x3f0] sm:$0xff] %v1392_v0  ;;  %v392_v0 = vld [vmem:[%s2845_s19 + $0x4b0] sm:$0xff]  ;;  %v1415_v5 = vadd.f32 %v903_v62, %v391_v61  ;;  %v923_v58 = vld [vmem:[%s2852_s7 + $0x548] sm:$0xff] }
  0xed   : > { %1905 = vst [vmem:[%s2867_s20 + $0x3f8] sm:$0xff] %v1393_v3  ;;  %v393_v3 = vld [vmem:[%s2845_s19 + $0x4b8] sm:$0xff]  ;;  %v1416_v8 = vadd.f32 %v904_v1, %v392_v0  ;;  %v924_v61 = vld [vmem:[%s2852_s7 + $0x550] sm:$0xff] }
  0xee   : > { %1906 = vst [vmem:[%s2867_s20 + $0x400] sm:$0xff] %v1394_v6  ;;  %v394_v6 = vld [vmem:[%s2845_s19 + $0x4c0] sm:$0xff]  ;;  %v1417_v11 = vadd.f32 %v905_v4, %v393_v3  ;;  %v925_v0 = vld [vmem:[%s2852_s7 + $0x558] sm:$0xff] }
  0xef   : > { %1907 = vst [vmem:[%s2867_s20 + $0x408] sm:$0xff] %v1395_v9  ;;  %v395_v9 = vld [vmem:[%s2845_s19 + $0x4c8] sm:$0xff]  ;;  %v1418_v14 = vadd.f32 %v906_v7, %v394_v6  ;;  %v926_v3 = vld [vmem:[%s2852_s7 + $0x560] sm:$0xff] }
  0xf0   : > { %1908 = vst [vmem:[%s2867_s20 + $0x410] sm:$0xff] %v1396_v12  ;;  %v396_v12 = vld [vmem:[%s2845_s19 + $0x4d0] sm:$0xff]  ;;  %v1419_v17 = vadd.f32 %v907_v10, %v395_v9  ;;  %v927_v6 = vld [vmem:[%s2852_s7 + $0x568] sm:$0xff] }
  0xf1   : > { %1909 = vst [vmem:[%s2867_s20 + $0x418] sm:$0xff] %v1397_v15  ;;  %v397_v15 = vld [vmem:[%s2845_s19 + $0x4d8] sm:$0xff]  ;;  %v1420_v20 = vadd.f32 %v908_v13, %v396_v12  ;;  %v928_v9 = vld [vmem:[%s2852_s7 + $0x570] sm:$0xff] }
  0xf2   : > { %1910 = vst [vmem:[%s2867_s20 + $0x420] sm:$0xff] %v1398_v18  ;;  %v398_v18 = vld [vmem:[%s2845_s19 + $0x4e0] sm:$0xff]  ;;  %v1421_v23 = vadd.f32 %v909_v16, %v397_v15  ;;  %v929_v12 = vld [vmem:[%s2852_s7 + $0x578] sm:$0xff] }
  0xf3   : > { %1911 = vst [vmem:[%s2867_s20 + $0x428] sm:$0xff] %v1399_v21  ;;  %v399_v21 = vld [vmem:[%s2845_s19 + $0x4e8] sm:$0xff]  ;;  %v1422_v26 = vadd.f32 %v910_v19, %v398_v18  ;;  %v930_v15 = vld [vmem:[%s2852_s7 + $0x580] sm:$0xff] }
  0xf4   : > { %1912 = vst [vmem:[%s2867_s20 + $0x430] sm:$0xff] %v1400_v24  ;;  %v400_v24 = vld [vmem:[%s2845_s19 + $0x4f0] sm:$0xff]  ;;  %v1423_v29 = vadd.f32 %v911_v22, %v399_v21  ;;  %v931_v18 = vld [vmem:[%s2852_s7 + $0x588] sm:$0xff] }
  0xf5   : > { %1913 = vst [vmem:[%s2867_s20 + $0x438] sm:$0xff] %v1401_v27  ;;  %v401_v27 = vld [vmem:[%s2845_s19 + $0x4f8] sm:$0xff]  ;;  %v1424_v32 = vadd.f32 %v912_v25, %v400_v24  ;;  %v932_v21 = vld [vmem:[%s2852_s7 + $0x590] sm:$0xff] }
  0xf6   : > { %1914 = vst [vmem:[%s2867_s20 + $0x440] sm:$0xff] %v1402_v30  ;;  %v402_v30 = vld [vmem:[%s2845_s19 + $0x500] sm:$0xff]  ;;  %v1425_v35 = vadd.f32 %v913_v28, %v401_v27  ;;  %v933_v24 = vld [vmem:[%s2852_s7 + $0x598] sm:$0xff] }
  0xf7   : > { %1915 = vst [vmem:[%s2867_s20 + $0x448] sm:$0xff] %v1403_v33  ;;  %v403_v33 = vld [vmem:[%s2845_s19 + $0x508] sm:$0xff]  ;;  %v1426_v38 = vadd.f32 %v914_v31, %v402_v30  ;;  %v934_v27 = vld [vmem:[%s2852_s7 + $0x5a0] sm:$0xff] }
  0xf8   : > { %1916 = vst [vmem:[%s2867_s20 + $0x450] sm:$0xff] %v1404_v36  ;;  %v404_v36 = vld [vmem:[%s2845_s19 + $0x510] sm:$0xff]  ;;  %v1427_v41 = vadd.f32 %v915_v34, %v403_v33  ;;  %v935_v30 = vld [vmem:[%s2852_s7 + $0x5a8] sm:$0xff] }
  0xf9   : > { %1917 = vst [vmem:[%s2867_s20 + $0x458] sm:$0xff] %v1405_v39  ;;  %v405_v39 = vld [vmem:[%s2845_s19 + $0x518] sm:$0xff]  ;;  %v1428_v44 = vadd.f32 %v916_v37, %v404_v36  ;;  %v936_v33 = vld [vmem:[%s2852_s7 + $0x5b0] sm:$0xff] }
  0xfa   : > { %1918 = vst [vmem:[%s2867_s20 + $0x460] sm:$0xff] %v1406_v42  ;;  %v406_v42 = vld [vmem:[%s2845_s19 + $0x520] sm:$0xff]  ;;  %v1429_v47 = vadd.f32 %v917_v40, %v405_v39  ;;  %v937_v36 = vld [vmem:[%s2852_s7 + $0x5b8] sm:$0xff] }
  0xfb   : > { %1919 = vst [vmem:[%s2867_s20 + $0x468] sm:$0xff] %v1407_v45  ;;  %v407_v45 = vld [vmem:[%s2845_s19 + $0x528] sm:$0xff]  ;;  %v1430_v50 = vadd.f32 %v918_v43, %v406_v42  ;;  %v938_v39 = vld [vmem:[%s2852_s7 + $0x5c0] sm:$0xff] }
  0xfc   : > { %1920 = vst [vmem:[%s2867_s20 + $0x470] sm:$0xff] %v1408_v48  ;;  %v408_v48 = vld [vmem:[%s2845_s19 + $0x530] sm:$0xff]  ;;  %v1431_v53 = vadd.f32 %v919_v46, %v407_v45  ;;  %v939_v42 = vld [vmem:[%s2852_s7 + $0x5c8] sm:$0xff] }
  0xfd   : > { %1921 = vst [vmem:[%s2867_s20 + $0x478] sm:$0xff] %v1409_v51  ;;  %v409_v51 = vld [vmem:[%s2845_s19 + $0x538] sm:$0xff]  ;;  %v1432_v56 = vadd.f32 %v920_v49, %v408_v48  ;;  %v940_v45 = vld [vmem:[%s2852_s7 + $0x5d0] sm:$0xff] }
  0xfe   : > { %1922 = vst [vmem:[%s2867_s20 + $0x480] sm:$0xff] %v1410_v54  ;;  %v410_v54 = vld [vmem:[%s2845_s19 + $0x540] sm:$0xff]  ;;  %v1433_v59 = vadd.f32 %v921_v52, %v409_v51  ;;  %v941_v48 = vld [vmem:[%s2852_s7 + $0x5d8] sm:$0xff] }
  0xff   : > { %1923 = vst [vmem:[%s2867_s20 + $0x488] sm:$0xff] %v1411_v57  ;;  %v411_v57 = vld [vmem:[%s2845_s19 + $0x548] sm:$0xff]  ;;  %v1434_v62 = vadd.f32 %v922_v55, %v410_v54  ;;  %v942_v51 = vld [vmem:[%s2852_s7 + $0x5e0] sm:$0xff] }
 0x100   : > { %1924 = vst [vmem:[%s2867_s20 + $0x490] sm:$0xff] %v1412_v60  ;;  %v412_v60 = vld [vmem:[%s2845_s19 + $0x550] sm:$0xff]  ;;  %v1435_v1 = vadd.f32 %v923_v58, %v411_v57  ;;  %v943_v54 = vld [vmem:[%s2852_s7 + $0x5e8] sm:$0xff] }
 0x101   : > { %1925 = vst [vmem:[%s2867_s20 + $0x498] sm:$0xff] %v1413_v63  ;;  %v413_v63 = vld [vmem:[%s2845_s19 + $0x558] sm:$0xff]  ;;  %v1436_v4 = vadd.f32 %v924_v61, %v412_v60  ;;  %v944_v57 = vld [vmem:[%s2852_s7 + $0x5f0] sm:$0xff] }
 0x102   : > { %1926 = vst [vmem:[%s2867_s20 + $0x4a0] sm:$0xff] %v1414_v2  ;;  %v414_v2 = vld [vmem:[%s2845_s19 + $0x560] sm:$0xff]  ;;  %v1437_v7 = vadd.f32 %v925_v0, %v413_v63  ;;  %v945_v60 = vld [vmem:[%s2852_s7 + $0x5f8] sm:$0xff] }
 0x103   : > { %1927 = vst [vmem:[%s2867_s20 + $0x4a8] sm:$0xff] %v1415_v5  ;;  %v415_v5 = vld [vmem:[%s2845_s19 + $0x568] sm:$0xff]  ;;  %v1438_v10 = vadd.f32 %v926_v3, %v414_v2  ;;  %v946_v63 = vld [vmem:[%s2852_s7 + $0x600] sm:$0xff] }
 0x104   : > { %1928 = vst [vmem:[%s2867_s20 + $0x4b0] sm:$0xff] %v1416_v8  ;;  %v416_v8 = vld [vmem:[%s2845_s19 + $0x570] sm:$0xff]  ;;  %v1439_v13 = vadd.f32 %v927_v6, %v415_v5  ;;  %v947_v2 = vld [vmem:[%s2852_s7 + $0x608] sm:$0xff] }
 0x105   : > { %1929 = vst [vmem:[%s2867_s20 + $0x4b8] sm:$0xff] %v1417_v11  ;;  %v417_v11 = vld [vmem:[%s2845_s19 + $0x578] sm:$0xff]  ;;  %v1440_v16 = vadd.f32 %v928_v9, %v416_v8  ;;  %v948_v5 = vld [vmem:[%s2852_s7 + $0x610] sm:$0xff] }
 0x106   : > { %1930 = vst [vmem:[%s2867_s20 + $0x4c0] sm:$0xff] %v1418_v14  ;;  %v418_v14 = vld [vmem:[%s2845_s19 + $0x580] sm:$0xff]  ;;  %v1441_v19 = vadd.f32 %v929_v12, %v417_v11  ;;  %v949_v8 = vld [vmem:[%s2852_s7 + $0x618] sm:$0xff] }
 0x107   : > { %1931 = vst [vmem:[%s2867_s20 + $0x4c8] sm:$0xff] %v1419_v17  ;;  %v419_v17 = vld [vmem:[%s2845_s19 + $0x588] sm:$0xff]  ;;  %v1442_v22 = vadd.f32 %v930_v15, %v418_v14  ;;  %v950_v11 = vld [vmem:[%s2852_s7 + $0x620] sm:$0xff] }
 0x108   : > { %1932 = vst [vmem:[%s2867_s20 + $0x4d0] sm:$0xff] %v1420_v20  ;;  %v420_v20 = vld [vmem:[%s2845_s19 + $0x590] sm:$0xff]  ;;  %v1443_v25 = vadd.f32 %v931_v18, %v419_v17  ;;  %v951_v14 = vld [vmem:[%s2852_s7 + $0x628] sm:$0xff] }
 0x109   : > { %1933 = vst [vmem:[%s2867_s20 + $0x4d8] sm:$0xff] %v1421_v23  ;;  %v421_v23 = vld [vmem:[%s2845_s19 + $0x598] sm:$0xff]  ;;  %v1444_v28 = vadd.f32 %v932_v21, %v420_v20  ;;  %v952_v17 = vld [vmem:[%s2852_s7 + $0x630] sm:$0xff] }
 0x10a   : > { %1934 = vst [vmem:[%s2867_s20 + $0x4e0] sm:$0xff] %v1422_v26  ;;  %v422_v26 = vld [vmem:[%s2845_s19 + $0x5a0] sm:$0xff]  ;;  %v1445_v31 = vadd.f32 %v933_v24, %v421_v23  ;;  %v953_v20 = vld [vmem:[%s2852_s7 + $0x638] sm:$0xff] }
 0x10b   : > { %1935 = vst [vmem:[%s2867_s20 + $0x4e8] sm:$0xff] %v1423_v29  ;;  %v423_v29 = vld [vmem:[%s2845_s19 + $0x5a8] sm:$0xff]  ;;  %v1446_v34 = vadd.f32 %v934_v27, %v422_v26  ;;  %v954_v23 = vld [vmem:[%s2852_s7 + $0x640] sm:$0xff] }
 0x10c   : > { %1936 = vst [vmem:[%s2867_s20 + $0x4f0] sm:$0xff] %v1424_v32  ;;  %v424_v32 = vld [vmem:[%s2845_s19 + $0x5b0] sm:$0xff]  ;;  %v1447_v37 = vadd.f32 %v935_v30, %v423_v29  ;;  %v955_v26 = vld [vmem:[%s2852_s7 + $0x648] sm:$0xff] }
 0x10d   : > { %1937 = vst [vmem:[%s2867_s20 + $0x4f8] sm:$0xff] %v1425_v35  ;;  %v425_v35 = vld [vmem:[%s2845_s19 + $0x5b8] sm:$0xff]  ;;  %v1448_v40 = vadd.f32 %v936_v33, %v424_v32  ;;  %v956_v29 = vld [vmem:[%s2852_s7 + $0x650] sm:$0xff] }
 0x10e   : > { %1938 = vst [vmem:[%s2867_s20 + $0x500] sm:$0xff] %v1426_v38  ;;  %v426_v38 = vld [vmem:[%s2845_s19 + $0x5c0] sm:$0xff]  ;;  %v1449_v43 = vadd.f32 %v937_v36, %v425_v35  ;;  %v957_v32 = vld [vmem:[%s2852_s7 + $0x658] sm:$0xff] }
 0x10f   : > { %1939 = vst [vmem:[%s2867_s20 + $0x508] sm:$0xff] %v1427_v41  ;;  %v427_v41 = vld [vmem:[%s2845_s19 + $0x5c8] sm:$0xff]  ;;  %v1450_v46 = vadd.f32 %v938_v39, %v426_v38  ;;  %v958_v35 = vld [vmem:[%s2852_s7 + $0x660] sm:$0xff] }
 0x110   : > { %1940 = vst [vmem:[%s2867_s20 + $0x510] sm:$0xff] %v1428_v44  ;;  %v428_v44 = vld [vmem:[%s2845_s19 + $0x5d0] sm:$0xff]  ;;  %v1451_v49 = vadd.f32 %v939_v42, %v427_v41  ;;  %v959_v38 = vld [vmem:[%s2852_s7 + $0x668] sm:$0xff] }
 0x111   : > { %1941 = vst [vmem:[%s2867_s20 + $0x518] sm:$0xff] %v1429_v47  ;;  %v429_v47 = vld [vmem:[%s2845_s19 + $0x5d8] sm:$0xff]  ;;  %v1452_v52 = vadd.f32 %v940_v45, %v428_v44  ;;  %v960_v41 = vld [vmem:[%s2852_s7 + $0x670] sm:$0xff] }
 0x112   : > { %1942 = vst [vmem:[%s2867_s20 + $0x520] sm:$0xff] %v1430_v50  ;;  %v430_v50 = vld [vmem:[%s2845_s19 + $0x5e0] sm:$0xff]  ;;  %v1453_v55 = vadd.f32 %v941_v48, %v429_v47  ;;  %v961_v44 = vld [vmem:[%s2852_s7 + $0x678] sm:$0xff] }
 0x113   : > { %1943 = vst [vmem:[%s2867_s20 + $0x528] sm:$0xff] %v1431_v53  ;;  %v431_v53 = vld [vmem:[%s2845_s19 + $0x5e8] sm:$0xff]  ;;  %v1454_v58 = vadd.f32 %v942_v51, %v430_v50  ;;  %v962_v47 = vld [vmem:[%s2852_s7 + $0x680] sm:$0xff] }
 0x114   : > { %1944 = vst [vmem:[%s2867_s20 + $0x530] sm:$0xff] %v1432_v56  ;;  %v432_v56 = vld [vmem:[%s2845_s19 + $0x5f0] sm:$0xff]  ;;  %v1455_v61 = vadd.f32 %v943_v54, %v431_v53  ;;  %v963_v50 = vld [vmem:[%s2852_s7 + $0x688] sm:$0xff] }
 0x115   : > { %1945 = vst [vmem:[%s2867_s20 + $0x538] sm:$0xff] %v1433_v59  ;;  %v433_v59 = vld [vmem:[%s2845_s19 + $0x5f8] sm:$0xff]  ;;  %v1456_v0 = vadd.f32 %v944_v57, %v432_v56  ;;  %v964_v53 = vld [vmem:[%s2852_s7 + $0x690] sm:$0xff] }
 0x116   : > { %1946 = vst [vmem:[%s2867_s20 + $0x540] sm:$0xff] %v1434_v62  ;;  %v434_v62 = vld [vmem:[%s2845_s19 + $0x600] sm:$0xff]  ;;  %v1457_v3 = vadd.f32 %v945_v60, %v433_v59  ;;  %v965_v56 = vld [vmem:[%s2852_s7 + $0x698] sm:$0xff] }
 0x117   : > { %1947 = vst [vmem:[%s2867_s20 + $0x548] sm:$0xff] %v1435_v1  ;;  %v435_v1 = vld [vmem:[%s2845_s19 + $0x608] sm:$0xff]  ;;  %v1458_v6 = vadd.f32 %v946_v63, %v434_v62  ;;  %v966_v59 = vld [vmem:[%s2852_s7 + $0x6a0] sm:$0xff] }
 0x118   : > { %1948 = vst [vmem:[%s2867_s20 + $0x550] sm:$0xff] %v1436_v4  ;;  %v436_v4 = vld [vmem:[%s2845_s19 + $0x610] sm:$0xff]  ;;  %v1459_v9 = vadd.f32 %v947_v2, %v435_v1  ;;  %v967_v62 = vld [vmem:[%s2852_s7 + $0x6a8] sm:$0xff] }
 0x119   : > { %1949 = vst [vmem:[%s2867_s20 + $0x558] sm:$0xff] %v1437_v7  ;;  %v437_v7 = vld [vmem:[%s2845_s19 + $0x618] sm:$0xff]  ;;  %v1460_v12 = vadd.f32 %v948_v5, %v436_v4  ;;  %v968_v1 = vld [vmem:[%s2852_s7 + $0x6b0] sm:$0xff] }
 0x11a   : > { %1950 = vst [vmem:[%s2867_s20 + $0x560] sm:$0xff] %v1438_v10  ;;  %v438_v10 = vld [vmem:[%s2845_s19 + $0x620] sm:$0xff]  ;;  %v1461_v15 = vadd.f32 %v949_v8, %v437_v7  ;;  %v969_v4 = vld [vmem:[%s2852_s7 + $0x6b8] sm:$0xff] }
 0x11b   : > { %1951 = vst [vmem:[%s2867_s20 + $0x568] sm:$0xff] %v1439_v13  ;;  %v439_v13 = vld [vmem:[%s2845_s19 + $0x628] sm:$0xff]  ;;  %v1462_v18 = vadd.f32 %v950_v11, %v438_v10  ;;  %v970_v7 = vld [vmem:[%s2852_s7 + $0x6c0] sm:$0xff] }
 0x11c   : > { %1952 = vst [vmem:[%s2867_s20 + $0x570] sm:$0xff] %v1440_v16  ;;  %v440_v16 = vld [vmem:[%s2845_s19 + $0x630] sm:$0xff]  ;;  %v1463_v21 = vadd.f32 %v951_v14, %v439_v13  ;;  %v971_v10 = vld [vmem:[%s2852_s7 + $0x6c8] sm:$0xff] }
 0x11d   : > { %1953 = vst [vmem:[%s2867_s20 + $0x578] sm:$0xff] %v1441_v19  ;;  %v441_v19 = vld [vmem:[%s2845_s19 + $0x638] sm:$0xff]  ;;  %v1464_v24 = vadd.f32 %v952_v17, %v440_v16  ;;  %v972_v13 = vld [vmem:[%s2852_s7 + $0x6d0] sm:$0xff] }
 0x11e   : > { %1954 = vst [vmem:[%s2867_s20 + $0x580] sm:$0xff] %v1442_v22  ;;  %v442_v22 = vld [vmem:[%s2845_s19 + $0x640] sm:$0xff]  ;;  %v1465_v27 = vadd.f32 %v953_v20, %v441_v19  ;;  %v973_v16 = vld [vmem:[%s2852_s7 + $0x6d8] sm:$0xff] }
 0x11f   : > { %1955 = vst [vmem:[%s2867_s20 + $0x588] sm:$0xff] %v1443_v25  ;;  %v443_v25 = vld [vmem:[%s2845_s19 + $0x648] sm:$0xff]  ;;  %v1466_v30 = vadd.f32 %v954_v23, %v442_v22  ;;  %v974_v19 = vld [vmem:[%s2852_s7 + $0x6e0] sm:$0xff] }
 0x120   : > { %1956 = vst [vmem:[%s2867_s20 + $0x590] sm:$0xff] %v1444_v28  ;;  %v444_v28 = vld [vmem:[%s2845_s19 + $0x650] sm:$0xff]  ;;  %v1467_v33 = vadd.f32 %v955_v26, %v443_v25  ;;  %v975_v22 = vld [vmem:[%s2852_s7 + $0x6e8] sm:$0xff] }
 0x121   : > { %1957 = vst [vmem:[%s2867_s20 + $0x598] sm:$0xff] %v1445_v31  ;;  %v445_v31 = vld [vmem:[%s2845_s19 + $0x658] sm:$0xff]  ;;  %v1468_v36 = vadd.f32 %v956_v29, %v444_v28  ;;  %v976_v25 = vld [vmem:[%s2852_s7 + $0x6f0] sm:$0xff] }
 0x122   : > { %1958 = vst [vmem:[%s2867_s20 + $0x5a0] sm:$0xff] %v1446_v34  ;;  %v446_v34 = vld [vmem:[%s2845_s19 + $0x660] sm:$0xff]  ;;  %v1469_v39 = vadd.f32 %v957_v32, %v445_v31  ;;  %v977_v28 = vld [vmem:[%s2852_s7 + $0x6f8] sm:$0xff] }
 0x123   : > { %1959 = vst [vmem:[%s2867_s20 + $0x5a8] sm:$0xff] %v1447_v37  ;;  %v447_v37 = vld [vmem:[%s2845_s19 + $0x668] sm:$0xff]  ;;  %v1470_v42 = vadd.f32 %v958_v35, %v446_v34  ;;  %v978_v31 = vld [vmem:[%s2852_s7 + $0x700] sm:$0xff] }
 0x124   : > { %1960 = vst [vmem:[%s2867_s20 + $0x5b0] sm:$0xff] %v1448_v40  ;;  %v448_v40 = vld [vmem:[%s2845_s19 + $0x670] sm:$0xff]  ;;  %v1471_v45 = vadd.f32 %v959_v38, %v447_v37  ;;  %v979_v34 = vld [vmem:[%s2852_s7 + $0x708] sm:$0xff] }
 0x125   : > { %1961 = vst [vmem:[%s2867_s20 + $0x5b8] sm:$0xff] %v1449_v43  ;;  %v449_v43 = vld [vmem:[%s2845_s19 + $0x678] sm:$0xff]  ;;  %v1472_v48 = vadd.f32 %v960_v41, %v448_v40  ;;  %v980_v37 = vld [vmem:[%s2852_s7 + $0x710] sm:$0xff] }
 0x126   : > { %1962 = vst [vmem:[%s2867_s20 + $0x5c0] sm:$0xff] %v1450_v46  ;;  %v450_v46 = vld [vmem:[%s2845_s19 + $0x680] sm:$0xff]  ;;  %v1473_v51 = vadd.f32 %v961_v44, %v449_v43  ;;  %v981_v40 = vld [vmem:[%s2852_s7 + $0x718] sm:$0xff] }
 0x127   : > { %1963 = vst [vmem:[%s2867_s20 + $0x5c8] sm:$0xff] %v1451_v49  ;;  %v451_v49 = vld [vmem:[%s2845_s19 + $0x688] sm:$0xff]  ;;  %v1474_v54 = vadd.f32 %v962_v47, %v450_v46  ;;  %v982_v43 = vld [vmem:[%s2852_s7 + $0x720] sm:$0xff] }
 0x128   : > { %1964 = vst [vmem:[%s2867_s20 + $0x5d0] sm:$0xff] %v1452_v52  ;;  %v452_v52 = vld [vmem:[%s2845_s19 + $0x690] sm:$0xff]  ;;  %v1475_v57 = vadd.f32 %v963_v50, %v451_v49  ;;  %v983_v46 = vld [vmem:[%s2852_s7 + $0x728] sm:$0xff] }
 0x129   : > { %1965 = vst [vmem:[%s2867_s20 + $0x5d8] sm:$0xff] %v1453_v55  ;;  %v453_v55 = vld [vmem:[%s2845_s19 + $0x698] sm:$0xff]  ;;  %v1476_v60 = vadd.f32 %v964_v53, %v452_v52  ;;  %v984_v49 = vld [vmem:[%s2852_s7 + $0x730] sm:$0xff] }
 0x12a   : > { %1966 = vst [vmem:[%s2867_s20 + $0x5e0] sm:$0xff] %v1454_v58  ;;  %v454_v58 = vld [vmem:[%s2845_s19 + $0x6a0] sm:$0xff]  ;;  %v1477_v63 = vadd.f32 %v965_v56, %v453_v55  ;;  %v985_v52 = vld [vmem:[%s2852_s7 + $0x738] sm:$0xff] }
 0x12b   : > { %1967 = vst [vmem:[%s2867_s20 + $0x5e8] sm:$0xff] %v1455_v61  ;;  %v455_v61 = vld [vmem:[%s2845_s19 + $0x6a8] sm:$0xff]  ;;  %v1478_v2 = vadd.f32 %v966_v59, %v454_v58  ;;  %v986_v55 = vld [vmem:[%s2852_s7 + $0x740] sm:$0xff] }
 0x12c   : > { %1968 = vst [vmem:[%s2867_s20 + $0x5f0] sm:$0xff] %v1456_v0  ;;  %v456_v0 = vld [vmem:[%s2845_s19 + $0x6b0] sm:$0xff]  ;;  %v1479_v5 = vadd.f32 %v967_v62, %v455_v61  ;;  %v987_v58 = vld [vmem:[%s2852_s7 + $0x748] sm:$0xff] }
 0x12d   : > { %1969 = vst [vmem:[%s2867_s20 + $0x5f8] sm:$0xff] %v1457_v3  ;;  %v457_v3 = vld [vmem:[%s2845_s19 + $0x6b8] sm:$0xff]  ;;  %v1480_v8 = vadd.f32 %v968_v1, %v456_v0  ;;  %v988_v61 = vld [vmem:[%s2852_s7 + $0x750] sm:$0xff] }
 0x12e   : > { %1970 = vst [vmem:[%s2867_s20 + $0x600] sm:$0xff] %v1458_v6  ;;  %v458_v6 = vld [vmem:[%s2845_s19 + $0x6c0] sm:$0xff]  ;;  %v1481_v11 = vadd.f32 %v969_v4, %v457_v3  ;;  %v989_v0 = vld [vmem:[%s2852_s7 + $0x758] sm:$0xff] }
 0x12f   : > { %1971 = vst [vmem:[%s2867_s20 + $0x608] sm:$0xff] %v1459_v9  ;;  %v459_v9 = vld [vmem:[%s2845_s19 + $0x6c8] sm:$0xff]  ;;  %v1482_v14 = vadd.f32 %v970_v7, %v458_v6  ;;  %v990_v3 = vld [vmem:[%s2852_s7 + $0x760] sm:$0xff] }
 0x130   : > { %1972 = vst [vmem:[%s2867_s20 + $0x610] sm:$0xff] %v1460_v12  ;;  %v460_v12 = vld [vmem:[%s2845_s19 + $0x6d0] sm:$0xff]  ;;  %v1483_v17 = vadd.f32 %v971_v10, %v459_v9  ;;  %v991_v6 = vld [vmem:[%s2852_s7 + $0x768] sm:$0xff] }
 0x131   : > { %1973 = vst [vmem:[%s2867_s20 + $0x618] sm:$0xff] %v1461_v15  ;;  %v461_v15 = vld [vmem:[%s2845_s19 + $0x6d8] sm:$0xff]  ;;  %v1484_v20 = vadd.f32 %v972_v13, %v460_v12  ;;  %v992_v9 = vld [vmem:[%s2852_s7 + $0x770] sm:$0xff] }
 0x132   : > { %1974 = vst [vmem:[%s2867_s20 + $0x620] sm:$0xff] %v1462_v18  ;;  %v462_v18 = vld [vmem:[%s2845_s19 + $0x6e0] sm:$0xff]  ;;  %v1485_v23 = vadd.f32 %v973_v16, %v461_v15  ;;  %v993_v12 = vld [vmem:[%s2852_s7 + $0x778] sm:$0xff] }
 0x133   : > { %1975 = vst [vmem:[%s2867_s20 + $0x628] sm:$0xff] %v1463_v21  ;;  %v463_v21 = vld [vmem:[%s2845_s19 + $0x6e8] sm:$0xff]  ;;  %v1486_v26 = vadd.f32 %v974_v19, %v462_v18  ;;  %v994_v15 = vld [vmem:[%s2852_s7 + $0x780] sm:$0xff] }
 0x134   : > { %1976 = vst [vmem:[%s2867_s20 + $0x630] sm:$0xff] %v1464_v24  ;;  %v464_v24 = vld [vmem:[%s2845_s19 + $0x6f0] sm:$0xff]  ;;  %v1487_v29 = vadd.f32 %v975_v22, %v463_v21  ;;  %v995_v18 = vld [vmem:[%s2852_s7 + $0x788] sm:$0xff] }
 0x135   : > { %1977 = vst [vmem:[%s2867_s20 + $0x638] sm:$0xff] %v1465_v27  ;;  %v465_v27 = vld [vmem:[%s2845_s19 + $0x6f8] sm:$0xff]  ;;  %v1488_v32 = vadd.f32 %v976_v25, %v464_v24  ;;  %v996_v21 = vld [vmem:[%s2852_s7 + $0x790] sm:$0xff] }
 0x136   : > { %1978 = vst [vmem:[%s2867_s20 + $0x640] sm:$0xff] %v1466_v30  ;;  %v466_v30 = vld [vmem:[%s2845_s19 + $0x700] sm:$0xff]  ;;  %v1489_v35 = vadd.f32 %v977_v28, %v465_v27  ;;  %v997_v24 = vld [vmem:[%s2852_s7 + $0x798] sm:$0xff] }
 0x137   : > { %1979 = vst [vmem:[%s2867_s20 + $0x648] sm:$0xff] %v1467_v33  ;;  %v467_v33 = vld [vmem:[%s2845_s19 + $0x708] sm:$0xff]  ;;  %v1490_v38 = vadd.f32 %v978_v31, %v466_v30  ;;  %v998_v27 = vld [vmem:[%s2852_s7 + $0x7a0] sm:$0xff] }
 0x138   : > { %1980 = vst [vmem:[%s2867_s20 + $0x650] sm:$0xff] %v1468_v36  ;;  %v468_v36 = vld [vmem:[%s2845_s19 + $0x710] sm:$0xff]  ;;  %v1491_v41 = vadd.f32 %v979_v34, %v467_v33  ;;  %v999_v30 = vld [vmem:[%s2852_s7 + $0x7a8] sm:$0xff] }
 0x139   : > { %1981 = vst [vmem:[%s2867_s20 + $0x658] sm:$0xff] %v1469_v39  ;;  %v469_v39 = vld [vmem:[%s2845_s19 + $0x718] sm:$0xff]  ;;  %v1492_v44 = vadd.f32 %v980_v37, %v468_v36  ;;  %v1000_v33 = vld [vmem:[%s2852_s7 + $0x7b0] sm:$0xff] }
 0x13a   : > { %1982 = vst [vmem:[%s2867_s20 + $0x660] sm:$0xff] %v1470_v42  ;;  %v470_v42 = vld [vmem:[%s2845_s19 + $0x720] sm:$0xff]  ;;  %v1493_v47 = vadd.f32 %v981_v40, %v469_v39  ;;  %v1001_v36 = vld [vmem:[%s2852_s7 + $0x7b8] sm:$0xff] }
 0x13b   : > { %1983 = vst [vmem:[%s2867_s20 + $0x668] sm:$0xff] %v1471_v45  ;;  %v471_v45 = vld [vmem:[%s2845_s19 + $0x728] sm:$0xff]  ;;  %v1494_v50 = vadd.f32 %v982_v43, %v470_v42  ;;  %v1002_v39 = vld [vmem:[%s2852_s7 + $0x7c0] sm:$0xff] }
 0x13c   : > { %1984 = vst [vmem:[%s2867_s20 + $0x670] sm:$0xff] %v1472_v48  ;;  %v472_v48 = vld [vmem:[%s2845_s19 + $0x730] sm:$0xff]  ;;  %v1495_v53 = vadd.f32 %v983_v46, %v471_v45  ;;  %v1003_v42 = vld [vmem:[%s2852_s7 + $0x7c8] sm:$0xff] }
 0x13d   : > { %1985 = vst [vmem:[%s2867_s20 + $0x678] sm:$0xff] %v1473_v51  ;;  %v473_v51 = vld [vmem:[%s2845_s19 + $0x738] sm:$0xff]  ;;  %v1496_v56 = vadd.f32 %v984_v49, %v472_v48  ;;  %v1004_v45 = vld [vmem:[%s2852_s7 + $0x7d0] sm:$0xff] }
 0x13e   : > { %1986 = vst [vmem:[%s2867_s20 + $0x680] sm:$0xff] %v1474_v54  ;;  %v474_v54 = vld [vmem:[%s2845_s19 + $0x740] sm:$0xff]  ;;  %v1497_v59 = vadd.f32 %v985_v52, %v473_v51  ;;  %v1005_v48 = vld [vmem:[%s2852_s7 + $0x7d8] sm:$0xff] }
 0x13f   : > { %1987 = vst [vmem:[%s2867_s20 + $0x688] sm:$0xff] %v1475_v57  ;;  %v475_v57 = vld [vmem:[%s2845_s19 + $0x748] sm:$0xff]  ;;  %v1498_v62 = vadd.f32 %v986_v55, %v474_v54  ;;  %v1006_v51 = vld [vmem:[%s2852_s7 + $0x7e0] sm:$0xff] }
 0x140   : > { %1988 = vst [vmem:[%s2867_s20 + $0x690] sm:$0xff] %v1476_v60  ;;  %v476_v60 = vld [vmem:[%s2845_s19 + $0x750] sm:$0xff]  ;;  %v1499_v1 = vadd.f32 %v987_v58, %v475_v57  ;;  %v1007_v54 = vld [vmem:[%s2852_s7 + $0x7e8] sm:$0xff] }
 0x141   : > { %1989 = vst [vmem:[%s2867_s20 + $0x698] sm:$0xff] %v1477_v63  ;;  %v477_v63 = vld [vmem:[%s2845_s19 + $0x758] sm:$0xff]  ;;  %v1500_v4 = vadd.f32 %v988_v61, %v476_v60  ;;  %v1008_v57 = vld [vmem:[%s2852_s7 + $0x7f0] sm:$0xff] }
 0x142   : > { %1990 = vst [vmem:[%s2867_s20 + $0x6a0] sm:$0xff] %v1478_v2  ;;  %v478_v2 = vld [vmem:[%s2845_s19 + $0x760] sm:$0xff]  ;;  %v1501_v7 = vadd.f32 %v989_v0, %v477_v63  ;;  %v1009_v60 = vld [vmem:[%s2852_s7 + $0x7f8] sm:$0xff] }
 0x143   : > { %1991 = vst [vmem:[%s2867_s20 + $0x6a8] sm:$0xff] %v1479_v5  ;;  %v479_v5 = vld [vmem:[%s2845_s19 + $0x768] sm:$0xff]  ;;  %v1502_v10 = vadd.f32 %v990_v3, %v478_v2  ;;  %v1010_v63 = vld [vmem:[%s2852_s7 + $0x800] sm:$0xff] }
 0x144   : > { %1992 = vst [vmem:[%s2867_s20 + $0x6b0] sm:$0xff] %v1480_v8  ;;  %v480_v8 = vld [vmem:[%s2845_s19 + $0x770] sm:$0xff]  ;;  %v1503_v13 = vadd.f32 %v991_v6, %v479_v5  ;;  %v1011_v2 = vld [vmem:[%s2852_s7 + $0x808] sm:$0xff] }
 0x145   : > { %1993 = vst [vmem:[%s2867_s20 + $0x6b8] sm:$0xff] %v1481_v11  ;;  %v481_v11 = vld [vmem:[%s2845_s19 + $0x778] sm:$0xff]  ;;  %v1504_v16 = vadd.f32 %v992_v9, %v480_v8  ;;  %v1012_v5 = vld [vmem:[%s2852_s7 + $0x810] sm:$0xff] }
 0x146   : > { %1994 = vst [vmem:[%s2867_s20 + $0x6c0] sm:$0xff] %v1482_v14  ;;  %v482_v14 = vld [vmem:[%s2845_s19 + $0x780] sm:$0xff]  ;;  %v1505_v19 = vadd.f32 %v993_v12, %v481_v11  ;;  %v1013_v8 = vld [vmem:[%s2852_s7 + $0x818] sm:$0xff] }
 0x147   : > { %1995 = vst [vmem:[%s2867_s20 + $0x6c8] sm:$0xff] %v1483_v17  ;;  %v483_v17 = vld [vmem:[%s2845_s19 + $0x788] sm:$0xff]  ;;  %v1506_v22 = vadd.f32 %v994_v15, %v482_v14  ;;  %v1014_v11 = vld [vmem:[%s2852_s7 + $0x820] sm:$0xff] }
 0x148   : > { %1996 = vst [vmem:[%s2867_s20 + $0x6d0] sm:$0xff] %v1484_v20  ;;  %v484_v20 = vld [vmem:[%s2845_s19 + $0x790] sm:$0xff]  ;;  %v1507_v25 = vadd.f32 %v995_v18, %v483_v17  ;;  %v1015_v14 = vld [vmem:[%s2852_s7 + $0x828] sm:$0xff] }
 0x149   : > { %1997 = vst [vmem:[%s2867_s20 + $0x6d8] sm:$0xff] %v1485_v23  ;;  %v485_v23 = vld [vmem:[%s2845_s19 + $0x798] sm:$0xff]  ;;  %v1508_v28 = vadd.f32 %v996_v21, %v484_v20  ;;  %v1016_v17 = vld [vmem:[%s2852_s7 + $0x830] sm:$0xff] }
 0x14a   : > { %1998 = vst [vmem:[%s2867_s20 + $0x6e0] sm:$0xff] %v1486_v26  ;;  %v486_v26 = vld [vmem:[%s2845_s19 + $0x7a0] sm:$0xff]  ;;  %v1509_v31 = vadd.f32 %v997_v24, %v485_v23  ;;  %v1017_v20 = vld [vmem:[%s2852_s7 + $0x838] sm:$0xff] }
 0x14b   : > { %1999 = vst [vmem:[%s2867_s20 + $0x6e8] sm:$0xff] %v1487_v29  ;;  %v487_v29 = vld [vmem:[%s2845_s19 + $0x7a8] sm:$0xff]  ;;  %v1510_v34 = vadd.f32 %v998_v27, %v486_v26  ;;  %v1018_v23 = vld [vmem:[%s2852_s7 + $0x840] sm:$0xff] }
 0x14c   : > { %2000 = vst [vmem:[%s2867_s20 + $0x6f0] sm:$0xff] %v1488_v32  ;;  %v488_v32 = vld [vmem:[%s2845_s19 + $0x7b0] sm:$0xff]  ;;  %v1511_v37 = vadd.f32 %v999_v30, %v487_v29  ;;  %v1019_v26 = vld [vmem:[%s2852_s7 + $0x848] sm:$0xff] }
 0x14d   : > { %2001 = vst [vmem:[%s2867_s20 + $0x6f8] sm:$0xff] %v1489_v35  ;;  %v489_v35 = vld [vmem:[%s2845_s19 + $0x7b8] sm:$0xff]  ;;  %v1512_v40 = vadd.f32 %v1000_v33, %v488_v32  ;;  %v1020_v29 = vld [vmem:[%s2852_s7 + $0x850] sm:$0xff] }
 0x14e   : > { %2002 = vst [vmem:[%s2867_s20 + $0x700] sm:$0xff] %v1490_v38  ;;  %v490_v38 = vld [vmem:[%s2845_s19 + $0x7c0] sm:$0xff]  ;;  %v1513_v43 = vadd.f32 %v1001_v36, %v489_v35  ;;  %v1021_v32 = vld [vmem:[%s2852_s7 + $0x858] sm:$0xff] }
 0x14f   : > { %2003 = vst [vmem:[%s2867_s20 + $0x708] sm:$0xff] %v1491_v41  ;;  %v491_v41 = vld [vmem:[%s2845_s19 + $0x7c8] sm:$0xff]  ;;  %v1514_v46 = vadd.f32 %v1002_v39, %v490_v38  ;;  %v1022_v35 = vld [vmem:[%s2852_s7 + $0x860] sm:$0xff] }
 0x150   : > { %2004 = vst [vmem:[%s2867_s20 + $0x710] sm:$0xff] %v1492_v44  ;;  %v492_v44 = vld [vmem:[%s2845_s19 + $0x7d0] sm:$0xff]  ;;  %v1515_v49 = vadd.f32 %v1003_v42, %v491_v41  ;;  %v1023_v38 = vld [vmem:[%s2852_s7 + $0x868] sm:$0xff] }
 0x151   : > { %2005 = vst [vmem:[%s2867_s20 + $0x718] sm:$0xff] %v1493_v47  ;;  %v493_v47 = vld [vmem:[%s2845_s19 + $0x7d8] sm:$0xff]  ;;  %v1516_v52 = vadd.f32 %v1004_v45, %v492_v44  ;;  %v1024_v41 = vld [vmem:[%s2852_s7 + $0x870] sm:$0xff] }
 0x152   : > { %2006 = vst [vmem:[%s2867_s20 + $0x720] sm:$0xff] %v1494_v50  ;;  %v494_v50 = vld [vmem:[%s2845_s19 + $0x7e0] sm:$0xff]  ;;  %v1517_v55 = vadd.f32 %v1005_v48, %v493_v47  ;;  %v1025_v44 = vld [vmem:[%s2852_s7 + $0x878] sm:$0xff] }
 0x153   : > { %2007 = vst [vmem:[%s2867_s20 + $0x728] sm:$0xff] %v1495_v53  ;;  %v495_v53 = vld [vmem:[%s2845_s19 + $0x7e8] sm:$0xff]  ;;  %v1518_v58 = vadd.f32 %v1006_v51, %v494_v50  ;;  %v1026_v47 = vld [vmem:[%s2852_s7 + $0x880] sm:$0xff] }
 0x154   : > { %2008 = vst [vmem:[%s2867_s20 + $0x730] sm:$0xff] %v1496_v56  ;;  %v496_v56 = vld [vmem:[%s2845_s19 + $0x7f0] sm:$0xff]  ;;  %v1519_v61 = vadd.f32 %v1007_v54, %v495_v53  ;;  %v1027_v50 = vld [vmem:[%s2852_s7 + $0x888] sm:$0xff] }
 0x155   : > { %2009 = vst [vmem:[%s2867_s20 + $0x738] sm:$0xff] %v1497_v59  ;;  %v497_v59 = vld [vmem:[%s2845_s19 + $0x7f8] sm:$0xff]  ;;  %v1520_v0 = vadd.f32 %v1008_v57, %v496_v56  ;;  %v1028_v53 = vld [vmem:[%s2852_s7 + $0x890] sm:$0xff] }
 0x156   : > { %2010 = vst [vmem:[%s2867_s20 + $0x740] sm:$0xff] %v1498_v62  ;;  %v498_v62 = vld [vmem:[%s2845_s19 + $0x800] sm:$0xff]  ;;  %v1521_v3 = vadd.f32 %v1009_v60, %v497_v59  ;;  %v1029_v56 = vld [vmem:[%s2852_s7 + $0x898] sm:$0xff] }
 0x157   : > { %2011 = vst [vmem:[%s2867_s20 + $0x748] sm:$0xff] %v1499_v1  ;;  %v499_v1 = vld [vmem:[%s2845_s19 + $0x808] sm:$0xff]  ;;  %v1522_v6 = vadd.f32 %v1010_v63, %v498_v62  ;;  %v1030_v59 = vld [vmem:[%s2852_s7 + $0x8a0] sm:$0xff] }
 0x158   : > { %2012 = vst [vmem:[%s2867_s20 + $0x750] sm:$0xff] %v1500_v4  ;;  %v500_v4 = vld [vmem:[%s2845_s19 + $0x810] sm:$0xff]  ;;  %v1523_v9 = vadd.f32 %v1011_v2, %v499_v1  ;;  %v1031_v62 = vld [vmem:[%s2852_s7 + $0x8a8] sm:$0xff] }
 0x159   : > { %2013 = vst [vmem:[%s2867_s20 + $0x758] sm:$0xff] %v1501_v7  ;;  %v501_v7 = vld [vmem:[%s2845_s19 + $0x818] sm:$0xff]  ;;  %v1524_v12 = vadd.f32 %v1012_v5, %v500_v4  ;;  %v1032_v1 = vld [vmem:[%s2852_s7 + $0x8b0] sm:$0xff] }
 0x15a   : > { %2014 = vst [vmem:[%s2867_s20 + $0x760] sm:$0xff] %v1502_v10  ;;  %v502_v10 = vld [vmem:[%s2845_s19 + $0x820] sm:$0xff]  ;;  %v1525_v15 = vadd.f32 %v1013_v8, %v501_v7  ;;  %v1033_v4 = vld [vmem:[%s2852_s7 + $0x8b8] sm:$0xff] }
 0x15b   : > { %2015 = vst [vmem:[%s2867_s20 + $0x768] sm:$0xff] %v1503_v13  ;;  %v503_v13 = vld [vmem:[%s2845_s19 + $0x828] sm:$0xff]  ;;  %v1526_v18 = vadd.f32 %v1014_v11, %v502_v10  ;;  %v1034_v7 = vld [vmem:[%s2852_s7 + $0x8c0] sm:$0xff] }
 0x15c   : > { %2016 = vst [vmem:[%s2867_s20 + $0x770] sm:$0xff] %v1504_v16  ;;  %v504_v16 = vld [vmem:[%s2845_s19 + $0x830] sm:$0xff]  ;;  %v1527_v21 = vadd.f32 %v1015_v14, %v503_v13  ;;  %v1035_v10 = vld [vmem:[%s2852_s7 + $0x8c8] sm:$0xff] }
 0x15d   : > { %2017 = vst [vmem:[%s2867_s20 + $0x778] sm:$0xff] %v1505_v19  ;;  %v505_v19 = vld [vmem:[%s2845_s19 + $0x838] sm:$0xff]  ;;  %v1528_v24 = vadd.f32 %v1016_v17, %v504_v16  ;;  %v1036_v13 = vld [vmem:[%s2852_s7 + $0x8d0] sm:$0xff] }
 0x15e   : > { %2018 = vst [vmem:[%s2867_s20 + $0x780] sm:$0xff] %v1506_v22  ;;  %v506_v22 = vld [vmem:[%s2845_s19 + $0x840] sm:$0xff]  ;;  %v1529_v27 = vadd.f32 %v1017_v20, %v505_v19  ;;  %v1037_v16 = vld [vmem:[%s2852_s7 + $0x8d8] sm:$0xff] }
 0x15f   : > { %2019 = vst [vmem:[%s2867_s20 + $0x788] sm:$0xff] %v1507_v25  ;;  %v507_v25 = vld [vmem:[%s2845_s19 + $0x848] sm:$0xff]  ;;  %v1530_v30 = vadd.f32 %v1018_v23, %v506_v22  ;;  %v1038_v19 = vld [vmem:[%s2852_s7 + $0x8e0] sm:$0xff] }
 0x160   : > { %2020 = vst [vmem:[%s2867_s20 + $0x790] sm:$0xff] %v1508_v28  ;;  %v508_v28 = vld [vmem:[%s2845_s19 + $0x850] sm:$0xff]  ;;  %v1531_v33 = vadd.f32 %v1019_v26, %v507_v25  ;;  %v1039_v22 = vld [vmem:[%s2852_s7 + $0x8e8] sm:$0xff] }
 0x161   : > { %2021 = vst [vmem:[%s2867_s20 + $0x798] sm:$0xff] %v1509_v31  ;;  %v509_v31 = vld [vmem:[%s2845_s19 + $0x858] sm:$0xff]  ;;  %v1532_v36 = vadd.f32 %v1020_v29, %v508_v28  ;;  %v1040_v25 = vld [vmem:[%s2852_s7 + $0x8f0] sm:$0xff] }
 0x162   : > { %2022 = vst [vmem:[%s2867_s20 + $0x7a0] sm:$0xff] %v1510_v34  ;;  %v510_v34 = vld [vmem:[%s2845_s19 + $0x860] sm:$0xff]  ;;  %v1533_v39 = vadd.f32 %v1021_v32, %v509_v31  ;;  %v1041_v28 = vld [vmem:[%s2852_s7 + $0x8f8] sm:$0xff] }
 0x163   : > { %2023 = vst [vmem:[%s2867_s20 + $0x7a8] sm:$0xff] %v1511_v37  ;;  %v511_v37 = vld [vmem:[%s2845_s19 + $0x868] sm:$0xff]  ;;  %v1534_v42 = vadd.f32 %v1022_v35, %v510_v34  ;;  %v1042_v31 = vld [vmem:[%s2852_s7 + $0x900] sm:$0xff] }
 0x164   : > { %2024 = vst [vmem:[%s2867_s20 + $0x7b0] sm:$0xff] %v1512_v40  ;;  %v512_v40 = vld [vmem:[%s2845_s19 + $0x870] sm:$0xff]  ;;  %v1535_v45 = vadd.f32 %v1023_v38, %v511_v37  ;;  %v1043_v34 = vld [vmem:[%s2852_s7 + $0x908] sm:$0xff] }
 0x165   : > { %2025 = vst [vmem:[%s2867_s20 + $0x7b8] sm:$0xff] %v1513_v43  ;;  %v513_v43 = vld [vmem:[%s2845_s19 + $0x878] sm:$0xff]  ;;  %v1536_v48 = vadd.f32 %v1024_v41, %v512_v40  ;;  %v1044_v37 = vld [vmem:[%s2852_s7 + $0x910] sm:$0xff] }
 0x166   : > { %2026 = vst [vmem:[%s2867_s20 + $0x7c0] sm:$0xff] %v1514_v46  ;;  %v514_v46 = vld [vmem:[%s2845_s19 + $0x880] sm:$0xff]  ;;  %v1537_v51 = vadd.f32 %v1025_v44, %v513_v43  ;;  %v1045_v40 = vld [vmem:[%s2852_s7 + $0x918] sm:$0xff] }
 0x167   : > { %2027 = vst [vmem:[%s2867_s20 + $0x7c8] sm:$0xff] %v1515_v49  ;;  %v515_v49 = vld [vmem:[%s2845_s19 + $0x888] sm:$0xff]  ;;  %v1538_v54 = vadd.f32 %v1026_v47, %v514_v46  ;;  %v1046_v43 = vld [vmem:[%s2852_s7 + $0x920] sm:$0xff] }
 0x168   : > { %2028 = vst [vmem:[%s2867_s20 + $0x7d0] sm:$0xff] %v1516_v52  ;;  %v516_v52 = vld [vmem:[%s2845_s19 + $0x890] sm:$0xff]  ;;  %v1539_v57 = vadd.f32 %v1027_v50, %v515_v49  ;;  %v1047_v46 = vld [vmem:[%s2852_s7 + $0x928] sm:$0xff] }
 0x169   : > { %2029 = vst [vmem:[%s2867_s20 + $0x7d8] sm:$0xff] %v1517_v55  ;;  %v517_v55 = vld [vmem:[%s2845_s19 + $0x898] sm:$0xff]  ;;  %v1540_v60 = vadd.f32 %v1028_v53, %v516_v52  ;;  %v1048_v49 = vld [vmem:[%s2852_s7 + $0x930] sm:$0xff] }
 0x16a   : > { %2030 = vst [vmem:[%s2867_s20 + $0x7e0] sm:$0xff] %v1518_v58  ;;  %v518_v58 = vld [vmem:[%s2845_s19 + $0x8a0] sm:$0xff]  ;;  %v1541_v63 = vadd.f32 %v1029_v56, %v517_v55  ;;  %v1049_v52 = vld [vmem:[%s2852_s7 + $0x938] sm:$0xff] }
 0x16b   : > { %2031 = vst [vmem:[%s2867_s20 + $0x7e8] sm:$0xff] %v1519_v61  ;;  %v519_v61 = vld [vmem:[%s2845_s19 + $0x8a8] sm:$0xff]  ;;  %v1542_v2 = vadd.f32 %v1030_v59, %v518_v58  ;;  %v1050_v55 = vld [vmem:[%s2852_s7 + $0x940] sm:$0xff] }
 0x16c   : > { %2032 = vst [vmem:[%s2867_s20 + $0x7f0] sm:$0xff] %v1520_v0  ;;  %v520_v0 = vld [vmem:[%s2845_s19 + $0x8b0] sm:$0xff]  ;;  %v1543_v5 = vadd.f32 %v1031_v62, %v519_v61  ;;  %v1051_v58 = vld [vmem:[%s2852_s7 + $0x948] sm:$0xff] }
 0x16d   : > { %2033 = vst [vmem:[%s2867_s20 + $0x7f8] sm:$0xff] %v1521_v3  ;;  %v521_v3 = vld [vmem:[%s2845_s19 + $0x8b8] sm:$0xff]  ;;  %v1544_v8 = vadd.f32 %v1032_v1, %v520_v0  ;;  %v1052_v61 = vld [vmem:[%s2852_s7 + $0x950] sm:$0xff] }
 0x16e   : > { %2034 = vst [vmem:[%s2867_s20 + $0x800] sm:$0xff] %v1522_v6  ;;  %v522_v6 = vld [vmem:[%s2845_s19 + $0x8c0] sm:$0xff]  ;;  %v1545_v11 = vadd.f32 %v1033_v4, %v521_v3  ;;  %v1053_v0 = vld [vmem:[%s2852_s7 + $0x958] sm:$0xff] }
 0x16f   : > { %2035 = vst [vmem:[%s2867_s20 + $0x808] sm:$0xff] %v1523_v9  ;;  %v523_v9 = vld [vmem:[%s2845_s19 + $0x8c8] sm:$0xff]  ;;  %v1546_v14 = vadd.f32 %v1034_v7, %v522_v6  ;;  %v1054_v3 = vld [vmem:[%s2852_s7 + $0x960] sm:$0xff] }
 0x170   : > { %2036 = vst [vmem:[%s2867_s20 + $0x810] sm:$0xff] %v1524_v12  ;;  %v524_v12 = vld [vmem:[%s2845_s19 + $0x8d0] sm:$0xff]  ;;  %v1547_v17 = vadd.f32 %v1035_v10, %v523_v9  ;;  %v1055_v6 = vld [vmem:[%s2852_s7 + $0x968] sm:$0xff] }
 0x171   : > { %2037 = vst [vmem:[%s2867_s20 + $0x818] sm:$0xff] %v1525_v15  ;;  %v525_v15 = vld [vmem:[%s2845_s19 + $0x8d8] sm:$0xff]  ;;  %v1548_v20 = vadd.f32 %v1036_v13, %v524_v12  ;;  %v1056_v9 = vld [vmem:[%s2852_s7 + $0x970] sm:$0xff] }
 0x172   : > { %2038 = vst [vmem:[%s2867_s20 + $0x820] sm:$0xff] %v1526_v18  ;;  %v526_v18 = vld [vmem:[%s2845_s19 + $0x8e0] sm:$0xff]  ;;  %v1549_v23 = vadd.f32 %v1037_v16, %v525_v15  ;;  %v1057_v12 = vld [vmem:[%s2852_s7 + $0x978] sm:$0xff] }
 0x173   : > { %2039 = vst [vmem:[%s2867_s20 + $0x828] sm:$0xff] %v1527_v21  ;;  %v527_v21 = vld [vmem:[%s2845_s19 + $0x8e8] sm:$0xff]  ;;  %v1550_v26 = vadd.f32 %v1038_v19, %v526_v18  ;;  %v1058_v15 = vld [vmem:[%s2852_s7 + $0x980] sm:$0xff] }
 0x174   : > { %2040 = vst [vmem:[%s2867_s20 + $0x830] sm:$0xff] %v1528_v24  ;;  %v528_v24 = vld [vmem:[%s2845_s19 + $0x8f0] sm:$0xff]  ;;  %v1551_v29 = vadd.f32 %v1039_v22, %v527_v21  ;;  %v1059_v18 = vld [vmem:[%s2852_s7 + $0x988] sm:$0xff] }
 0x175   : > { %2041 = vst [vmem:[%s2867_s20 + $0x838] sm:$0xff] %v1529_v27  ;;  %v529_v27 = vld [vmem:[%s2845_s19 + $0x8f8] sm:$0xff]  ;;  %v1552_v32 = vadd.f32 %v1040_v25, %v528_v24  ;;  %v1060_v21 = vld [vmem:[%s2852_s7 + $0x990] sm:$0xff] }
 0x176   : > { %2042 = vst [vmem:[%s2867_s20 + $0x840] sm:$0xff] %v1530_v30  ;;  %v530_v30 = vld [vmem:[%s2845_s19 + $0x900] sm:$0xff]  ;;  %v1553_v35 = vadd.f32 %v1041_v28, %v529_v27  ;;  %v1061_v24 = vld [vmem:[%s2852_s7 + $0x998] sm:$0xff] }
 0x177   : > { %2043 = vst [vmem:[%s2867_s20 + $0x848] sm:$0xff] %v1531_v33  ;;  %v531_v33 = vld [vmem:[%s2845_s19 + $0x908] sm:$0xff]  ;;  %v1554_v38 = vadd.f32 %v1042_v31, %v530_v30  ;;  %v1062_v27 = vld [vmem:[%s2852_s7 + $0x9a0] sm:$0xff] }
 0x178   : > { %2044 = vst [vmem:[%s2867_s20 + $0x850] sm:$0xff] %v1532_v36  ;;  %v532_v36 = vld [vmem:[%s2845_s19 + $0x910] sm:$0xff]  ;;  %v1555_v41 = vadd.f32 %v1043_v34, %v531_v33  ;;  %v1063_v30 = vld [vmem:[%s2852_s7 + $0x9a8] sm:$0xff] }
 0x179   : > { %2045 = vst [vmem:[%s2867_s20 + $0x858] sm:$0xff] %v1533_v39  ;;  %v533_v39 = vld [vmem:[%s2845_s19 + $0x918] sm:$0xff]  ;;  %v1556_v44 = vadd.f32 %v1044_v37, %v532_v36  ;;  %v1064_v33 = vld [vmem:[%s2852_s7 + $0x9b0] sm:$0xff] }
 0x17a   : > { %2046 = vst [vmem:[%s2867_s20 + $0x860] sm:$0xff] %v1534_v42  ;;  %v534_v42 = vld [vmem:[%s2845_s19 + $0x920] sm:$0xff]  ;;  %v1557_v47 = vadd.f32 %v1045_v40, %v533_v39  ;;  %v1065_v36 = vld [vmem:[%s2852_s7 + $0x9b8] sm:$0xff] }
 0x17b   : > { %2047 = vst [vmem:[%s2867_s20 + $0x868] sm:$0xff] %v1535_v45  ;;  %v535_v45 = vld [vmem:[%s2845_s19 + $0x928] sm:$0xff]  ;;  %v1558_v50 = vadd.f32 %v1046_v43, %v534_v42  ;;  %v1066_v39 = vld [vmem:[%s2852_s7 + $0x9c0] sm:$0xff] }
 0x17c   : > { %2048 = vst [vmem:[%s2867_s20 + $0x870] sm:$0xff] %v1536_v48  ;;  %v536_v48 = vld [vmem:[%s2845_s19 + $0x930] sm:$0xff]  ;;  %v1559_v53 = vadd.f32 %v1047_v46, %v535_v45  ;;  %v1067_v42 = vld [vmem:[%s2852_s7 + $0x9c8] sm:$0xff] }
 0x17d   : > { %2049 = vst [vmem:[%s2867_s20 + $0x878] sm:$0xff] %v1537_v51  ;;  %v537_v51 = vld [vmem:[%s2845_s19 + $0x938] sm:$0xff]  ;;  %v1560_v56 = vadd.f32 %v1048_v49, %v536_v48  ;;  %v1068_v45 = vld [vmem:[%s2852_s7 + $0x9d0] sm:$0xff] }
 0x17e   : > { %2050 = vst [vmem:[%s2867_s20 + $0x880] sm:$0xff] %v1538_v54  ;;  %v538_v54 = vld [vmem:[%s2845_s19 + $0x940] sm:$0xff]  ;;  %v1561_v59 = vadd.f32 %v1049_v52, %v537_v51  ;;  %v1069_v48 = vld [vmem:[%s2852_s7 + $0x9d8] sm:$0xff] }
 0x17f   : > { %2051 = vst [vmem:[%s2867_s20 + $0x888] sm:$0xff] %v1539_v57  ;;  %v539_v57 = vld [vmem:[%s2845_s19 + $0x948] sm:$0xff]  ;;  %v1562_v62 = vadd.f32 %v1050_v55, %v538_v54  ;;  %v1070_v51 = vld [vmem:[%s2852_s7 + $0x9e0] sm:$0xff] }
 0x180   : > { %2052 = vst [vmem:[%s2867_s20 + $0x890] sm:$0xff] %v1540_v60  ;;  %v540_v60 = vld [vmem:[%s2845_s19 + $0x950] sm:$0xff]  ;;  %v1563_v1 = vadd.f32 %v1051_v58, %v539_v57  ;;  %v1071_v54 = vld [vmem:[%s2852_s7 + $0x9e8] sm:$0xff] }
 0x181   : > { %2053 = vst [vmem:[%s2867_s20 + $0x898] sm:$0xff] %v1541_v63  ;;  %v541_v63 = vld [vmem:[%s2845_s19 + $0x958] sm:$0xff]  ;;  %v1564_v4 = vadd.f32 %v1052_v61, %v540_v60  ;;  %v1072_v57 = vld [vmem:[%s2852_s7 + $0x9f0] sm:$0xff] }
 0x182   : > { %2054 = vst [vmem:[%s2867_s20 + $0x8a0] sm:$0xff] %v1542_v2  ;;  %v542_v2 = vld [vmem:[%s2845_s19 + $0x960] sm:$0xff]  ;;  %v1565_v7 = vadd.f32 %v1053_v0, %v541_v63  ;;  %v1073_v60 = vld [vmem:[%s2852_s7 + $0x9f8] sm:$0xff] }
 0x183   : > { %2055 = vst [vmem:[%s2867_s20 + $0x8a8] sm:$0xff] %v1543_v5  ;;  %v543_v5 = vld [vmem:[%s2845_s19 + $0x968] sm:$0xff]  ;;  %v1566_v10 = vadd.f32 %v1054_v3, %v542_v2  ;;  %v1074_v63 = vld [vmem:[%s2852_s7 + $0xa00] sm:$0xff] }
 0x184   : > { %2056 = vst [vmem:[%s2867_s20 + $0x8b0] sm:$0xff] %v1544_v8  ;;  %v544_v8 = vld [vmem:[%s2845_s19 + $0x970] sm:$0xff]  ;;  %v1567_v13 = vadd.f32 %v1055_v6, %v543_v5  ;;  %v1075_v2 = vld [vmem:[%s2852_s7 + $0xa08] sm:$0xff] }
 0x185   : > { %2057 = vst [vmem:[%s2867_s20 + $0x8b8] sm:$0xff] %v1545_v11  ;;  %v545_v11 = vld [vmem:[%s2845_s19 + $0x978] sm:$0xff]  ;;  %v1568_v16 = vadd.f32 %v1056_v9, %v544_v8  ;;  %v1076_v5 = vld [vmem:[%s2852_s7 + $0xa10] sm:$0xff] }
 0x186   : > { %2058 = vst [vmem:[%s2867_s20 + $0x8c0] sm:$0xff] %v1546_v14  ;;  %v546_v14 = vld [vmem:[%s2845_s19 + $0x980] sm:$0xff]  ;;  %v1569_v19 = vadd.f32 %v1057_v12, %v545_v11  ;;  %v1077_v8 = vld [vmem:[%s2852_s7 + $0xa18] sm:$0xff] }
 0x187   : > { %2059 = vst [vmem:[%s2867_s20 + $0x8c8] sm:$0xff] %v1547_v17  ;;  %v547_v17 = vld [vmem:[%s2845_s19 + $0x988] sm:$0xff]  ;;  %v1570_v22 = vadd.f32 %v1058_v15, %v546_v14  ;;  %v1078_v11 = vld [vmem:[%s2852_s7 + $0xa20] sm:$0xff] }
 0x188   : > { %2060 = vst [vmem:[%s2867_s20 + $0x8d0] sm:$0xff] %v1548_v20  ;;  %v548_v20 = vld [vmem:[%s2845_s19 + $0x990] sm:$0xff]  ;;  %v1571_v25 = vadd.f32 %v1059_v18, %v547_v17  ;;  %v1079_v14 = vld [vmem:[%s2852_s7 + $0xa28] sm:$0xff] }
 0x189   : > { %2061 = vst [vmem:[%s2867_s20 + $0x8d8] sm:$0xff] %v1549_v23  ;;  %v549_v23 = vld [vmem:[%s2845_s19 + $0x998] sm:$0xff]  ;;  %v1572_v28 = vadd.f32 %v1060_v21, %v548_v20  ;;  %v1080_v17 = vld [vmem:[%s2852_s7 + $0xa30] sm:$0xff] }
 0x18a   : > { %2062 = vst [vmem:[%s2867_s20 + $0x8e0] sm:$0xff] %v1550_v26  ;;  %v550_v26 = vld [vmem:[%s2845_s19 + $0x9a0] sm:$0xff]  ;;  %v1573_v31 = vadd.f32 %v1061_v24, %v549_v23  ;;  %v1081_v20 = vld [vmem:[%s2852_s7 + $0xa38] sm:$0xff] }
 0x18b   : > { %2063 = vst [vmem:[%s2867_s20 + $0x8e8] sm:$0xff] %v1551_v29  ;;  %v551_v29 = vld [vmem:[%s2845_s19 + $0x9a8] sm:$0xff]  ;;  %v1574_v34 = vadd.f32 %v1062_v27, %v550_v26  ;;  %v1082_v23 = vld [vmem:[%s2852_s7 + $0xa40] sm:$0xff] }
 0x18c   : > { %2064 = vst [vmem:[%s2867_s20 + $0x8f0] sm:$0xff] %v1552_v32  ;;  %v552_v32 = vld [vmem:[%s2845_s19 + $0x9b0] sm:$0xff]  ;;  %v1575_v37 = vadd.f32 %v1063_v30, %v551_v29  ;;  %v1083_v26 = vld [vmem:[%s2852_s7 + $0xa48] sm:$0xff] }
 0x18d   : > { %2065 = vst [vmem:[%s2867_s20 + $0x8f8] sm:$0xff] %v1553_v35  ;;  %v553_v35 = vld [vmem:[%s2845_s19 + $0x9b8] sm:$0xff]  ;;  %v1576_v40 = vadd.f32 %v1064_v33, %v552_v32  ;;  %v1084_v29 = vld [vmem:[%s2852_s7 + $0xa50] sm:$0xff] }
 0x18e   : > { %2066 = vst [vmem:[%s2867_s20 + $0x900] sm:$0xff] %v1554_v38  ;;  %v554_v38 = vld [vmem:[%s2845_s19 + $0x9c0] sm:$0xff]  ;;  %v1577_v43 = vadd.f32 %v1065_v36, %v553_v35  ;;  %v1085_v32 = vld [vmem:[%s2852_s7 + $0xa58] sm:$0xff] }
 0x18f   : > { %2067 = vst [vmem:[%s2867_s20 + $0x908] sm:$0xff] %v1555_v41  ;;  %v555_v41 = vld [vmem:[%s2845_s19 + $0x9c8] sm:$0xff]  ;;  %v1578_v46 = vadd.f32 %v1066_v39, %v554_v38  ;;  %v1086_v35 = vld [vmem:[%s2852_s7 + $0xa60] sm:$0xff] }
 0x190   : > { %2068 = vst [vmem:[%s2867_s20 + $0x910] sm:$0xff] %v1556_v44  ;;  %v556_v44 = vld [vmem:[%s2845_s19 + $0x9d0] sm:$0xff]  ;;  %v1579_v49 = vadd.f32 %v1067_v42, %v555_v41  ;;  %v1087_v38 = vld [vmem:[%s2852_s7 + $0xa68] sm:$0xff] }
 0x191   : > { %2069 = vst [vmem:[%s2867_s20 + $0x918] sm:$0xff] %v1557_v47  ;;  %v557_v47 = vld [vmem:[%s2845_s19 + $0x9d8] sm:$0xff]  ;;  %v1580_v52 = vadd.f32 %v1068_v45, %v556_v44  ;;  %v1088_v41 = vld [vmem:[%s2852_s7 + $0xa70] sm:$0xff] }
 0x192   : > { %2070 = vst [vmem:[%s2867_s20 + $0x920] sm:$0xff] %v1558_v50  ;;  %v558_v50 = vld [vmem:[%s2845_s19 + $0x9e0] sm:$0xff]  ;;  %v1581_v55 = vadd.f32 %v1069_v48, %v557_v47  ;;  %v1089_v44 = vld [vmem:[%s2852_s7 + $0xa78] sm:$0xff] }
 0x193   : > { %2071 = vst [vmem:[%s2867_s20 + $0x928] sm:$0xff] %v1559_v53  ;;  %v559_v53 = vld [vmem:[%s2845_s19 + $0x9e8] sm:$0xff]  ;;  %v1582_v58 = vadd.f32 %v1070_v51, %v558_v50  ;;  %v1090_v47 = vld [vmem:[%s2852_s7 + $0xa80] sm:$0xff] }
 0x194   : > { %2072 = vst [vmem:[%s2867_s20 + $0x930] sm:$0xff] %v1560_v56  ;;  %v560_v56 = vld [vmem:[%s2845_s19 + $0x9f0] sm:$0xff]  ;;  %v1583_v61 = vadd.f32 %v1071_v54, %v559_v53  ;;  %v1091_v50 = vld [vmem:[%s2852_s7 + $0xa88] sm:$0xff] }
 0x195   : > { %2073 = vst [vmem:[%s2867_s20 + $0x938] sm:$0xff] %v1561_v59  ;;  %v561_v59 = vld [vmem:[%s2845_s19 + $0x9f8] sm:$0xff]  ;;  %v1584_v0 = vadd.f32 %v1072_v57, %v560_v56  ;;  %v1092_v53 = vld [vmem:[%s2852_s7 + $0xa90] sm:$0xff] }
 0x196   : > { %2074 = vst [vmem:[%s2867_s20 + $0x940] sm:$0xff] %v1562_v62  ;;  %v562_v62 = vld [vmem:[%s2845_s19 + $0xa00] sm:$0xff]  ;;  %v1585_v3 = vadd.f32 %v1073_v60, %v561_v59  ;;  %v1093_v56 = vld [vmem:[%s2852_s7 + $0xa98] sm:$0xff] }
 0x197   : > { %2075 = vst [vmem:[%s2867_s20 + $0x948] sm:$0xff] %v1563_v1  ;;  %v563_v1 = vld [vmem:[%s2845_s19 + $0xa08] sm:$0xff]  ;;  %v1586_v6 = vadd.f32 %v1074_v63, %v562_v62  ;;  %v1094_v59 = vld [vmem:[%s2852_s7 + $0xaa0] sm:$0xff] }
 0x198   : > { %2076 = vst [vmem:[%s2867_s20 + $0x950] sm:$0xff] %v1564_v4  ;;  %v564_v4 = vld [vmem:[%s2845_s19 + $0xa10] sm:$0xff]  ;;  %v1587_v9 = vadd.f32 %v1075_v2, %v563_v1  ;;  %v1095_v62 = vld [vmem:[%s2852_s7 + $0xaa8] sm:$0xff] }
 0x199   : > { %2077 = vst [vmem:[%s2867_s20 + $0x958] sm:$0xff] %v1565_v7  ;;  %v565_v7 = vld [vmem:[%s2845_s19 + $0xa18] sm:$0xff]  ;;  %v1588_v12 = vadd.f32 %v1076_v5, %v564_v4  ;;  %v1096_v1 = vld [vmem:[%s2852_s7 + $0xab0] sm:$0xff] }
 0x19a   : > { %2078 = vst [vmem:[%s2867_s20 + $0x960] sm:$0xff] %v1566_v10  ;;  %v566_v10 = vld [vmem:[%s2845_s19 + $0xa20] sm:$0xff]  ;;  %v1589_v15 = vadd.f32 %v1077_v8, %v565_v7  ;;  %v1097_v4 = vld [vmem:[%s2852_s7 + $0xab8] sm:$0xff] }
 0x19b   : > { %2079 = vst [vmem:[%s2867_s20 + $0x968] sm:$0xff] %v1567_v13  ;;  %v567_v13 = vld [vmem:[%s2845_s19 + $0xa28] sm:$0xff]  ;;  %v1590_v18 = vadd.f32 %v1078_v11, %v566_v10  ;;  %v1098_v7 = vld [vmem:[%s2852_s7 + $0xac0] sm:$0xff] }
 0x19c   : > { %2080 = vst [vmem:[%s2867_s20 + $0x970] sm:$0xff] %v1568_v16  ;;  %v568_v16 = vld [vmem:[%s2845_s19 + $0xa30] sm:$0xff]  ;;  %v1591_v21 = vadd.f32 %v1079_v14, %v567_v13  ;;  %v1099_v10 = vld [vmem:[%s2852_s7 + $0xac8] sm:$0xff] }
 0x19d   : > { %2081 = vst [vmem:[%s2867_s20 + $0x978] sm:$0xff] %v1569_v19  ;;  %v569_v19 = vld [vmem:[%s2845_s19 + $0xa38] sm:$0xff]  ;;  %v1592_v24 = vadd.f32 %v1080_v17, %v568_v16  ;;  %v1100_v13 = vld [vmem:[%s2852_s7 + $0xad0] sm:$0xff] }
 0x19e   : > { %2082 = vst [vmem:[%s2867_s20 + $0x980] sm:$0xff] %v1570_v22  ;;  %v570_v22 = vld [vmem:[%s2845_s19 + $0xa40] sm:$0xff]  ;;  %v1593_v27 = vadd.f32 %v1081_v20, %v569_v19  ;;  %v1101_v16 = vld [vmem:[%s2852_s7 + $0xad8] sm:$0xff] }
 0x19f   : > { %2083 = vst [vmem:[%s2867_s20 + $0x988] sm:$0xff] %v1571_v25  ;;  %v571_v25 = vld [vmem:[%s2845_s19 + $0xa48] sm:$0xff]  ;;  %v1594_v30 = vadd.f32 %v1082_v23, %v570_v22  ;;  %v1102_v19 = vld [vmem:[%s2852_s7 + $0xae0] sm:$0xff] }
 0x1a0   : > { %2084 = vst [vmem:[%s2867_s20 + $0x990] sm:$0xff] %v1572_v28  ;;  %v572_v28 = vld [vmem:[%s2845_s19 + $0xa50] sm:$0xff]  ;;  %v1595_v33 = vadd.f32 %v1083_v26, %v571_v25  ;;  %v1103_v22 = vld [vmem:[%s2852_s7 + $0xae8] sm:$0xff] }
 0x1a1   : > { %2085 = vst [vmem:[%s2867_s20 + $0x998] sm:$0xff] %v1573_v31  ;;  %v573_v31 = vld [vmem:[%s2845_s19 + $0xa58] sm:$0xff]  ;;  %v1596_v36 = vadd.f32 %v1084_v29, %v572_v28  ;;  %v1104_v25 = vld [vmem:[%s2852_s7 + $0xaf0] sm:$0xff] }
 0x1a2   : > { %2086 = vst [vmem:[%s2867_s20 + $0x9a0] sm:$0xff] %v1574_v34  ;;  %v574_v34 = vld [vmem:[%s2845_s19 + $0xa60] sm:$0xff]  ;;  %v1597_v39 = vadd.f32 %v1085_v32, %v573_v31  ;;  %v1105_v28 = vld [vmem:[%s2852_s7 + $0xaf8] sm:$0xff] }
 0x1a3   : > { %2087 = vst [vmem:[%s2867_s20 + $0x9a8] sm:$0xff] %v1575_v37  ;;  %v575_v37 = vld [vmem:[%s2845_s19 + $0xa68] sm:$0xff]  ;;  %v1598_v42 = vadd.f32 %v1086_v35, %v574_v34  ;;  %v1106_v31 = vld [vmem:[%s2852_s7 + $0xb00] sm:$0xff] }
 0x1a4   : > { %2088 = vst [vmem:[%s2867_s20 + $0x9b0] sm:$0xff] %v1576_v40  ;;  %v576_v40 = vld [vmem:[%s2845_s19 + $0xa70] sm:$0xff]  ;;  %v1599_v45 = vadd.f32 %v1087_v38, %v575_v37  ;;  %v1107_v34 = vld [vmem:[%s2852_s7 + $0xb08] sm:$0xff] }
 0x1a5   : > { %2089 = vst [vmem:[%s2867_s20 + $0x9b8] sm:$0xff] %v1577_v43  ;;  %v577_v43 = vld [vmem:[%s2845_s19 + $0xa78] sm:$0xff]  ;;  %v1600_v48 = vadd.f32 %v1088_v41, %v576_v40  ;;  %v1108_v37 = vld [vmem:[%s2852_s7 + $0xb10] sm:$0xff] }
 0x1a6   : > { %2090 = vst [vmem:[%s2867_s20 + $0x9c0] sm:$0xff] %v1578_v46  ;;  %v578_v46 = vld [vmem:[%s2845_s19 + $0xa80] sm:$0xff]  ;;  %v1601_v51 = vadd.f32 %v1089_v44, %v577_v43  ;;  %v1109_v40 = vld [vmem:[%s2852_s7 + $0xb18] sm:$0xff] }
 0x1a7   : > { %2091 = vst [vmem:[%s2867_s20 + $0x9c8] sm:$0xff] %v1579_v49  ;;  %v579_v49 = vld [vmem:[%s2845_s19 + $0xa88] sm:$0xff]  ;;  %v1602_v54 = vadd.f32 %v1090_v47, %v578_v46  ;;  %v1110_v43 = vld [vmem:[%s2852_s7 + $0xb20] sm:$0xff] }
 0x1a8   : > { %2092 = vst [vmem:[%s2867_s20 + $0x9d0] sm:$0xff] %v1580_v52  ;;  %v580_v52 = vld [vmem:[%s2845_s19 + $0xa90] sm:$0xff]  ;;  %v1603_v57 = vadd.f32 %v1091_v50, %v579_v49  ;;  %v1111_v46 = vld [vmem:[%s2852_s7 + $0xb28] sm:$0xff] }
 0x1a9   : > { %2093 = vst [vmem:[%s2867_s20 + $0x9d8] sm:$0xff] %v1581_v55  ;;  %v581_v55 = vld [vmem:[%s2845_s19 + $0xa98] sm:$0xff]  ;;  %v1604_v60 = vadd.f32 %v1092_v53, %v580_v52  ;;  %v1112_v49 = vld [vmem:[%s2852_s7 + $0xb30] sm:$0xff] }
 0x1aa   : > { %2094 = vst [vmem:[%s2867_s20 + $0x9e0] sm:$0xff] %v1582_v58  ;;  %v582_v58 = vld [vmem:[%s2845_s19 + $0xaa0] sm:$0xff]  ;;  %v1605_v63 = vadd.f32 %v1093_v56, %v581_v55  ;;  %v1113_v52 = vld [vmem:[%s2852_s7 + $0xb38] sm:$0xff] }
 0x1ab   : > { %2095 = vst [vmem:[%s2867_s20 + $0x9e8] sm:$0xff] %v1583_v61  ;;  %v583_v61 = vld [vmem:[%s2845_s19 + $0xaa8] sm:$0xff]  ;;  %v1606_v2 = vadd.f32 %v1094_v59, %v582_v58  ;;  %v1114_v55 = vld [vmem:[%s2852_s7 + $0xb40] sm:$0xff] }
 0x1ac   : > { %2096 = vst [vmem:[%s2867_s20 + $0x9f0] sm:$0xff] %v1584_v0  ;;  %v584_v0 = vld [vmem:[%s2845_s19 + $0xab0] sm:$0xff]  ;;  %v1607_v5 = vadd.f32 %v1095_v62, %v583_v61  ;;  %v1115_v58 = vld [vmem:[%s2852_s7 + $0xb48] sm:$0xff] }
 0x1ad   : > { %2097 = vst [vmem:[%s2867_s20 + $0x9f8] sm:$0xff] %v1585_v3  ;;  %v585_v3 = vld [vmem:[%s2845_s19 + $0xab8] sm:$0xff]  ;;  %v1608_v8 = vadd.f32 %v1096_v1, %v584_v0  ;;  %v1116_v61 = vld [vmem:[%s2852_s7 + $0xb50] sm:$0xff] }
 0x1ae   : > { %2098 = vst [vmem:[%s2867_s20 + $0xa00] sm:$0xff] %v1586_v6  ;;  %v586_v6 = vld [vmem:[%s2845_s19 + $0xac0] sm:$0xff]  ;;  %v1609_v11 = vadd.f32 %v1097_v4, %v585_v3  ;;  %v1117_v0 = vld [vmem:[%s2852_s7 + $0xb58] sm:$0xff] }
 0x1af   : > { %2099 = vst [vmem:[%s2867_s20 + $0xa08] sm:$0xff] %v1587_v9  ;;  %v587_v9 = vld [vmem:[%s2845_s19 + $0xac8] sm:$0xff]  ;;  %v1610_v14 = vadd.f32 %v1098_v7, %v586_v6  ;;  %v1118_v3 = vld [vmem:[%s2852_s7 + $0xb60] sm:$0xff] }
 0x1b0   : > { %2100 = vst [vmem:[%s2867_s20 + $0xa10] sm:$0xff] %v1588_v12  ;;  %v588_v12 = vld [vmem:[%s2845_s19 + $0xad0] sm:$0xff]  ;;  %v1611_v17 = vadd.f32 %v1099_v10, %v587_v9  ;;  %v1119_v6 = vld [vmem:[%s2852_s7 + $0xb68] sm:$0xff] }
 0x1b1   : > { %2101 = vst [vmem:[%s2867_s20 + $0xa18] sm:$0xff] %v1589_v15  ;;  %v589_v15 = vld [vmem:[%s2845_s19 + $0xad8] sm:$0xff]  ;;  %v1612_v20 = vadd.f32 %v1100_v13, %v588_v12  ;;  %v1120_v9 = vld [vmem:[%s2852_s7 + $0xb70] sm:$0xff] }
 0x1b2   : > { %2102 = vst [vmem:[%s2867_s20 + $0xa20] sm:$0xff] %v1590_v18  ;;  %v590_v18 = vld [vmem:[%s2845_s19 + $0xae0] sm:$0xff]  ;;  %v1613_v23 = vadd.f32 %v1101_v16, %v589_v15  ;;  %v1121_v12 = vld [vmem:[%s2852_s7 + $0xb78] sm:$0xff] }
 0x1b3   : > { %2103 = vst [vmem:[%s2867_s20 + $0xa28] sm:$0xff] %v1591_v21  ;;  %v591_v21 = vld [vmem:[%s2845_s19 + $0xae8] sm:$0xff]  ;;  %v1614_v26 = vadd.f32 %v1102_v19, %v590_v18  ;;  %v1122_v15 = vld [vmem:[%s2852_s7 + $0xb80] sm:$0xff] }
 0x1b4   : > { %2104 = vst [vmem:[%s2867_s20 + $0xa30] sm:$0xff] %v1592_v24  ;;  %v592_v24 = vld [vmem:[%s2845_s19 + $0xaf0] sm:$0xff]  ;;  %v1615_v29 = vadd.f32 %v1103_v22, %v591_v21  ;;  %v1123_v18 = vld [vmem:[%s2852_s7 + $0xb88] sm:$0xff] }
 0x1b5   : > { %2105 = vst [vmem:[%s2867_s20 + $0xa38] sm:$0xff] %v1593_v27  ;;  %v593_v27 = vld [vmem:[%s2845_s19 + $0xaf8] sm:$0xff]  ;;  %v1616_v32 = vadd.f32 %v1104_v25, %v592_v24  ;;  %v1124_v21 = vld [vmem:[%s2852_s7 + $0xb90] sm:$0xff] }
 0x1b6   : > { %2106 = vst [vmem:[%s2867_s20 + $0xa40] sm:$0xff] %v1594_v30  ;;  %v594_v30 = vld [vmem:[%s2845_s19 + $0xb00] sm:$0xff]  ;;  %v1617_v35 = vadd.f32 %v1105_v28, %v593_v27  ;;  %v1125_v24 = vld [vmem:[%s2852_s7 + $0xb98] sm:$0xff] }
 0x1b7   : > { %2107 = vst [vmem:[%s2867_s20 + $0xa48] sm:$0xff] %v1595_v33  ;;  %v595_v33 = vld [vmem:[%s2845_s19 + $0xb08] sm:$0xff]  ;;  %v1618_v38 = vadd.f32 %v1106_v31, %v594_v30  ;;  %v1126_v27 = vld [vmem:[%s2852_s7 + $0xba0] sm:$0xff] }
 0x1b8   : > { %2108 = vst [vmem:[%s2867_s20 + $0xa50] sm:$0xff] %v1596_v36  ;;  %v596_v36 = vld [vmem:[%s2845_s19 + $0xb10] sm:$0xff]  ;;  %v1619_v41 = vadd.f32 %v1107_v34, %v595_v33  ;;  %v1127_v30 = vld [vmem:[%s2852_s7 + $0xba8] sm:$0xff] }
 0x1b9   : > { %2109 = vst [vmem:[%s2867_s20 + $0xa58] sm:$0xff] %v1597_v39  ;;  %v597_v39 = vld [vmem:[%s2845_s19 + $0xb18] sm:$0xff]  ;;  %v1620_v44 = vadd.f32 %v1108_v37, %v596_v36  ;;  %v1128_v33 = vld [vmem:[%s2852_s7 + $0xbb0] sm:$0xff] }
 0x1ba   : > { %2110 = vst [vmem:[%s2867_s20 + $0xa60] sm:$0xff] %v1598_v42  ;;  %v598_v42 = vld [vmem:[%s2845_s19 + $0xb20] sm:$0xff]  ;;  %v1621_v47 = vadd.f32 %v1109_v40, %v597_v39  ;;  %v1129_v36 = vld [vmem:[%s2852_s7 + $0xbb8] sm:$0xff] }
 0x1bb   : > { %2111 = vst [vmem:[%s2867_s20 + $0xa68] sm:$0xff] %v1599_v45  ;;  %v599_v45 = vld [vmem:[%s2845_s19 + $0xb28] sm:$0xff]  ;;  %v1622_v50 = vadd.f32 %v1110_v43, %v598_v42  ;;  %v1130_v39 = vld [vmem:[%s2852_s7 + $0xbc0] sm:$0xff] }
 0x1bc   : > { %2112 = vst [vmem:[%s2867_s20 + $0xa70] sm:$0xff] %v1600_v48  ;;  %v600_v48 = vld [vmem:[%s2845_s19 + $0xb30] sm:$0xff]  ;;  %v1623_v53 = vadd.f32 %v1111_v46, %v599_v45  ;;  %v1131_v42 = vld [vmem:[%s2852_s7 + $0xbc8] sm:$0xff] }
 0x1bd   : > { %2113 = vst [vmem:[%s2867_s20 + $0xa78] sm:$0xff] %v1601_v51  ;;  %v601_v51 = vld [vmem:[%s2845_s19 + $0xb38] sm:$0xff]  ;;  %v1624_v56 = vadd.f32 %v1112_v49, %v600_v48  ;;  %v1132_v45 = vld [vmem:[%s2852_s7 + $0xbd0] sm:$0xff] }
 0x1be   : > { %2114 = vst [vmem:[%s2867_s20 + $0xa80] sm:$0xff] %v1602_v54  ;;  %v602_v54 = vld [vmem:[%s2845_s19 + $0xb40] sm:$0xff]  ;;  %v1625_v59 = vadd.f32 %v1113_v52, %v601_v51  ;;  %v1133_v48 = vld [vmem:[%s2852_s7 + $0xbd8] sm:$0xff] }
 0x1bf   : > { %2115 = vst [vmem:[%s2867_s20 + $0xa88] sm:$0xff] %v1603_v57  ;;  %v603_v57 = vld [vmem:[%s2845_s19 + $0xb48] sm:$0xff]  ;;  %v1626_v62 = vadd.f32 %v1114_v55, %v602_v54  ;;  %v1134_v51 = vld [vmem:[%s2852_s7 + $0xbe0] sm:$0xff] }
 0x1c0   : > { %2116 = vst [vmem:[%s2867_s20 + $0xa90] sm:$0xff] %v1604_v60  ;;  %v604_v60 = vld [vmem:[%s2845_s19 + $0xb50] sm:$0xff]  ;;  %v1627_v1 = vadd.f32 %v1115_v58, %v603_v57  ;;  %v1135_v54 = vld [vmem:[%s2852_s7 + $0xbe8] sm:$0xff] }
 0x1c1   : > { %2117 = vst [vmem:[%s2867_s20 + $0xa98] sm:$0xff] %v1605_v63  ;;  %v605_v63 = vld [vmem:[%s2845_s19 + $0xb58] sm:$0xff]  ;;  %v1628_v4 = vadd.f32 %v1116_v61, %v604_v60  ;;  %v1136_v57 = vld [vmem:[%s2852_s7 + $0xbf0] sm:$0xff] }
 0x1c2   : > { %2118 = vst [vmem:[%s2867_s20 + $0xaa0] sm:$0xff] %v1606_v2  ;;  %v606_v2 = vld [vmem:[%s2845_s19 + $0xb60] sm:$0xff]  ;;  %v1629_v7 = vadd.f32 %v1117_v0, %v605_v63  ;;  %v1137_v60 = vld [vmem:[%s2852_s7 + $0xbf8] sm:$0xff] }
 0x1c3   : > { %2119 = vst [vmem:[%s2867_s20 + $0xaa8] sm:$0xff] %v1607_v5  ;;  %v607_v5 = vld [vmem:[%s2845_s19 + $0xb68] sm:$0xff]  ;;  %v1630_v10 = vadd.f32 %v1118_v3, %v606_v2  ;;  %v1138_v63 = vld [vmem:[%s2852_s7 + $0xc00] sm:$0xff] }
 0x1c4   : > { %2120 = vst [vmem:[%s2867_s20 + $0xab0] sm:$0xff] %v1608_v8  ;;  %v608_v8 = vld [vmem:[%s2845_s19 + $0xb70] sm:$0xff]  ;;  %v1631_v13 = vadd.f32 %v1119_v6, %v607_v5  ;;  %v1139_v2 = vld [vmem:[%s2852_s7 + $0xc08] sm:$0xff] }
 0x1c5   : > { %2121 = vst [vmem:[%s2867_s20 + $0xab8] sm:$0xff] %v1609_v11  ;;  %v609_v11 = vld [vmem:[%s2845_s19 + $0xb78] sm:$0xff]  ;;  %v1632_v16 = vadd.f32 %v1120_v9, %v608_v8  ;;  %v1140_v5 = vld [vmem:[%s2852_s7 + $0xc10] sm:$0xff] }
 0x1c6   : > { %2122 = vst [vmem:[%s2867_s20 + $0xac0] sm:$0xff] %v1610_v14  ;;  %v610_v14 = vld [vmem:[%s2845_s19 + $0xb80] sm:$0xff]  ;;  %v1633_v19 = vadd.f32 %v1121_v12, %v609_v11  ;;  %v1141_v8 = vld [vmem:[%s2852_s7 + $0xc18] sm:$0xff] }
 0x1c7   : > { %2123 = vst [vmem:[%s2867_s20 + $0xac8] sm:$0xff] %v1611_v17  ;;  %v611_v17 = vld [vmem:[%s2845_s19 + $0xb88] sm:$0xff]  ;;  %v1634_v22 = vadd.f32 %v1122_v15, %v610_v14  ;;  %v1142_v11 = vld [vmem:[%s2852_s7 + $0xc20] sm:$0xff] }
 0x1c8   : > { %2124 = vst [vmem:[%s2867_s20 + $0xad0] sm:$0xff] %v1612_v20  ;;  %v612_v20 = vld [vmem:[%s2845_s19 + $0xb90] sm:$0xff]  ;;  %v1635_v25 = vadd.f32 %v1123_v18, %v611_v17  ;;  %v1143_v14 = vld [vmem:[%s2852_s7 + $0xc28] sm:$0xff] }
 0x1c9   : > { %2125 = vst [vmem:[%s2867_s20 + $0xad8] sm:$0xff] %v1613_v23  ;;  %v613_v23 = vld [vmem:[%s2845_s19 + $0xb98] sm:$0xff]  ;;  %v1636_v28 = vadd.f32 %v1124_v21, %v612_v20  ;;  %v1144_v17 = vld [vmem:[%s2852_s7 + $0xc30] sm:$0xff] }
 0x1ca   : > { %2126 = vst [vmem:[%s2867_s20 + $0xae0] sm:$0xff] %v1614_v26  ;;  %v614_v26 = vld [vmem:[%s2845_s19 + $0xba0] sm:$0xff]  ;;  %v1637_v31 = vadd.f32 %v1125_v24, %v613_v23  ;;  %v1145_v20 = vld [vmem:[%s2852_s7 + $0xc38] sm:$0xff] }
 0x1cb   : > { %2127 = vst [vmem:[%s2867_s20 + $0xae8] sm:$0xff] %v1615_v29  ;;  %v615_v29 = vld [vmem:[%s2845_s19 + $0xba8] sm:$0xff]  ;;  %v1638_v34 = vadd.f32 %v1126_v27, %v614_v26  ;;  %v1146_v23 = vld [vmem:[%s2852_s7 + $0xc40] sm:$0xff] }
 0x1cc   : > { %2128 = vst [vmem:[%s2867_s20 + $0xaf0] sm:$0xff] %v1616_v32  ;;  %v616_v32 = vld [vmem:[%s2845_s19 + $0xbb0] sm:$0xff]  ;;  %v1639_v37 = vadd.f32 %v1127_v30, %v615_v29  ;;  %v1147_v26 = vld [vmem:[%s2852_s7 + $0xc48] sm:$0xff] }
 0x1cd   : > { %2129 = vst [vmem:[%s2867_s20 + $0xaf8] sm:$0xff] %v1617_v35  ;;  %v617_v35 = vld [vmem:[%s2845_s19 + $0xbb8] sm:$0xff]  ;;  %v1640_v40 = vadd.f32 %v1128_v33, %v616_v32  ;;  %v1148_v29 = vld [vmem:[%s2852_s7 + $0xc50] sm:$0xff] }
 0x1ce   : > { %2130 = vst [vmem:[%s2867_s20 + $0xb00] sm:$0xff] %v1618_v38  ;;  %v618_v38 = vld [vmem:[%s2845_s19 + $0xbc0] sm:$0xff]  ;;  %v1641_v43 = vadd.f32 %v1129_v36, %v617_v35  ;;  %v1149_v32 = vld [vmem:[%s2852_s7 + $0xc58] sm:$0xff] }
 0x1cf   : > { %2131 = vst [vmem:[%s2867_s20 + $0xb08] sm:$0xff] %v1619_v41  ;;  %v619_v41 = vld [vmem:[%s2845_s19 + $0xbc8] sm:$0xff]  ;;  %v1642_v46 = vadd.f32 %v1130_v39, %v618_v38  ;;  %v1150_v35 = vld [vmem:[%s2852_s7 + $0xc60] sm:$0xff] }
 0x1d0   : > { %2132 = vst [vmem:[%s2867_s20 + $0xb10] sm:$0xff] %v1620_v44  ;;  %v620_v44 = vld [vmem:[%s2845_s19 + $0xbd0] sm:$0xff]  ;;  %v1643_v49 = vadd.f32 %v1131_v42, %v619_v41  ;;  %v1151_v38 = vld [vmem:[%s2852_s7 + $0xc68] sm:$0xff] }
 0x1d1   : > { %2133 = vst [vmem:[%s2867_s20 + $0xb18] sm:$0xff] %v1621_v47  ;;  %v621_v47 = vld [vmem:[%s2845_s19 + $0xbd8] sm:$0xff]  ;;  %v1644_v52 = vadd.f32 %v1132_v45, %v620_v44  ;;  %v1152_v41 = vld [vmem:[%s2852_s7 + $0xc70] sm:$0xff] }
 0x1d2   : > { %2134 = vst [vmem:[%s2867_s20 + $0xb20] sm:$0xff] %v1622_v50  ;;  %v622_v50 = vld [vmem:[%s2845_s19 + $0xbe0] sm:$0xff]  ;;  %v1645_v55 = vadd.f32 %v1133_v48, %v621_v47  ;;  %v1153_v44 = vld [vmem:[%s2852_s7 + $0xc78] sm:$0xff] }
 0x1d3   : > { %2135 = vst [vmem:[%s2867_s20 + $0xb28] sm:$0xff] %v1623_v53  ;;  %v623_v53 = vld [vmem:[%s2845_s19 + $0xbe8] sm:$0xff]  ;;  %v1646_v58 = vadd.f32 %v1134_v51, %v622_v50  ;;  %v1154_v47 = vld [vmem:[%s2852_s7 + $0xc80] sm:$0xff] }
 0x1d4   : > { %2136 = vst [vmem:[%s2867_s20 + $0xb30] sm:$0xff] %v1624_v56  ;;  %v624_v56 = vld [vmem:[%s2845_s19 + $0xbf0] sm:$0xff]  ;;  %v1647_v61 = vadd.f32 %v1135_v54, %v623_v53  ;;  %v1155_v50 = vld [vmem:[%s2852_s7 + $0xc88] sm:$0xff] }
 0x1d5   : > { %2137 = vst [vmem:[%s2867_s20 + $0xb38] sm:$0xff] %v1625_v59  ;;  %v625_v59 = vld [vmem:[%s2845_s19 + $0xbf8] sm:$0xff]  ;;  %v1648_v0 = vadd.f32 %v1136_v57, %v624_v56  ;;  %v1156_v53 = vld [vmem:[%s2852_s7 + $0xc90] sm:$0xff] }
 0x1d6   : > { %2138 = vst [vmem:[%s2867_s20 + $0xb40] sm:$0xff] %v1626_v62  ;;  %v626_v62 = vld [vmem:[%s2845_s19 + $0xc00] sm:$0xff]  ;;  %v1649_v3 = vadd.f32 %v1137_v60, %v625_v59  ;;  %v1157_v56 = vld [vmem:[%s2852_s7 + $0xc98] sm:$0xff] }
 0x1d7   : > { %2139 = vst [vmem:[%s2867_s20 + $0xb48] sm:$0xff] %v1627_v1  ;;  %v627_v1 = vld [vmem:[%s2845_s19 + $0xc08] sm:$0xff]  ;;  %v1650_v6 = vadd.f32 %v1138_v63, %v626_v62  ;;  %v1158_v59 = vld [vmem:[%s2852_s7 + $0xca0] sm:$0xff] }
 0x1d8   : > { %2140 = vst [vmem:[%s2867_s20 + $0xb50] sm:$0xff] %v1628_v4  ;;  %v628_v4 = vld [vmem:[%s2845_s19 + $0xc10] sm:$0xff]  ;;  %v1651_v9 = vadd.f32 %v1139_v2, %v627_v1  ;;  %v1159_v62 = vld [vmem:[%s2852_s7 + $0xca8] sm:$0xff] }
 0x1d9   : > { %2141 = vst [vmem:[%s2867_s20 + $0xb58] sm:$0xff] %v1629_v7  ;;  %v629_v7 = vld [vmem:[%s2845_s19 + $0xc18] sm:$0xff]  ;;  %v1652_v12 = vadd.f32 %v1140_v5, %v628_v4  ;;  %v1160_v1 = vld [vmem:[%s2852_s7 + $0xcb0] sm:$0xff] }
 0x1da   : > { %2142 = vst [vmem:[%s2867_s20 + $0xb60] sm:$0xff] %v1630_v10  ;;  %v630_v10 = vld [vmem:[%s2845_s19 + $0xc20] sm:$0xff]  ;;  %v1653_v15 = vadd.f32 %v1141_v8, %v629_v7  ;;  %v1161_v4 = vld [vmem:[%s2852_s7 + $0xcb8] sm:$0xff] }
 0x1db   : > { %2143 = vst [vmem:[%s2867_s20 + $0xb68] sm:$0xff] %v1631_v13  ;;  %v631_v13 = vld [vmem:[%s2845_s19 + $0xc28] sm:$0xff]  ;;  %v1654_v18 = vadd.f32 %v1142_v11, %v630_v10  ;;  %v1162_v7 = vld [vmem:[%s2852_s7 + $0xcc0] sm:$0xff] }
 0x1dc   : > { %2144 = vst [vmem:[%s2867_s20 + $0xb70] sm:$0xff] %v1632_v16  ;;  %v632_v16 = vld [vmem:[%s2845_s19 + $0xc30] sm:$0xff]  ;;  %v1655_v21 = vadd.f32 %v1143_v14, %v631_v13  ;;  %v1163_v10 = vld [vmem:[%s2852_s7 + $0xcc8] sm:$0xff] }
 0x1dd   : > { %2145 = vst [vmem:[%s2867_s20 + $0xb78] sm:$0xff] %v1633_v19  ;;  %v633_v19 = vld [vmem:[%s2845_s19 + $0xc38] sm:$0xff]  ;;  %v1656_v24 = vadd.f32 %v1144_v17, %v632_v16  ;;  %v1164_v13 = vld [vmem:[%s2852_s7 + $0xcd0] sm:$0xff] }
 0x1de   : > { %2146 = vst [vmem:[%s2867_s20 + $0xb80] sm:$0xff] %v1634_v22  ;;  %v634_v22 = vld [vmem:[%s2845_s19 + $0xc40] sm:$0xff]  ;;  %v1657_v27 = vadd.f32 %v1145_v20, %v633_v19  ;;  %v1165_v16 = vld [vmem:[%s2852_s7 + $0xcd8] sm:$0xff] }
 0x1df   : > { %2147 = vst [vmem:[%s2867_s20 + $0xb88] sm:$0xff] %v1635_v25  ;;  %v635_v25 = vld [vmem:[%s2845_s19 + $0xc48] sm:$0xff]  ;;  %v1658_v30 = vadd.f32 %v1146_v23, %v634_v22  ;;  %v1166_v19 = vld [vmem:[%s2852_s7 + $0xce0] sm:$0xff] }
 0x1e0   : > { %2148 = vst [vmem:[%s2867_s20 + $0xb90] sm:$0xff] %v1636_v28  ;;  %v636_v28 = vld [vmem:[%s2845_s19 + $0xc50] sm:$0xff]  ;;  %v1659_v33 = vadd.f32 %v1147_v26, %v635_v25  ;;  %v1167_v22 = vld [vmem:[%s2852_s7 + $0xce8] sm:$0xff] }
 0x1e1   : > { %2149 = vst [vmem:[%s2867_s20 + $0xb98] sm:$0xff] %v1637_v31  ;;  %v637_v31 = vld [vmem:[%s2845_s19 + $0xc58] sm:$0xff]  ;;  %v1660_v36 = vadd.f32 %v1148_v29, %v636_v28  ;;  %v1168_v25 = vld [vmem:[%s2852_s7 + $0xcf0] sm:$0xff] }
 0x1e2   : > { %2150 = vst [vmem:[%s2867_s20 + $0xba0] sm:$0xff] %v1638_v34  ;;  %v638_v34 = vld [vmem:[%s2845_s19 + $0xc60] sm:$0xff]  ;;  %v1661_v39 = vadd.f32 %v1149_v32, %v637_v31  ;;  %v1169_v28 = vld [vmem:[%s2852_s7 + $0xcf8] sm:$0xff] }
 0x1e3   : > { %2151 = vst [vmem:[%s2867_s20 + $0xba8] sm:$0xff] %v1639_v37  ;;  %v639_v37 = vld [vmem:[%s2845_s19 + $0xc68] sm:$0xff]  ;;  %v1662_v42 = vadd.f32 %v1150_v35, %v638_v34  ;;  %v1170_v31 = vld [vmem:[%s2852_s7 + $0xd00] sm:$0xff] }
 0x1e4   : > { %2152 = vst [vmem:[%s2867_s20 + $0xbb0] sm:$0xff] %v1640_v40  ;;  %v640_v40 = vld [vmem:[%s2845_s19 + $0xc70] sm:$0xff]  ;;  %v1663_v45 = vadd.f32 %v1151_v38, %v639_v37  ;;  %v1171_v34 = vld [vmem:[%s2852_s7 + $0xd08] sm:$0xff] }
 0x1e5   : > { %2153 = vst [vmem:[%s2867_s20 + $0xbb8] sm:$0xff] %v1641_v43  ;;  %v641_v43 = vld [vmem:[%s2845_s19 + $0xc78] sm:$0xff]  ;;  %v1664_v48 = vadd.f32 %v1152_v41, %v640_v40  ;;  %v1172_v37 = vld [vmem:[%s2852_s7 + $0xd10] sm:$0xff] }
 0x1e6   : > { %2154 = vst [vmem:[%s2867_s20 + $0xbc0] sm:$0xff] %v1642_v46  ;;  %v642_v46 = vld [vmem:[%s2845_s19 + $0xc80] sm:$0xff]  ;;  %v1665_v51 = vadd.f32 %v1153_v44, %v641_v43  ;;  %v1173_v40 = vld [vmem:[%s2852_s7 + $0xd18] sm:$0xff] }
 0x1e7   : > { %2155 = vst [vmem:[%s2867_s20 + $0xbc8] sm:$0xff] %v1643_v49  ;;  %v643_v49 = vld [vmem:[%s2845_s19 + $0xc88] sm:$0xff]  ;;  %v1666_v54 = vadd.f32 %v1154_v47, %v642_v46  ;;  %v1174_v43 = vld [vmem:[%s2852_s7 + $0xd20] sm:$0xff] }
 0x1e8   : > { %2156 = vst [vmem:[%s2867_s20 + $0xbd0] sm:$0xff] %v1644_v52  ;;  %v644_v52 = vld [vmem:[%s2845_s19 + $0xc90] sm:$0xff]  ;;  %v1667_v57 = vadd.f32 %v1155_v50, %v643_v49  ;;  %v1175_v46 = vld [vmem:[%s2852_s7 + $0xd28] sm:$0xff] }
 0x1e9   : > { %2157 = vst [vmem:[%s2867_s20 + $0xbd8] sm:$0xff] %v1645_v55  ;;  %v645_v55 = vld [vmem:[%s2845_s19 + $0xc98] sm:$0xff]  ;;  %v1668_v60 = vadd.f32 %v1156_v53, %v644_v52  ;;  %v1176_v49 = vld [vmem:[%s2852_s7 + $0xd30] sm:$0xff] }
 0x1ea   : > { %2158 = vst [vmem:[%s2867_s20 + $0xbe0] sm:$0xff] %v1646_v58  ;;  %v646_v58 = vld [vmem:[%s2845_s19 + $0xca0] sm:$0xff]  ;;  %v1669_v63 = vadd.f32 %v1157_v56, %v645_v55  ;;  %v1177_v52 = vld [vmem:[%s2852_s7 + $0xd38] sm:$0xff] }
 0x1eb   : > { %2159 = vst [vmem:[%s2867_s20 + $0xbe8] sm:$0xff] %v1647_v61  ;;  %v647_v61 = vld [vmem:[%s2845_s19 + $0xca8] sm:$0xff]  ;;  %v1670_v2 = vadd.f32 %v1158_v59, %v646_v58  ;;  %v1178_v55 = vld [vmem:[%s2852_s7 + $0xd40] sm:$0xff] }
 0x1ec   : > { %2160 = vst [vmem:[%s2867_s20 + $0xbf0] sm:$0xff] %v1648_v0  ;;  %v648_v0 = vld [vmem:[%s2845_s19 + $0xcb0] sm:$0xff]  ;;  %v1671_v5 = vadd.f32 %v1159_v62, %v647_v61  ;;  %v1179_v58 = vld [vmem:[%s2852_s7 + $0xd48] sm:$0xff] }
 0x1ed   : > { %2161 = vst [vmem:[%s2867_s20 + $0xbf8] sm:$0xff] %v1649_v3  ;;  %v649_v3 = vld [vmem:[%s2845_s19 + $0xcb8] sm:$0xff]  ;;  %v1672_v8 = vadd.f32 %v1160_v1, %v648_v0  ;;  %v1180_v61 = vld [vmem:[%s2852_s7 + $0xd50] sm:$0xff] }
 0x1ee   : > { %2162 = vst [vmem:[%s2867_s20 + $0xc00] sm:$0xff] %v1650_v6  ;;  %v650_v6 = vld [vmem:[%s2845_s19 + $0xcc0] sm:$0xff]  ;;  %v1673_v11 = vadd.f32 %v1161_v4, %v649_v3  ;;  %v1181_v0 = vld [vmem:[%s2852_s7 + $0xd58] sm:$0xff] }
 0x1ef   : > { %2163 = vst [vmem:[%s2867_s20 + $0xc08] sm:$0xff] %v1651_v9  ;;  %v651_v9 = vld [vmem:[%s2845_s19 + $0xcc8] sm:$0xff]  ;;  %v1674_v14 = vadd.f32 %v1162_v7, %v650_v6  ;;  %v1182_v3 = vld [vmem:[%s2852_s7 + $0xd60] sm:$0xff] }
 0x1f0   : > { %2164 = vst [vmem:[%s2867_s20 + $0xc10] sm:$0xff] %v1652_v12  ;;  %v652_v12 = vld [vmem:[%s2845_s19 + $0xcd0] sm:$0xff]  ;;  %v1675_v17 = vadd.f32 %v1163_v10, %v651_v9  ;;  %v1183_v6 = vld [vmem:[%s2852_s7 + $0xd68] sm:$0xff] }
 0x1f1   : > { %2165 = vst [vmem:[%s2867_s20 + $0xc18] sm:$0xff] %v1653_v15  ;;  %v653_v15 = vld [vmem:[%s2845_s19 + $0xcd8] sm:$0xff]  ;;  %v1676_v20 = vadd.f32 %v1164_v13, %v652_v12  ;;  %v1184_v9 = vld [vmem:[%s2852_s7 + $0xd70] sm:$0xff] }
 0x1f2   : > { %2166 = vst [vmem:[%s2867_s20 + $0xc20] sm:$0xff] %v1654_v18  ;;  %v654_v18 = vld [vmem:[%s2845_s19 + $0xce0] sm:$0xff]  ;;  %v1677_v23 = vadd.f32 %v1165_v16, %v653_v15  ;;  %v1185_v12 = vld [vmem:[%s2852_s7 + $0xd78] sm:$0xff] }
 0x1f3   : > { %2167 = vst [vmem:[%s2867_s20 + $0xc28] sm:$0xff] %v1655_v21  ;;  %v655_v21 = vld [vmem:[%s2845_s19 + $0xce8] sm:$0xff]  ;;  %v1678_v26 = vadd.f32 %v1166_v19, %v654_v18  ;;  %v1186_v15 = vld [vmem:[%s2852_s7 + $0xd80] sm:$0xff] }
 0x1f4   : > { %2168 = vst [vmem:[%s2867_s20 + $0xc30] sm:$0xff] %v1656_v24  ;;  %v656_v24 = vld [vmem:[%s2845_s19 + $0xcf0] sm:$0xff]  ;;  %v1679_v29 = vadd.f32 %v1167_v22, %v655_v21  ;;  %v1187_v18 = vld [vmem:[%s2852_s7 + $0xd88] sm:$0xff] }
 0x1f5   : > { %2169 = vst [vmem:[%s2867_s20 + $0xc38] sm:$0xff] %v1657_v27  ;;  %v657_v27 = vld [vmem:[%s2845_s19 + $0xcf8] sm:$0xff]  ;;  %v1680_v32 = vadd.f32 %v1168_v25, %v656_v24  ;;  %v1188_v21 = vld [vmem:[%s2852_s7 + $0xd90] sm:$0xff] }
 0x1f6   : > { %2170 = vst [vmem:[%s2867_s20 + $0xc40] sm:$0xff] %v1658_v30  ;;  %v658_v30 = vld [vmem:[%s2845_s19 + $0xd00] sm:$0xff]  ;;  %v1681_v35 = vadd.f32 %v1169_v28, %v657_v27  ;;  %v1189_v24 = vld [vmem:[%s2852_s7 + $0xd98] sm:$0xff] }
 0x1f7   : > { %2171 = vst [vmem:[%s2867_s20 + $0xc48] sm:$0xff] %v1659_v33  ;;  %v659_v33 = vld [vmem:[%s2845_s19 + $0xd08] sm:$0xff]  ;;  %v1682_v38 = vadd.f32 %v1170_v31, %v658_v30  ;;  %v1190_v27 = vld [vmem:[%s2852_s7 + $0xda0] sm:$0xff] }
 0x1f8   : > { %2172 = vst [vmem:[%s2867_s20 + $0xc50] sm:$0xff] %v1660_v36  ;;  %v660_v36 = vld [vmem:[%s2845_s19 + $0xd10] sm:$0xff]  ;;  %v1683_v41 = vadd.f32 %v1171_v34, %v659_v33  ;;  %v1191_v30 = vld [vmem:[%s2852_s7 + $0xda8] sm:$0xff] }
 0x1f9   : > { %2173 = vst [vmem:[%s2867_s20 + $0xc58] sm:$0xff] %v1661_v39  ;;  %v661_v39 = vld [vmem:[%s2845_s19 + $0xd18] sm:$0xff]  ;;  %v1684_v44 = vadd.f32 %v1172_v37, %v660_v36  ;;  %v1192_v33 = vld [vmem:[%s2852_s7 + $0xdb0] sm:$0xff] }
 0x1fa   : > { %2174 = vst [vmem:[%s2867_s20 + $0xc60] sm:$0xff] %v1662_v42  ;;  %v662_v42 = vld [vmem:[%s2845_s19 + $0xd20] sm:$0xff]  ;;  %v1685_v47 = vadd.f32 %v1173_v40, %v661_v39  ;;  %v1193_v36 = vld [vmem:[%s2852_s7 + $0xdb8] sm:$0xff] }
 0x1fb   : > { %2175 = vst [vmem:[%s2867_s20 + $0xc68] sm:$0xff] %v1663_v45  ;;  %v663_v45 = vld [vmem:[%s2845_s19 + $0xd28] sm:$0xff]  ;;  %v1686_v50 = vadd.f32 %v1174_v43, %v662_v42  ;;  %v1194_v39 = vld [vmem:[%s2852_s7 + $0xdc0] sm:$0xff] }
 0x1fc   : > { %2176 = vst [vmem:[%s2867_s20 + $0xc70] sm:$0xff] %v1664_v48  ;;  %v664_v48 = vld [vmem:[%s2845_s19 + $0xd30] sm:$0xff]  ;;  %v1687_v53 = vadd.f32 %v1175_v46, %v663_v45  ;;  %v1195_v42 = vld [vmem:[%s2852_s7 + $0xdc8] sm:$0xff] }
 0x1fd   : > { %2177 = vst [vmem:[%s2867_s20 + $0xc78] sm:$0xff] %v1665_v51  ;;  %v665_v51 = vld [vmem:[%s2845_s19 + $0xd38] sm:$0xff]  ;;  %v1688_v56 = vadd.f32 %v1176_v49, %v664_v48  ;;  %v1196_v45 = vld [vmem:[%s2852_s7 + $0xdd0] sm:$0xff] }
 0x1fe   : > { %2178 = vst [vmem:[%s2867_s20 + $0xc80] sm:$0xff] %v1666_v54  ;;  %v666_v54 = vld [vmem:[%s2845_s19 + $0xd40] sm:$0xff]  ;;  %v1689_v59 = vadd.f32 %v1177_v52, %v665_v51  ;;  %v1197_v48 = vld [vmem:[%s2852_s7 + $0xdd8] sm:$0xff] }
 0x1ff   : > { %2179 = vst [vmem:[%s2867_s20 + $0xc88] sm:$0xff] %v1667_v57  ;;  %v667_v57 = vld [vmem:[%s2845_s19 + $0xd48] sm:$0xff]  ;;  %v1690_v62 = vadd.f32 %v1178_v55, %v666_v54  ;;  %v1198_v51 = vld [vmem:[%s2852_s7 + $0xde0] sm:$0xff] }
 0x200   : > { %2180 = vst [vmem:[%s2867_s20 + $0xc90] sm:$0xff] %v1668_v60  ;;  %v668_v60 = vld [vmem:[%s2845_s19 + $0xd50] sm:$0xff]  ;;  %v1691_v1 = vadd.f32 %v1179_v58, %v667_v57  ;;  %v1199_v54 = vld [vmem:[%s2852_s7 + $0xde8] sm:$0xff] }
 0x201   : > { %2181 = vst [vmem:[%s2867_s20 + $0xc98] sm:$0xff] %v1669_v63  ;;  %v669_v63 = vld [vmem:[%s2845_s19 + $0xd58] sm:$0xff]  ;;  %v1692_v4 = vadd.f32 %v1180_v61, %v668_v60  ;;  %v1200_v57 = vld [vmem:[%s2852_s7 + $0xdf0] sm:$0xff] }
 0x202   : > { %2182 = vst [vmem:[%s2867_s20 + $0xca0] sm:$0xff] %v1670_v2  ;;  %v670_v2 = vld [vmem:[%s2845_s19 + $0xd60] sm:$0xff]  ;;  %v1693_v7 = vadd.f32 %v1181_v0, %v669_v63  ;;  %v1201_v60 = vld [vmem:[%s2852_s7 + $0xdf8] sm:$0xff] }
 0x203   : > { %2183 = vst [vmem:[%s2867_s20 + $0xca8] sm:$0xff] %v1671_v5  ;;  %v671_v5 = vld [vmem:[%s2845_s19 + $0xd68] sm:$0xff]  ;;  %v1694_v10 = vadd.f32 %v1182_v3, %v670_v2  ;;  %v1202_v63 = vld [vmem:[%s2852_s7 + $0xe00] sm:$0xff] }
 0x204   : > { %2184 = vst [vmem:[%s2867_s20 + $0xcb0] sm:$0xff] %v1672_v8  ;;  %v672_v8 = vld [vmem:[%s2845_s19 + $0xd70] sm:$0xff]  ;;  %v1695_v13 = vadd.f32 %v1183_v6, %v671_v5  ;;  %v1203_v2 = vld [vmem:[%s2852_s7 + $0xe08] sm:$0xff] }
 0x205   : > { %2185 = vst [vmem:[%s2867_s20 + $0xcb8] sm:$0xff] %v1673_v11  ;;  %v673_v11 = vld [vmem:[%s2845_s19 + $0xd78] sm:$0xff]  ;;  %v1696_v16 = vadd.f32 %v1184_v9, %v672_v8  ;;  %v1204_v5 = vld [vmem:[%s2852_s7 + $0xe10] sm:$0xff] }
 0x206   : > { %2186 = vst [vmem:[%s2867_s20 + $0xcc0] sm:$0xff] %v1674_v14  ;;  %v674_v14 = vld [vmem:[%s2845_s19 + $0xd80] sm:$0xff]  ;;  %v1697_v19 = vadd.f32 %v1185_v12, %v673_v11  ;;  %v1205_v8 = vld [vmem:[%s2852_s7 + $0xe18] sm:$0xff] }
 0x207   : > { %2187 = vst [vmem:[%s2867_s20 + $0xcc8] sm:$0xff] %v1675_v17  ;;  %v675_v17 = vld [vmem:[%s2845_s19 + $0xd88] sm:$0xff]  ;;  %v1698_v22 = vadd.f32 %v1186_v15, %v674_v14  ;;  %v1206_v11 = vld [vmem:[%s2852_s7 + $0xe20] sm:$0xff] }
 0x208   : > { %2188 = vst [vmem:[%s2867_s20 + $0xcd0] sm:$0xff] %v1676_v20  ;;  %v676_v20 = vld [vmem:[%s2845_s19 + $0xd90] sm:$0xff]  ;;  %v1699_v25 = vadd.f32 %v1187_v18, %v675_v17  ;;  %v1207_v14 = vld [vmem:[%s2852_s7 + $0xe28] sm:$0xff] }
 0x209   : > { %2189 = vst [vmem:[%s2867_s20 + $0xcd8] sm:$0xff] %v1677_v23  ;;  %v677_v23 = vld [vmem:[%s2845_s19 + $0xd98] sm:$0xff]  ;;  %v1700_v28 = vadd.f32 %v1188_v21, %v676_v20  ;;  %v1208_v17 = vld [vmem:[%s2852_s7 + $0xe30] sm:$0xff] }
 0x20a   : > { %2190 = vst [vmem:[%s2867_s20 + $0xce0] sm:$0xff] %v1678_v26  ;;  %v678_v26 = vld [vmem:[%s2845_s19 + $0xda0] sm:$0xff]  ;;  %v1701_v31 = vadd.f32 %v1189_v24, %v677_v23  ;;  %v1209_v20 = vld [vmem:[%s2852_s7 + $0xe38] sm:$0xff] }
 0x20b   : > { %2191 = vst [vmem:[%s2867_s20 + $0xce8] sm:$0xff] %v1679_v29  ;;  %v679_v29 = vld [vmem:[%s2845_s19 + $0xda8] sm:$0xff]  ;;  %v1702_v34 = vadd.f32 %v1190_v27, %v678_v26  ;;  %v1210_v23 = vld [vmem:[%s2852_s7 + $0xe40] sm:$0xff] }
 0x20c   : > { %2192 = vst [vmem:[%s2867_s20 + $0xcf0] sm:$0xff] %v1680_v32  ;;  %v680_v32 = vld [vmem:[%s2845_s19 + $0xdb0] sm:$0xff]  ;;  %v1703_v37 = vadd.f32 %v1191_v30, %v679_v29  ;;  %v1211_v26 = vld [vmem:[%s2852_s7 + $0xe48] sm:$0xff] }
 0x20d   : > { %2193 = vst [vmem:[%s2867_s20 + $0xcf8] sm:$0xff] %v1681_v35  ;;  %v681_v35 = vld [vmem:[%s2845_s19 + $0xdb8] sm:$0xff]  ;;  %v1704_v40 = vadd.f32 %v1192_v33, %v680_v32  ;;  %v1212_v29 = vld [vmem:[%s2852_s7 + $0xe50] sm:$0xff] }
 0x20e   : > { %2194 = vst [vmem:[%s2867_s20 + $0xd00] sm:$0xff] %v1682_v38  ;;  %v682_v38 = vld [vmem:[%s2845_s19 + $0xdc0] sm:$0xff]  ;;  %v1705_v43 = vadd.f32 %v1193_v36, %v681_v35  ;;  %v1213_v32 = vld [vmem:[%s2852_s7 + $0xe58] sm:$0xff] }
 0x20f   : > { %2195 = vst [vmem:[%s2867_s20 + $0xd08] sm:$0xff] %v1683_v41  ;;  %v683_v41 = vld [vmem:[%s2845_s19 + $0xdc8] sm:$0xff]  ;;  %v1706_v46 = vadd.f32 %v1194_v39, %v682_v38  ;;  %v1214_v35 = vld [vmem:[%s2852_s7 + $0xe60] sm:$0xff] }
 0x210   : > { %2196 = vst [vmem:[%s2867_s20 + $0xd10] sm:$0xff] %v1684_v44  ;;  %v684_v44 = vld [vmem:[%s2845_s19 + $0xdd0] sm:$0xff]  ;;  %v1707_v49 = vadd.f32 %v1195_v42, %v683_v41  ;;  %v1215_v38 = vld [vmem:[%s2852_s7 + $0xe68] sm:$0xff] }
 0x211   : > { %2197 = vst [vmem:[%s2867_s20 + $0xd18] sm:$0xff] %v1685_v47  ;;  %v685_v47 = vld [vmem:[%s2845_s19 + $0xdd8] sm:$0xff]  ;;  %v1708_v52 = vadd.f32 %v1196_v45, %v684_v44  ;;  %v1216_v41 = vld [vmem:[%s2852_s7 + $0xe70] sm:$0xff] }
 0x212   : > { %2198 = vst [vmem:[%s2867_s20 + $0xd20] sm:$0xff] %v1686_v50  ;;  %v686_v50 = vld [vmem:[%s2845_s19 + $0xde0] sm:$0xff]  ;;  %v1709_v55 = vadd.f32 %v1197_v48, %v685_v47  ;;  %v1217_v44 = vld [vmem:[%s2852_s7 + $0xe78] sm:$0xff] }
 0x213   : > { %2199 = vst [vmem:[%s2867_s20 + $0xd28] sm:$0xff] %v1687_v53  ;;  %v687_v53 = vld [vmem:[%s2845_s19 + $0xde8] sm:$0xff]  ;;  %v1710_v58 = vadd.f32 %v1198_v51, %v686_v50  ;;  %v1218_v47 = vld [vmem:[%s2852_s7 + $0xe80] sm:$0xff] }
 0x214   : > { %2200 = vst [vmem:[%s2867_s20 + $0xd30] sm:$0xff] %v1688_v56  ;;  %v688_v56 = vld [vmem:[%s2845_s19 + $0xdf0] sm:$0xff]  ;;  %v1711_v61 = vadd.f32 %v1199_v54, %v687_v53  ;;  %v1219_v50 = vld [vmem:[%s2852_s7 + $0xe88] sm:$0xff] }
 0x215   : > { %2201 = vst [vmem:[%s2867_s20 + $0xd38] sm:$0xff] %v1689_v59  ;;  %v689_v59 = vld [vmem:[%s2845_s19 + $0xdf8] sm:$0xff]  ;;  %v1712_v0 = vadd.f32 %v1200_v57, %v688_v56  ;;  %v1220_v53 = vld [vmem:[%s2852_s7 + $0xe90] sm:$0xff] }
 0x216   : > { %2202 = vst [vmem:[%s2867_s20 + $0xd40] sm:$0xff] %v1690_v62  ;;  %v690_v62 = vld [vmem:[%s2845_s19 + $0xe00] sm:$0xff]  ;;  %v1713_v3 = vadd.f32 %v1201_v60, %v689_v59  ;;  %v1221_v56 = vld [vmem:[%s2852_s7 + $0xe98] sm:$0xff] }
 0x217   : > { %2203 = vst [vmem:[%s2867_s20 + $0xd48] sm:$0xff] %v1691_v1  ;;  %v691_v1 = vld [vmem:[%s2845_s19 + $0xe08] sm:$0xff]  ;;  %v1714_v6 = vadd.f32 %v1202_v63, %v690_v62  ;;  %v1222_v59 = vld [vmem:[%s2852_s7 + $0xea0] sm:$0xff] }
 0x218   : > { %2204 = vst [vmem:[%s2867_s20 + $0xd50] sm:$0xff] %v1692_v4  ;;  %v692_v4 = vld [vmem:[%s2845_s19 + $0xe10] sm:$0xff]  ;;  %v1715_v9 = vadd.f32 %v1203_v2, %v691_v1  ;;  %v1223_v62 = vld [vmem:[%s2852_s7 + $0xea8] sm:$0xff] }
 0x219   : > { %2205 = vst [vmem:[%s2867_s20 + $0xd58] sm:$0xff] %v1693_v7  ;;  %v693_v7 = vld [vmem:[%s2845_s19 + $0xe18] sm:$0xff]  ;;  %v1716_v12 = vadd.f32 %v1204_v5, %v692_v4  ;;  %v1224_v1 = vld [vmem:[%s2852_s7 + $0xeb0] sm:$0xff] }
 0x21a   : > { %2206 = vst [vmem:[%s2867_s20 + $0xd60] sm:$0xff] %v1694_v10  ;;  %v694_v10 = vld [vmem:[%s2845_s19 + $0xe20] sm:$0xff]  ;;  %v1717_v15 = vadd.f32 %v1205_v8, %v693_v7  ;;  %v1225_v4 = vld [vmem:[%s2852_s7 + $0xeb8] sm:$0xff] }
 0x21b   : > { %2207 = vst [vmem:[%s2867_s20 + $0xd68] sm:$0xff] %v1695_v13  ;;  %v695_v13 = vld [vmem:[%s2845_s19 + $0xe28] sm:$0xff]  ;;  %v1718_v18 = vadd.f32 %v1206_v11, %v694_v10  ;;  %v1226_v7 = vld [vmem:[%s2852_s7 + $0xec0] sm:$0xff] }
 0x21c   : > { %2208 = vst [vmem:[%s2867_s20 + $0xd70] sm:$0xff] %v1696_v16  ;;  %v696_v16 = vld [vmem:[%s2845_s19 + $0xe30] sm:$0xff]  ;;  %v1719_v21 = vadd.f32 %v1207_v14, %v695_v13  ;;  %v1227_v10 = vld [vmem:[%s2852_s7 + $0xec8] sm:$0xff] }
 0x21d   : > { %2209 = vst [vmem:[%s2867_s20 + $0xd78] sm:$0xff] %v1697_v19  ;;  %v697_v19 = vld [vmem:[%s2845_s19 + $0xe38] sm:$0xff]  ;;  %v1720_v24 = vadd.f32 %v1208_v17, %v696_v16  ;;  %v1228_v13 = vld [vmem:[%s2852_s7 + $0xed0] sm:$0xff] }
 0x21e   : > { %2210 = vst [vmem:[%s2867_s20 + $0xd80] sm:$0xff] %v1698_v22  ;;  %v698_v22 = vld [vmem:[%s2845_s19 + $0xe40] sm:$0xff]  ;;  %v1721_v27 = vadd.f32 %v1209_v20, %v697_v19  ;;  %v1229_v16 = vld [vmem:[%s2852_s7 + $0xed8] sm:$0xff] }
 0x21f   : > { %2211 = vst [vmem:[%s2867_s20 + $0xd88] sm:$0xff] %v1699_v25  ;;  %v699_v25 = vld [vmem:[%s2845_s19 + $0xe48] sm:$0xff]  ;;  %v1722_v30 = vadd.f32 %v1210_v23, %v698_v22  ;;  %v1230_v19 = vld [vmem:[%s2852_s7 + $0xee0] sm:$0xff] }
 0x220   : > { %2212 = vst [vmem:[%s2867_s20 + $0xd90] sm:$0xff] %v1700_v28  ;;  %v700_v28 = vld [vmem:[%s2845_s19 + $0xe50] sm:$0xff]  ;;  %v1723_v33 = vadd.f32 %v1211_v26, %v699_v25  ;;  %v1231_v22 = vld [vmem:[%s2852_s7 + $0xee8] sm:$0xff] }
 0x221   : > { %2213 = vst [vmem:[%s2867_s20 + $0xd98] sm:$0xff] %v1701_v31  ;;  %v701_v31 = vld [vmem:[%s2845_s19 + $0xe58] sm:$0xff]  ;;  %v1724_v36 = vadd.f32 %v1212_v29, %v700_v28  ;;  %v1232_v25 = vld [vmem:[%s2852_s7 + $0xef0] sm:$0xff] }
 0x222   : > { %2214 = vst [vmem:[%s2867_s20 + $0xda0] sm:$0xff] %v1702_v34  ;;  %v702_v34 = vld [vmem:[%s2845_s19 + $0xe60] sm:$0xff]  ;;  %v1725_v39 = vadd.f32 %v1213_v32, %v701_v31  ;;  %v1233_v28 = vld [vmem:[%s2852_s7 + $0xef8] sm:$0xff] }
 0x223   : > { %2215 = vst [vmem:[%s2867_s20 + $0xda8] sm:$0xff] %v1703_v37  ;;  %v703_v37 = vld [vmem:[%s2845_s19 + $0xe68] sm:$0xff]  ;;  %v1726_v42 = vadd.f32 %v1214_v35, %v702_v34  ;;  %v1234_v31 = vld [vmem:[%s2852_s7 + $0xf00] sm:$0xff] }
 0x224   : > { %2216 = vst [vmem:[%s2867_s20 + $0xdb0] sm:$0xff] %v1704_v40  ;;  %v704_v40 = vld [vmem:[%s2845_s19 + $0xe70] sm:$0xff]  ;;  %v1727_v45 = vadd.f32 %v1215_v38, %v703_v37  ;;  %v1235_v34 = vld [vmem:[%s2852_s7 + $0xf08] sm:$0xff] }
 0x225   : > { %2217 = vst [vmem:[%s2867_s20 + $0xdb8] sm:$0xff] %v1705_v43  ;;  %v705_v43 = vld [vmem:[%s2845_s19 + $0xe78] sm:$0xff]  ;;  %v1728_v48 = vadd.f32 %v1216_v41, %v704_v40  ;;  %v1236_v37 = vld [vmem:[%s2852_s7 + $0xf10] sm:$0xff] }
 0x226   : > { %2218 = vst [vmem:[%s2867_s20 + $0xdc0] sm:$0xff] %v1706_v46  ;;  %v706_v46 = vld [vmem:[%s2845_s19 + $0xe80] sm:$0xff]  ;;  %v1729_v51 = vadd.f32 %v1217_v44, %v705_v43  ;;  %v1237_v40 = vld [vmem:[%s2852_s7 + $0xf18] sm:$0xff] }
 0x227   : > { %2219 = vst [vmem:[%s2867_s20 + $0xdc8] sm:$0xff] %v1707_v49  ;;  %v707_v49 = vld [vmem:[%s2845_s19 + $0xe88] sm:$0xff]  ;;  %v1730_v54 = vadd.f32 %v1218_v47, %v706_v46  ;;  %v1238_v43 = vld [vmem:[%s2852_s7 + $0xf20] sm:$0xff] }
 0x228   : > { %2220 = vst [vmem:[%s2867_s20 + $0xdd0] sm:$0xff] %v1708_v52  ;;  %v708_v52 = vld [vmem:[%s2845_s19 + $0xe90] sm:$0xff]  ;;  %v1731_v57 = vadd.f32 %v1219_v50, %v707_v49  ;;  %v1239_v46 = vld [vmem:[%s2852_s7 + $0xf28] sm:$0xff] }
 0x229   : > { %2221 = vst [vmem:[%s2867_s20 + $0xdd8] sm:$0xff] %v1709_v55  ;;  %v709_v55 = vld [vmem:[%s2845_s19 + $0xe98] sm:$0xff]  ;;  %v1732_v60 = vadd.f32 %v1220_v53, %v708_v52  ;;  %v1240_v49 = vld [vmem:[%s2852_s7 + $0xf30] sm:$0xff] }
 0x22a   : > { %2222 = vst [vmem:[%s2867_s20 + $0xde0] sm:$0xff] %v1710_v58  ;;  %v710_v58 = vld [vmem:[%s2845_s19 + $0xea0] sm:$0xff]  ;;  %v1733_v63 = vadd.f32 %v1221_v56, %v709_v55  ;;  %v1241_v52 = vld [vmem:[%s2852_s7 + $0xf38] sm:$0xff] }
 0x22b   : > { %2223 = vst [vmem:[%s2867_s20 + $0xde8] sm:$0xff] %v1711_v61  ;;  %v711_v61 = vld [vmem:[%s2845_s19 + $0xea8] sm:$0xff]  ;;  %v1734_v2 = vadd.f32 %v1222_v59, %v710_v58  ;;  %v1242_v55 = vld [vmem:[%s2852_s7 + $0xf40] sm:$0xff] }
 0x22c   : > { %2224 = vst [vmem:[%s2867_s20 + $0xdf0] sm:$0xff] %v1712_v0  ;;  %v712_v0 = vld [vmem:[%s2845_s19 + $0xeb0] sm:$0xff]  ;;  %v1735_v5 = vadd.f32 %v1223_v62, %v711_v61  ;;  %v1243_v58 = vld [vmem:[%s2852_s7 + $0xf48] sm:$0xff] }
 0x22d   : > { %2225 = vst [vmem:[%s2867_s20 + $0xdf8] sm:$0xff] %v1713_v3  ;;  %v713_v3 = vld [vmem:[%s2845_s19 + $0xeb8] sm:$0xff]  ;;  %v1736_v8 = vadd.f32 %v1224_v1, %v712_v0  ;;  %v1244_v61 = vld [vmem:[%s2852_s7 + $0xf50] sm:$0xff] }
 0x22e   : > { %2226 = vst [vmem:[%s2867_s20 + $0xe00] sm:$0xff] %v1714_v6  ;;  %v714_v6 = vld [vmem:[%s2845_s19 + $0xec0] sm:$0xff]  ;;  %v1737_v11 = vadd.f32 %v1225_v4, %v713_v3  ;;  %v1245_v0 = vld [vmem:[%s2852_s7 + $0xf58] sm:$0xff] }
 0x22f   : > { %2227 = vst [vmem:[%s2867_s20 + $0xe08] sm:$0xff] %v1715_v9  ;;  %v715_v9 = vld [vmem:[%s2845_s19 + $0xec8] sm:$0xff]  ;;  %v1738_v14 = vadd.f32 %v1226_v7, %v714_v6  ;;  %v1246_v3 = vld [vmem:[%s2852_s7 + $0xf60] sm:$0xff] }
 0x230   : > { %2228 = vst [vmem:[%s2867_s20 + $0xe10] sm:$0xff] %v1716_v12  ;;  %v716_v12 = vld [vmem:[%s2845_s19 + $0xed0] sm:$0xff]  ;;  %v1739_v17 = vadd.f32 %v1227_v10, %v715_v9  ;;  %v1247_v6 = vld [vmem:[%s2852_s7 + $0xf68] sm:$0xff] }
 0x231   : > { %2229 = vst [vmem:[%s2867_s20 + $0xe18] sm:$0xff] %v1717_v15  ;;  %v717_v15 = vld [vmem:[%s2845_s19 + $0xed8] sm:$0xff]  ;;  %v1740_v20 = vadd.f32 %v1228_v13, %v716_v12  ;;  %v1248_v9 = vld [vmem:[%s2852_s7 + $0xf70] sm:$0xff] }
 0x232   : > { %2230 = vst [vmem:[%s2867_s20 + $0xe20] sm:$0xff] %v1718_v18  ;;  %v718_v18 = vld [vmem:[%s2845_s19 + $0xee0] sm:$0xff]  ;;  %v1741_v23 = vadd.f32 %v1229_v16, %v717_v15  ;;  %v1249_v12 = vld [vmem:[%s2852_s7 + $0xf78] sm:$0xff] }
 0x233   : > { %2231 = vst [vmem:[%s2867_s20 + $0xe28] sm:$0xff] %v1719_v21  ;;  %v719_v21 = vld [vmem:[%s2845_s19 + $0xee8] sm:$0xff]  ;;  %v1742_v26 = vadd.f32 %v1230_v19, %v718_v18  ;;  %v1250_v15 = vld [vmem:[%s2852_s7 + $0xf80] sm:$0xff] }
 0x234   : > { %2232 = vst [vmem:[%s2867_s20 + $0xe30] sm:$0xff] %v1720_v24  ;;  %v720_v24 = vld [vmem:[%s2845_s19 + $0xef0] sm:$0xff]  ;;  %v1743_v29 = vadd.f32 %v1231_v22, %v719_v21  ;;  %v1251_v18 = vld [vmem:[%s2852_s7 + $0xf88] sm:$0xff] }
 0x235   : > { %2233 = vst [vmem:[%s2867_s20 + $0xe38] sm:$0xff] %v1721_v27  ;;  %v721_v27 = vld [vmem:[%s2845_s19 + $0xef8] sm:$0xff]  ;;  %v1744_v32 = vadd.f32 %v1232_v25, %v720_v24  ;;  %v1252_v21 = vld [vmem:[%s2852_s7 + $0xf90] sm:$0xff] }
 0x236   : > { %2234 = vst [vmem:[%s2867_s20 + $0xe40] sm:$0xff] %v1722_v30  ;;  %v722_v30 = vld [vmem:[%s2845_s19 + $0xf00] sm:$0xff]  ;;  %v1745_v35 = vadd.f32 %v1233_v28, %v721_v27  ;;  %v1253_v24 = vld [vmem:[%s2852_s7 + $0xf98] sm:$0xff] }
 0x237   : > { %2235 = vst [vmem:[%s2867_s20 + $0xe48] sm:$0xff] %v1723_v33  ;;  %v723_v33 = vld [vmem:[%s2845_s19 + $0xf08] sm:$0xff]  ;;  %v1746_v38 = vadd.f32 %v1234_v31, %v722_v30  ;;  %v1254_v27 = vld [vmem:[%s2852_s7 + $0xfa0] sm:$0xff] }
 0x238   : > { %2236 = vst [vmem:[%s2867_s20 + $0xe50] sm:$0xff] %v1724_v36  ;;  %v724_v36 = vld [vmem:[%s2845_s19 + $0xf10] sm:$0xff]  ;;  %v1747_v41 = vadd.f32 %v1235_v34, %v723_v33  ;;  %v1255_v30 = vld [vmem:[%s2852_s7 + $0xfa8] sm:$0xff] }
 0x239   : > { %2237 = vst [vmem:[%s2867_s20 + $0xe58] sm:$0xff] %v1725_v39  ;;  %v725_v39 = vld [vmem:[%s2845_s19 + $0xf18] sm:$0xff]  ;;  %v1748_v44 = vadd.f32 %v1236_v37, %v724_v36  ;;  %v1256_v33 = vld [vmem:[%s2852_s7 + $0xfb0] sm:$0xff] }
 0x23a   : > { %2238 = vst [vmem:[%s2867_s20 + $0xe60] sm:$0xff] %v1726_v42  ;;  %v726_v42 = vld [vmem:[%s2845_s19 + $0xf20] sm:$0xff]  ;;  %v1749_v47 = vadd.f32 %v1237_v40, %v725_v39  ;;  %v1257_v36 = vld [vmem:[%s2852_s7 + $0xfb8] sm:$0xff] }
 0x23b   : > { %2239 = vst [vmem:[%s2867_s20 + $0xe68] sm:$0xff] %v1727_v45  ;;  %v727_v45 = vld [vmem:[%s2845_s19 + $0xf28] sm:$0xff]  ;;  %v1750_v50 = vadd.f32 %v1238_v43, %v726_v42  ;;  %v1258_v39 = vld [vmem:[%s2852_s7 + $0xfc0] sm:$0xff] }
 0x23c   : > { %2240 = vst [vmem:[%s2867_s20 + $0xe70] sm:$0xff] %v1728_v48  ;;  %v728_v48 = vld [vmem:[%s2845_s19 + $0xf30] sm:$0xff]  ;;  %v1751_v53 = vadd.f32 %v1239_v46, %v727_v45  ;;  %v1259_v42 = vld [vmem:[%s2852_s7 + $0xfc8] sm:$0xff] }
 0x23d   : > { %2241 = vst [vmem:[%s2867_s20 + $0xe78] sm:$0xff] %v1729_v51  ;;  %v729_v51 = vld [vmem:[%s2845_s19 + $0xf38] sm:$0xff]  ;;  %v1752_v56 = vadd.f32 %v1240_v49, %v728_v48  ;;  %v1260_v45 = vld [vmem:[%s2852_s7 + $0xfd0] sm:$0xff] }
 0x23e   : > { %2242 = vst [vmem:[%s2867_s20 + $0xe80] sm:$0xff] %v1730_v54  ;;  %v730_v54 = vld [vmem:[%s2845_s19 + $0xf40] sm:$0xff]  ;;  %v1753_v59 = vadd.f32 %v1241_v52, %v729_v51  ;;  %v1261_v48 = vld [vmem:[%s2852_s7 + $0xfd8] sm:$0xff] }
 0x23f   : > { %2243 = vst [vmem:[%s2867_s20 + $0xe88] sm:$0xff] %v1731_v57  ;;  %v731_v57 = vld [vmem:[%s2845_s19 + $0xf48] sm:$0xff]  ;;  %v1754_v62 = vadd.f32 %v1242_v55, %v730_v54  ;;  %v1262_v51 = vld [vmem:[%s2852_s7 + $0xfe0] sm:$0xff] }
 0x240   : > { %2244 = vst [vmem:[%s2867_s20 + $0xe90] sm:$0xff] %v1732_v60  ;;  %v732_v60 = vld [vmem:[%s2845_s19 + $0xf50] sm:$0xff]  ;;  %v1755_v1 = vadd.f32 %v1243_v58, %v731_v57  ;;  %v1263_v54 = vld [vmem:[%s2852_s7 + $0xfe8] sm:$0xff] }
 0x241   : > { %2245 = vst [vmem:[%s2867_s20 + $0xe98] sm:$0xff] %v1733_v63  ;;  %v733_v63 = vld [vmem:[%s2845_s19 + $0xf58] sm:$0xff]  ;;  %v1756_v4 = vadd.f32 %v1244_v61, %v732_v60  ;;  %v1264_v57 = vld [vmem:[%s2852_s7 + $0xff0] sm:$0xff] }
 0x242   : > { %2246 = vst [vmem:[%s2867_s20 + $0xea0] sm:$0xff] %v1734_v2  ;;  %v734_v2 = vld [vmem:[%s2845_s19 + $0xf60] sm:$0xff]  ;;  %v1757_v7 = vadd.f32 %v1245_v0, %v733_v63  ;;  %v1265_v60 = vld [vmem:[%s2852_s7 + $0xff8] sm:$0xff] }
 0x243   : > { %2247 = vst [vmem:[%s2867_s20 + $0xea8] sm:$0xff] %v1735_v5  ;;  %v735_v5 = vld [vmem:[%s2845_s19 + $0xf68] sm:$0xff]  ;;  %v1758_v10 = vadd.f32 %v1246_v3, %v734_v2 }
 0x244   : > { %2248 = vst [vmem:[%s2867_s20 + $0xeb0] sm:$0xff] %v1736_v8  ;;  %v736_v8 = vld [vmem:[%s2845_s19 + $0xf70] sm:$0xff]  ;;  %v1759_v13 = vadd.f32 %v1247_v6, %v735_v5 }
 0x245   : > { %2249 = vst [vmem:[%s2867_s20 + $0xeb8] sm:$0xff] %v1737_v11  ;;  %v737_v11 = vld [vmem:[%s2845_s19 + $0xf78] sm:$0xff]  ;;  %v1760_v16 = vadd.f32 %v1248_v9, %v736_v8 }
 0x246   : > { %2250 = vst [vmem:[%s2867_s20 + $0xec0] sm:$0xff] %v1738_v14  ;;  %v738_v14 = vld [vmem:[%s2845_s19 + $0xf80] sm:$0xff]  ;;  %v1761_v19 = vadd.f32 %v1249_v12, %v737_v11 }
 0x247   : > { %2251 = vst [vmem:[%s2867_s20 + $0xec8] sm:$0xff] %v1739_v17  ;;  %v739_v17 = vld [vmem:[%s2845_s19 + $0xf88] sm:$0xff]  ;;  %v1762_v22 = vadd.f32 %v1250_v15, %v738_v14 }
 0x248   : > { %2252 = vst [vmem:[%s2867_s20 + $0xed0] sm:$0xff] %v1740_v20  ;;  %v740_v20 = vld [vmem:[%s2845_s19 + $0xf90] sm:$0xff]  ;;  %v1763_v25 = vadd.f32 %v1251_v18, %v739_v17 }
 0x249   : > { %2253 = vst [vmem:[%s2867_s20 + $0xed8] sm:$0xff] %v1741_v23  ;;  %v741_v23 = vld [vmem:[%s2845_s19 + $0xf98] sm:$0xff]  ;;  %v1764_v28 = vadd.f32 %v1252_v21, %v740_v20 }
 0x24a   : > { %2254 = vst [vmem:[%s2867_s20 + $0xee0] sm:$0xff] %v1742_v26  ;;  %v742_v26 = vld [vmem:[%s2845_s19 + $0xfa0] sm:$0xff]  ;;  %v1765_v31 = vadd.f32 %v1253_v24, %v741_v23 }
 0x24b   : > { %2255 = vst [vmem:[%s2867_s20 + $0xee8] sm:$0xff] %v1743_v29  ;;  %v743_v29 = vld [vmem:[%s2845_s19 + $0xfa8] sm:$0xff]  ;;  %v1766_v34 = vadd.f32 %v1254_v27, %v742_v26 }
 0x24c   : > { %2256 = vst [vmem:[%s2867_s20 + $0xef0] sm:$0xff] %v1744_v32  ;;  %v744_v32 = vld [vmem:[%s2845_s19 + $0xfb0] sm:$0xff]  ;;  %v1767_v37 = vadd.f32 %v1255_v30, %v743_v29 }
 0x24d   : > { %2257 = vst [vmem:[%s2867_s20 + $0xef8] sm:$0xff] %v1745_v35  ;;  %v745_v35 = vld [vmem:[%s2845_s19 + $0xfb8] sm:$0xff]  ;;  %v1768_v40 = vadd.f32 %v1256_v33, %v744_v32 }
 0x24e   : > { %2258 = vst [vmem:[%s2867_s20 + $0xf00] sm:$0xff] %v1746_v38  ;;  %v746_v38 = vld [vmem:[%s2845_s19 + $0xfc0] sm:$0xff]  ;;  %v1769_v43 = vadd.f32 %v1257_v36, %v745_v35 }
 0x24f   : > { %2259 = vst [vmem:[%s2867_s20 + $0xf08] sm:$0xff] %v1747_v41  ;;  %v747_v41 = vld [vmem:[%s2845_s19 + $0xfc8] sm:$0xff]  ;;  %v1770_v46 = vadd.f32 %v1258_v39, %v746_v38 }
 0x250   : > { %2260 = vst [vmem:[%s2867_s20 + $0xf10] sm:$0xff] %v1748_v44  ;;  %v748_v44 = vld [vmem:[%s2845_s19 + $0xfd0] sm:$0xff]  ;;  %v1771_v49 = vadd.f32 %v1259_v42, %v747_v41 }
 0x251   : > { %2261 = vst [vmem:[%s2867_s20 + $0xf18] sm:$0xff] %v1749_v47  ;;  %v749_v47 = vld [vmem:[%s2845_s19 + $0xfd8] sm:$0xff]  ;;  %v1772_v52 = vadd.f32 %v1260_v45, %v748_v44 }
 0x252   : > { %2262 = vst [vmem:[%s2867_s20 + $0xf20] sm:$0xff] %v1750_v50  ;;  %v750_v50 = vld [vmem:[%s2845_s19 + $0xfe0] sm:$0xff]  ;;  %v1773_v55 = vadd.f32 %v1261_v48, %v749_v47 }
 0x253   : > { %2263 = vst [vmem:[%s2867_s20 + $0xf28] sm:$0xff] %v1751_v53  ;;  %v751_v53 = vld [vmem:[%s2845_s19 + $0xfe8] sm:$0xff]  ;;  %v1774_v58 = vadd.f32 %v1262_v51, %v750_v50 }
 0x254   : > { %2264 = vst [vmem:[%s2867_s20 + $0xf30] sm:$0xff] %v1752_v56  ;;  %v752_v56 = vld [vmem:[%s2845_s19 + $0xff0] sm:$0xff]  ;;  %v1775_v61 = vadd.f32 %v1263_v54, %v751_v53 }
 0x255   : > { %2265 = vst [vmem:[%s2867_s20 + $0xf38] sm:$0xff] %v1753_v59  ;;  %v753_v59 = vld [vmem:[%s2845_s19 + $0xff8] sm:$0xff] }
 0x256   : > { %2266 = vst [vmem:[%s2867_s20 + $0xf40] sm:$0xff] %v1754_v62  ;;  %v1776_v62 = vadd.f32 %v1264_v57, %v752_v56  ;;  %v1777_v63 = vadd.f32 %v1265_v60, %v753_v59 }
 0x257   : > { %2267 = vst [vmem:[%s2867_s20 + $0xf48] sm:$0xff] %v1755_v1 }
 0x258   : > { %2268 = vst [vmem:[%s2867_s20 + $0xf50] sm:$0xff] %v1756_v4 }
 0x259   : > { %2269 = vst [vmem:[%s2867_s20 + $0xf58] sm:$0xff] %v1757_v7 }
 0x25a   : > { %2270 = vst [vmem:[%s2867_s20 + $0xf60] sm:$0xff] %v1758_v10 }
 0x25b   : > { %2271 = vst [vmem:[%s2867_s20 + $0xf68] sm:$0xff] %v1759_v13 }
 0x25c   : > { %2272 = vst [vmem:[%s2867_s20 + $0xf70] sm:$0xff] %v1760_v16 }
 0x25d   : > { %2273 = vst [vmem:[%s2867_s20 + $0xf78] sm:$0xff] %v1761_v19 }
 0x25e   : > { %2274 = vst [vmem:[%s2867_s20 + $0xf80] sm:$0xff] %v1762_v22 }
 0x25f   : > { %2275 = vst [vmem:[%s2867_s20 + $0xf88] sm:$0xff] %v1763_v25 }
 0x260   : > { %2276 = vst [vmem:[%s2867_s20 + $0xf90] sm:$0xff] %v1764_v28 }
 0x261   : > { %2277 = vst [vmem:[%s2867_s20 + $0xf98] sm:$0xff] %v1765_v31 }
 0x262   : > { %2278 = vst [vmem:[%s2867_s20 + $0xfa0] sm:$0xff] %v1766_v34 }
 0x263   : > { %2279 = vst [vmem:[%s2867_s20 + $0xfa8] sm:$0xff] %v1767_v37 }
 0x264   : > { %2280 = vst [vmem:[%s2867_s20 + $0xfb0] sm:$0xff] %v1768_v40 }
 0x265   : > { %2281 = vst [vmem:[%s2867_s20 + $0xfb8] sm:$0xff] %v1769_v43 }
 0x266   : > { %2282 = vst [vmem:[%s2867_s20 + $0xfc0] sm:$0xff] %v1770_v46 }
 0x267   : > { %2283 = vst [vmem:[%s2867_s20 + $0xfc8] sm:$0xff] %v1771_v49 }
 0x268   : > { %2284 = vst [vmem:[%s2867_s20 + $0xfd0] sm:$0xff] %v1772_v52 }
 0x269   : > { %2285 = vst [vmem:[%s2867_s20 + $0xfd8] sm:$0xff] %v1773_v55  ;;  %2297 = sbr.rel (!%p2735_p9) target bundleno = 653 (0x28d), region = 40 }
 0x26a   : > { %2286 = vst [vmem:[%s2867_s20 + $0xfe0] sm:$0xff] %v1774_v58 }
 0x26b   : > { %2287 = vst [vmem:[%s2867_s20 + $0xfe8] sm:$0xff] %v1775_v61 }
 0x26c   : > { %2288 = vst [vmem:[%s2867_s20 + $0xff0] sm:$0xff] %v1776_v62 }
 0x26d   : > { %2289 = vst [vmem:[%s2867_s20 + $0xff8] sm:$0xff] %v1777_v63 }
 0x26e   : > { %s4478_s23 = smov (!%p2300_p6, %s2299_s23), 128 }
 0x26f   : > { %s2453_s6 = sshll.u32 %s4478_s23, 5 }
 0x270   : > { %s2304_s4 = ssub.s32 4096, %s2453_s6 }
 0x271   : > { %s2305_s26 = sshll.u32 %s2304_s4, 4 }
 0x272   : > { %2306 = vsyncadd %s2291_s8, %s2305_s26  ;;  %p4405_p5 = scmp.ne.s32.totalorder %s2453_s6, 0  ;;  %s2455_s30 = sshll.u32 %s2708_s13, 12 }
 0x273   : > { %s2310_s17 = scalar_lea.hbm %s4460_s2, %s2455_s30  ;;  %s2312_s25 = sshll.u32 %s2867_s20, 4  ;;  %s4414_s25 = int_to_ptr.vmem [resolvable:$true] %s2312_s25 }
 0x274   : > { %s2314_s28 = sshll.u32 %s2310_s17, 4  ;;  %s2444_s29 = sshll.u32 %s4478_s23, 9  ;;  %s4416_s28 = int_to_ptr.hbm [resolvable:$true] %s2314_s28 }
 0x275   : > { %s2580_s5 = sshra.s32 %s4414_s25, 4  ;;  %s2582_s19 = sshrl.u32 %s2444_s29, 4  ;;  %s2581_s5 = int_to_ptr.vmem [resolvable:$true] %s2580_s5 }
 0x276   : > { %s2587_s3 = scalar_lea.vmem %s2581_s5, %s2582_s19  ;;  %s2669_s13 = smov [#allocation7]  }
 0x277   : > { %p2588_p9 = scmp.ne.s32.totalorder %s2581_s5, %s2587_s3  ;;  %s2591_s7 = scalar_lea.vmem %s2669_s13, 8192 }
 0x278   : > { %p2593_p11 = scmp.lt.s32.totalorder %s2591_s7, %s2587_s3 }
 0x279   : > { %p2589_p7 = pnand %p2588_p9, %p4405_p5 }
 0x27b   : > { %p2590_p8 = pneg %p2589_p7 }
 0x27d   : > { %p2595_p12 = pnand %p2593_p11, %p2590_p8 }
 0x27f   : > { %2598 = shalt.err (!%p2595_p12)
}
 0x280   : > { %s2599_s20 = sshra.s32 %s4416_s28, 4  ;;  %s2610_s26 = scalar_lea.hbm %s4460_s2, 12000  ;;  %s2600_s20 = int_to_ptr.hbm [resolvable:$true] %s2599_s20 }
 0x281   : > { %s2606_s27 = scalar_lea.hbm %s2600_s20, %s2582_s19  ;;  %p2611_p13 = scmp.lt.s32.totalorder %s2600_s20, %s4460_s2 }
 0x282   : > { %p2607_p0 = scmp.ne.s32.totalorder %s2600_s20, %s2606_s27  ;;  %p2612_p2 = scmp.lt.s32.totalorder %s2610_s26, %s2606_s27 }
 0x284   : > { %p2608_p1 = pnand %p2607_p0, %p4405_p5  ;;  %p2613_p3 = por %p2612_p2, %p2611_p13 }
 0x286   : > { %p2609_p10 = pneg %p2608_p1 }
 0x288   : > { %p2614_p4 = pnand %p2613_p3, %p2609_p10 }
 0x28a   : > { %2617 = shalt.err (!%p2614_p4)
}
 0x28b   : > { %s2670_s16 = smov 512   ;;  %s2671_s17 = smov 32  }
 0x28c   : > { %2320 = dma.vmem_to_hbm [thread:$0]  (%p4405_p5), %s4414_s25, %s2444_s29, %s4416_s28, %s2291_s8, %s2670_s16, %s2670_s16, %s2671_s17  }
 0x28d PF: > { %p2463_p6 = scmp.ge.s32.totalorder %s2661_s12, 2  ;;  %s2329_s5 = sand.u32 1, %s2649_s9  }
 0x28e   : > { %p4468_p9 = scmp.ne.s32.totalorder %s4464_s22, 0  ;;  %s2330_s19 = scalar_lea.sflag [#allocation4], %s2329_s5 }
 0x290   : > { %p2460_p7 = pnand %p2463_p6, %p4468_p9 }
 0x292   : > { %p2461_p8 = pneg %p2460_p7 }
 0x294   : > { %2644 = dma.done.wait (%p2461_p8), %s2330_s19, 65536  }
 0x295   : > { %2646 = vsyncadd (%p2461_p8), %s2330_s19, 4294901760  ;;  %p18_p11 = scmp.ge.s32.totalorder %s2712_s15, 5   ;;  %s4469_s9 = smov %s2653_s10 }
 0x296   : > { %s4470_s10 = smov %s2657_s11  ;;  %s4471_s11 = smov %s2724_s18 }
 0x297   : > { %s4472_s12 = smov %s2712_s15  ;;  %20 = sbr.rel (!%p18_p11) target bundleno = 7 (0x7), region = 86 }
 0x29c   :  { %2336 = vsyncpa [#allocation3], 1 }
 0x29d   :  { %2338 = vsyncpa [#allocation3 + $0x1], 1 }
 0x29e   :  { %2339 = vsyncpa [#allocation6], 1 }
 0x29f   :  { %2341 = vsyncpa [#allocation6 + $0x1], 1 }
 0x2a0   :  { %2342 = vsyncpa [#allocation4], 1 }
 0x2a1   :  { %2344 = vsyncpa [#allocation4 + $0x1], 1 }

</bundles_post_ra>
